<compile_context>
chip_gen: v7x
topology: tpu7x:2x2x1
jax: 0.10.0
libtpu: 0.0.40
codegen_flags: <defaults>
</compile_context>

<pallas_src>
import jax
import jax.numpy as jnp
from jax import lax
from jax.experimental import pallas as pl
from jax.experimental.pallas import tpu as pltpu

THRESHOLD = 1.0   # snntorch Leaky default threshold
BETA = 0.9        # membrane decay; unused for a single step with zero-init mem
KSIZE = 5         # kernel_size implied by fc1 = Linear(64*4*4, 10) on 28x28 input

# layer geometry (fixed by the architecture: 28x28x1 input)
H1, W1_IN, C0 = 28, 28, 1          # conv1 input
C1, PH1, PW1 = 12, 12, 12          # conv1 channels, pooled output 12x12
W2_IN = 12                         # conv2 input width
C2, PH2, PW2 = 64, 4, 4            # conv2 channels, pooled output 4x4
NCLS = 10
NPAD = 128                         # classes padded to a full lane tile


def _round_up(n, m):
    return ((n + m - 1) // m) * m


# ----------------------------- the fused Pallas kernel -----------------------

def _convsnn_kernel(x_ref, bk1_ref, b1_ref, bk2_ref, b2_ref, wfc_ref, bfc_ref,
                    spk_ref, mem_ref):
    """Whole ConvSNN forward for one batch tile of Bt elements.

    x_ref  : (2, 12, Bt, 140) bf16  kh-stacked conv1 LHS: x_ref[dh,ph,b,kh*28+w]
                                    = image[b, 2*ph+dh+kh, w]
    bk1_ref: (140, 288) bf16        conv1 band matrix; rows (kh,w), cols (dw,pw,c1)
    b1_ref : (1, 144)   f32         conv1 bias tiled over pw
    bk2_ref: (720, 512) bf16        conv2 band matrix; rows (kh,w,c1), cols (dw,pw,c2)
    b2_ref : (1, 256)   f32         conv2 bias tiled over pw
    wfc_ref: (1024, 128) bf16       fc1 weight, rows (ph,pw,c2) (PyTorch NCHW flatten
                                    re-ordered), cols zero-padded 10 -> 128
    bfc_ref: (1, 128)   f32
    spk_ref, mem_ref: (Bt, 128) f32 (first 10 columns are real)
    """
    bt = x_ref.shape[2]
    f32, bf16 = jnp.float32, jnp.bfloat16

    # ---- layer 1: conv1(1->12,k=5) + maxpool(2,2) + lif1 : ONE dot -------------
    lhs1 = x_ref[...].reshape(2 * PH1 * bt, KSIZE * W1_IN)             # (24Bt,140)
    cur1 = jnp.dot(lhs1, bk1_ref[...], preferred_element_type=f32)     # (24Bt,288)
    cur1 = cur1.reshape(2, PH1 * bt, 2 * PW1 * C1)
    cur1 = jnp.maximum(cur1[0], cur1[1])                               # max over dh
    pooled1 = jnp.maximum(cur1[:, :PW1 * C1], cur1[:, PW1 * C1:])      # max over dw
    spk1 = ((pooled1 + b1_ref[...]) > THRESHOLD).astype(bf16)          # (12Bt,144)

    # split spk1 rows by parity of ph so the layer-2 row windows are unit-stride
    spk1_r = spk1.reshape(PH1 // 2, 2, bt, PW1 * C1)                   # (6,2,Bt,144)
    spk1_par = (spk1_r[:, 0], spk1_r[:, 1])                            # (6,Bt,144) each

    # ---- layer 2: conv2(12->64,k=5) + maxpool(2,2) + lif2 : ONE dot ------------
    # LHS rows (dh,ph2,b), cols (kh, w=pw1, ci=c1): kh-stacked via lane concat.
    lhs2_dh = []
    for dh in range(2):
        pieces = []
        for kh in range(KSIZE):
            s = dh + kh                                                # spk1 row offset
            pieces.append(spk1_par[s % 2][s // 2:s // 2 + PH2])        # (4,Bt,144)
        lhs2_dh.append(jnp.concatenate(pieces, axis=-1))               # (4,Bt,720)
    lhs2 = jnp.concatenate(lhs2_dh, axis=0)                            # (8,Bt,720)
    lhs2 = lhs2.reshape(2 * PH2 * bt, KSIZE * W2_IN * C1)
    cur2 = jnp.dot(lhs2, bk2_ref[...], preferred_element_type=f32)     # (8Bt,512)
    cur2 = cur2.reshape(2, PH2 * bt, 2 * PW2 * C2)
    cur2 = jnp.maximum(cur2[0], cur2[1])                               # max over dh
    pooled2 = jnp.maximum(cur2[:, :PW2 * C2], cur2[:, PW2 * C2:])      # max over dw
    spk2 = ((pooled2 + b2_ref[...]) > THRESHOLD).astype(bf16)          # (4Bt,256)

    # ---- layer 3: fc1 + lif3 : ONE lane-dense dot ------------------------------
    spk2_r = spk2.reshape(PH2, bt, PW2 * C2)                           # (4,Bt,256)
    lhs3 = jnp.concatenate([spk2_r[p] for p in range(PH2)], axis=-1)   # (Bt,1024)
    mem3 = jnp.dot(lhs3, wfc_ref[...], preferred_element_type=f32) + bfc_ref[...]
    mem_ref[...] = mem3
    spk_ref[...] = (mem3 > THRESHOLD).astype(f32)


# ------------------------------ wrapper / prep -------------------------------

def _band_matrix(w_hwio, w_in, pw_out):
    """Band matrix with kh folded into rows and the pool column offset dw into cols.

    M[(kh, w, ci), (dw, pw, co)] = W[kh, w - (2*pw + dw), ci, co]   (0 if kw out of range)
    so that LHS[(dh,ph,b), (kh,w,ci)] @ M gives, per pooled column pw / channel co /
    offset dw, the conv output at spatial position (2*ph+dh, 2*pw+dw).
    """
    kh_, kw_, cin, cout = w_hwio.shape
    wi = jnp.arange(w_in)
    pw = jnp.arange(pw_out)
    halves = []
    for dw in range(2):
        kw_idx = wi[:, None] - (2 * pw[None, :] + dw)                 # (w_in, pw_out)
        valid = (kw_idx >= 0) & (kw_idx < kw_)
        kw_c = jnp.clip(kw_idx, 0, kw_ - 1)
        g = w_hwio[:, kw_c, :, :]                                     # (KH,w_in,pw,Cin,Cout)
        g = jnp.where(valid[None, :, :, None, None], g, 0.0)
        g = jnp.transpose(g, (0, 1, 3, 2, 4))                         # (KH,w_in,Cin,pw,Cout)
        halves.append(g.reshape(kh_ * w_in * cin, pw_out * cout))
    return jnp.concatenate(halves, axis=1)                            # (KH*w_in*Cin, 2*pw*Cout)


def conv_snn_forward(x_nchw, params, block_b=128):
    """Forward pass of ConvSNN. x_nchw: (B, 1, 28, 28). Returns (spk3, mem3), each (B, 10)."""
    w1, b1, w2, b2, wfc, bfc = params
    B = x_nchw.shape[0]

    # Batch tile: multiple of 16 (bf16 sublane tile) so every in-kernel
    # (lead, Bt, lanes) <-> (lead*Bt, lanes) reshape is a free relabeling.
    # block_b=128 keeps per-step VMEM (~14 MiB incl. double-buffered blocks) well under
    # the 32 MiB limit below on v5e/v6e/v7x; raise block_b and vmem_limit_bytes together.
    b16 = _round_up(B, 16)
    bt = min(_round_up(block_b, 16), b16)
    # v7x has 2 TensorCores: make the (parallel) batch grid >= 2 steps when possible.
    if b16 // bt < 2 and b16 >= 32:
        bt = _round_up((b16 + 1) // 2, 16)
    b_pad = _round_up(b16, bt)

    # ---- input prep: kh- and dh-stacked conv1 LHS (lane-dense, last dim 140) --------
    x2 = jnp.pad(x_nchw[:, 0, :, :].astype(jnp.float32),
                 ((0, b_pad - B), (0, 0), (0, 0)))                        # (b_pad,28,28)
    rows = (jnp.arange(2)[:, None, None] + 2 * jnp.arange(PH1)[None, :, None]
            + jnp.arange(KSIZE)[None, None, :])                           # (2,12,5): dh+2ph+kh
    xg = x2[:, rows, :]                                                   # (b_pad,2,12,5,28)
    x_l1 = jnp.transpose(xg, (1, 2, 0, 3, 4)).reshape(2, PH1, b_pad, KSIZE * W1_IN)
    x_l1 = x_l1.astype(jnp.bfloat16)

    # ---- weight prep (tiny, once per call) -------------------------------------------
    bk1 = _band_matrix(w1, W1_IN, PW1).astype(jnp.bfloat16)               # (140, 288)
    bk2 = _band_matrix(w2, W2_IN, PW2).astype(jnp.bfloat16)               # (720, 512)
    b1t = jnp.tile(b1, PW1).reshape(1, PW1 * C1).astype(jnp.float32)
    b2t = jnp.tile(b2, PW2).reshape(1, PW2 * C2).astype(jnp.float32)
    # fc1 weight: PyTorch NCHW flatten (c,h,w) rows re-ordered to (h,w,c), classes
    # zero-padded 10 -> 128 so the kernel output block is lane-dense.
    wfc_k = jnp.transpose(wfc.reshape(C2, PH2, PW2, NCLS), (1, 2, 0, 3))
    wfc_k = wfc_k.reshape(PH2 * PW2 * C2, NCLS)
    wfc_k = jnp.pad(wfc_k, ((0, 0), (0, NPAD - NCLS))).astype(jnp.bfloat16)
    bfc_p = jnp.pad(bfc.astype(jnp.float32), (0, NPAD - NCLS)).reshape(1, NPAD)

    # NOTE: the constant weight blocks (index (0,0)) could be single-buffered with
    # pipeline_mode=pl.Buffered(1) to free ~1 MiB of VMEM; unnecessary at Bt=128.
    spk3, mem3 = pl.pallas_call(
        _convsnn_kernel,
        out_shape=(jax.ShapeDtypeStruct((b_pad, NPAD), jnp.float32),
                   jax.ShapeDtypeStruct((b_pad, NPAD), jnp.float32)),
        grid=(b_pad // bt,),
        in_specs=[
            pl.BlockSpec((2, PH1, bt, KSIZE * W1_IN), lambda i: (0, 0, i, 0)),
            pl.BlockSpec((KSIZE * W1_IN * C0, 2 * PW1 * C1), lambda i: (0, 0)),
            pl.BlockSpec((1, PW1 * C1), lambda i: (0, 0)),
            pl.BlockSpec((KSIZE * W2_IN * C1, 2 * PW2 * C2), lambda i: (0, 0)),
            pl.BlockSpec((1, PW2 * C2), lambda i: (0, 0)),
            pl.BlockSpec((PH2 * PW2 * C2, NPAD), lambda i: (0, 0)),
            pl.BlockSpec((1, NPAD), lambda i: (0, 0)),
        ],
        out_specs=(pl.BlockSpec((bt, NPAD), lambda i: (i, 0)),
                   pl.BlockSpec((bt, NPAD), lambda i: (i, 0))),
        compiler_params=pltpu.CompilerParams(
            dimension_semantics=("parallel",),
            vmem_limit_bytes=32 * 1024 * 1024),
    )(x_l1, bk1, b1t, bk2, b2t, wfc_k, bfc_p)
    return spk3[:B, :NCLS], mem3[:B, :NCLS]


# ------------------------------ pure-JAX reference ---------------------------

def ref_forward(x_nchw, params):
    w1, b1, w2, b2, wfc, bfc = params
    x = jnp.transpose(x_nchw, (0, 2, 3, 1))

    def conv(z, w, b):
        return lax.conv_general_dilated(
            z, w, (1, 1), 'VALID',
            dimension_numbers=('NHWC', 'HWIO', 'NHWC'),
            precision=lax.Precision.HIGHEST) + b

    def pool(z):
        B, H, W, C = z.shape
        return z.reshape(B, H // 2, 2, W // 2, 2, C).max(axis=(2, 4))

    cur1 = pool(conv(x, w1, b1))
    spk1 = (cur1 > THRESHOLD).astype(jnp.float32)
    cur2 = pool(conv(spk1, w2, b2))
    spk2 = (cur2 > THRESHOLD).astype(jnp.float32)
    flat = jnp.transpose(spk2, (0, 3, 1, 2)).reshape(x.shape[0], -1)
    cur3 = jnp.dot(flat, wfc, precision=lax.Precision.HIGHEST) + bfc
    return (cur3 > THRESHOLD).astype(jnp.float32), cur3


# ---------------------------------- main --------------------------------------

if __name__ == "__main__":
    key = jax.random.PRNGKey(0)
    ks = jax.random.split(key, 7)

    # Deterministic PyTorch-style uniform(-1/sqrt(fan_in), 1/sqrt(fan_in)) init.
    def u(k, shape, fan_in):
        bnd = 1.0 / float(fan_in) ** 0.5
        return jax.random.uniform(k, shape, jnp.float32, -bnd, bnd)

    # The kernel feeds x / conv / fc weights to the MXU in bf16 (f32 accumulation).
    # Using bf16-representable test params & input makes the f32 reference agree with
    # the kernel up to f32 summation-order error (~1e-6), so the check is deterministic.
    def bf16_round(a):
        return a.astype(jnp.bfloat16).astype(jnp.float32)

    w1 = bf16_round(u(ks[0], (KSIZE, KSIZE, C0, C1), C0 * KSIZE * KSIZE))  # conv1 (HWIO)
    b1 = u(ks[1], (C1,), C0 * KSIZE * KSIZE)
    w2 = bf16_round(u(ks[2], (KSIZE, KSIZE, C1, C2), C1 * KSIZE * KSIZE))  # conv2 (HWIO)
    b2 = u(ks[3], (C2,), C1 * KSIZE * KSIZE)
    wfc = bf16_round(u(ks[4], (C2 * PH2 * PW2, NCLS), C2 * PH2 * PW2))     # fc1.weight.T
    bfc = u(ks[5], (NCLS,), C2 * PH2 * PW2)
    params = (w1, b1, w2, b2, wfc, bfc)

    # Input shape is fixed by the architecture (fc1 expects 64*4*4): (B, 1, 28, 28).
    x = bf16_round(2.0 * jax.random.normal(ks[6], (2, 1, 28, 28), jnp.float32))

    spk3, mem3 = jax.jit(conv_snn_forward)(x, params)
    jax.block_until_ready((spk3, mem3))

    # correctness check against pure-JAX reference
    spk_exp, mem_exp = ref_forward(x, params)
    assert spk3.shape == (2, 10) and mem3.shape == (2, 10)
    assert bool(jnp.allclose(mem3, mem_exp, rtol=2e-3, atol=2e-3)), "mem3 mismatch"
    tie = jnp.abs(mem_exp - THRESHOLD) < 1e-3   # tolerate flips only at exact-threshold ties
    assert bool(jnp.all((spk3 == spk_exp) | tie)), "spk3 mismatch"

    # TODO(synk): surrogate spike_grad only affects the backward pass; forward uses Heaviside.
    print("KERNEL_OK")
</pallas_src>

<mosaic_0001>
module attributes {stable_mosaic.version = 11 : i64} {
  func.func @_convsnn_kernel(%arg0: i32, %arg1: memref<2x12x16x140xbf16, #tpu.memory_space<vmem>>, %arg2: memref<140x288xbf16, #tpu.memory_space<vmem>>, %arg3: memref<1x144xf32, #tpu.memory_space<vmem>>, %arg4: memref<720x512xbf16, #tpu.memory_space<vmem>>, %arg5: memref<1x256xf32, #tpu.memory_space<vmem>>, %arg6: memref<1024x128xbf16, #tpu.memory_space<vmem>>, %arg7: memref<1x128xf32, #tpu.memory_space<vmem>>, %arg8: memref<16x128xf32, #tpu.memory_space<vmem>>, %arg9: memref<16x128xf32, #tpu.memory_space<vmem>>) attributes {dimension_semantics = [#tpu.dimension_semantics<parallel>], iteration_bounds = array<i64: 1>, scalar_prefetch = 0 : i64, scratch_operands = 0 : i64, tpu.core_type = #tpu.core_type<tc>, window_params = [{transform_indices = @transform_0, window_bounds = array<i64: 2, 12, 16, 140>}, {pipeline_mode = #tpu.pipeline_mode<synchronous>, transform_indices = @transform_1, window_bounds = array<i64: 140, 288>}, {pipeline_mode = #tpu.pipeline_mode<synchronous>, transform_indices = @transform_2, window_bounds = array<i64: 1, 144>}, {pipeline_mode = #tpu.pipeline_mode<synchronous>, transform_indices = @transform_3, window_bounds = array<i64: 720, 512>}, {pipeline_mode = #tpu.pipeline_mode<synchronous>, transform_indices = @transform_4, window_bounds = array<i64: 1, 256>}, {pipeline_mode = #tpu.pipeline_mode<synchronous>, transform_indices = @transform_5, window_bounds = array<i64: 1024, 128>}, {pipeline_mode = #tpu.pipeline_mode<synchronous>, transform_indices = @transform_6, window_bounds = array<i64: 1, 128>}, {transform_indices = @transform_7, window_bounds = array<i64: 16, 128>}, {transform_indices = @transform_8, window_bounds = array<i64: 16, 128>}]} {
    %c0 = arith.constant 0 : index
    %c0_0 = arith.constant 0 : index
    %c0_1 = arith.constant 0 : index
    %c0_2 = arith.constant 0 : index
    %0 = vector.load %arg1[%c0, %c0_0, %c0_1, %c0_2] : memref<2x12x16x140xbf16, #tpu.memory_space<vmem>>, vector<2x12x16x140xbf16>
    %1 = vector.shape_cast %0 : vector<2x12x16x140xbf16> to vector<384x140xbf16>
    %c0_3 = arith.constant 0 : index
    %c0_4 = arith.constant 0 : index
    %2 = vector.load %arg2[%c0_3, %c0_4] : memref<140x288xbf16, #tpu.memory_space<vmem>>, vector<140x288xbf16>
    %cst = arith.constant dense<0.000000e+00> : vector<384x288xf32>
    %3 = tpu.matmul %1, %2, %cst {dimension_numbers = #tpu.dot_dimension_numbers<[1], [0], [0], [1], [0, 0, 1, 1], [], []>} : vector<384x140xbf16>, vector<140x288xbf16>, vector<384x288xf32> -> vector<384x288xf32>
    %4 = vector.shape_cast %3 : vector<384x288xf32> to vector<2x192x288xf32>
    %5 = vector.extract_strided_slice %4 {offsets = [0, 0, 0], sizes = [1, 192, 288], strides = [1, 1, 1]} : vector<2x192x288xf32> to vector<1x192x288xf32>
    %6 = vector.shape_cast %5 : vector<1x192x288xf32> to vector<192x288xf32>
    %7 = vector.extract_strided_slice %4 {offsets = [1, 0, 0], sizes = [1, 192, 288], strides = [1, 1, 1]} : vector<2x192x288xf32> to vector<1x192x288xf32>
    %8 = vector.shape_cast %7 : vector<1x192x288xf32> to vector<192x288xf32>
    %9 = arith.maximumf %6, %8 : vector<192x288xf32>
    %10 = vector.extract_strided_slice %9 {offsets = [0, 0], sizes = [192, 144], strides = [1, 1]} : vector<192x288xf32> to vector<192x144xf32>
    %11 = vector.extract_strided_slice %9 {offsets = [0, 144], sizes = [192, 144], strides = [1, 1]} : vector<192x288xf32> to vector<192x144xf32>
    %12 = arith.maximumf %10, %11 : vector<192x144xf32>
    %c0_5 = arith.constant 0 : index
    %c0_6 = arith.constant 0 : index
    %13 = vector.load %arg3[%c0_5, %c0_6] : memref<1x144xf32, #tpu.memory_space<vmem>>, vector<1x144xf32>
    %14 = vector.broadcast %13 : vector<1x144xf32> to vector<192x144xf32>
    %15 = arith.addf %12, %14 : vector<192x144xf32>
    %cst_7 = arith.constant 1.000000e+00 : f32
    %16 = vector.broadcast %cst_7 : f32 to vector<192x144xf32>
    %17 = arith.cmpf ogt, %15, %16 : vector<192x144xf32>
    %18 = arith.extui %17 : vector<192x144xi1> to vector<192x144xi32>
    %19 = arith.sitofp %18 : vector<192x144xi32> to vector<192x144xf32>
    %20 = arith.truncf %19 : vector<192x144xf32> to vector<192x144xbf16>
    %21 = vector.shape_cast %20 : vector<192x144xbf16> to vector<6x2x16x144xbf16>
    %22 = vector.extract_strided_slice %21 {offsets = [0, 0, 0, 0], sizes = [6, 1, 16, 144], strides = [1, 1, 1, 1]} : vector<6x2x16x144xbf16> to vector<6x1x16x144xbf16>
    %23 = vector.shape_cast %22 : vector<6x1x16x144xbf16> to vector<6x16x144xbf16>
    %24 = vector.extract_strided_slice %21 {offsets = [0, 1, 0, 0], sizes = [6, 1, 16, 144], strides = [1, 1, 1, 1]} : vector<6x2x16x144xbf16> to vector<6x1x16x144xbf16>
    %25 = vector.shape_cast %24 : vector<6x1x16x144xbf16> to vector<6x16x144xbf16>
    %26 = vector.extract_strided_slice %23 {offsets = [0, 0, 0], sizes = [4, 16, 144], strides = [1, 1, 1]} : vector<6x16x144xbf16> to vector<4x16x144xbf16>
    %27 = vector.extract_strided_slice %25 {offsets = [0, 0, 0], sizes = [4, 16, 144], strides = [1, 1, 1]} : vector<6x16x144xbf16> to vector<4x16x144xbf16>
    %28 = vector.extract_strided_slice %23 {offsets = [1, 0, 0], sizes = [4, 16, 144], strides = [1, 1, 1]} : vector<6x16x144xbf16> to vector<4x16x144xbf16>
    %29 = vector.extract_strided_slice %25 {offsets = [1, 0, 0], sizes = [4, 16, 144], strides = [1, 1, 1]} : vector<6x16x144xbf16> to vector<4x16x144xbf16>
    %30 = vector.extract_strided_slice %23 {offsets = [2, 0, 0], sizes = [4, 16, 144], strides = [1, 1, 1]} : vector<6x16x144xbf16> to vector<4x16x144xbf16>
    %31 = tpu.concatenate %26, %27, %28, %29, %30 in 2 : vector<4x16x144xbf16>, vector<4x16x144xbf16>, vector<4x16x144xbf16>, vector<4x16x144xbf16>, vector<4x16x144xbf16> -> vector<4x16x720xbf16>
    %32 = vector.extract_strided_slice %25 {offsets = [0, 0, 0], sizes = [4, 16, 144], strides = [1, 1, 1]} : vector<6x16x144xbf16> to vector<4x16x144xbf16>
    %33 = vector.extract_strided_slice %23 {offsets = [1, 0, 0], sizes = [4, 16, 144], strides = [1, 1, 1]} : vector<6x16x144xbf16> to vector<4x16x144xbf16>
    %34 = vector.extract_strided_slice %25 {offsets = [1, 0, 0], sizes = [4, 16, 144], strides = [1, 1, 1]} : vector<6x16x144xbf16> to vector<4x16x144xbf16>
    %35 = vector.extract_strided_slice %23 {offsets = [2, 0, 0], sizes = [4, 16, 144], strides = [1, 1, 1]} : vector<6x16x144xbf16> to vector<4x16x144xbf16>
    %36 = vector.extract_strided_slice %25 {offsets = [2, 0, 0], sizes = [4, 16, 144], strides = [1, 1, 1]} : vector<6x16x144xbf16> to vector<4x16x144xbf16>
    %37 = tpu.concatenate %32, %33, %34, %35, %36 in 2 : vector<4x16x144xbf16>, vector<4x16x144xbf16>, vector<4x16x144xbf16>, vector<4x16x144xbf16>, vector<4x16x144xbf16> -> vector<4x16x720xbf16>
    %38 = tpu.concatenate %31, %37 in 0 : vector<4x16x720xbf16>, vector<4x16x720xbf16> -> vector<8x16x720xbf16>
    %39 = vector.shape_cast %38 : vector<8x16x720xbf16> to vector<128x720xbf16>
    %c0_8 = arith.constant 0 : index
    %c0_9 = arith.constant 0 : index
    %40 = vector.load %arg4[%c0_8, %c0_9] : memref<720x512xbf16, #tpu.memory_space<vmem>>, vector<720x512xbf16>
    %cst_10 = arith.constant dense<0.000000e+00> : vector<128x512xf32>
    %41 = tpu.matmul %39, %40, %cst_10 {dimension_numbers = #tpu.dot_dimension_numbers<[1], [0], [0], [1], [0, 0, 1, 1], [], []>} : vector<128x720xbf16>, vector<720x512xbf16>, vector<128x512xf32> -> vector<128x512xf32>
    %42 = vector.shape_cast %41 : vector<128x512xf32> to vector<2x64x512xf32>
    %43 = vector.extract_strided_slice %42 {offsets = [0, 0, 0], sizes = [1, 64, 512], strides = [1, 1, 1]} : vector<2x64x512xf32> to vector<1x64x512xf32>
    %44 = vector.shape_cast %43 : vector<1x64x512xf32> to vector<64x512xf32>
    %45 = vector.extract_strided_slice %42 {offsets = [1, 0, 0], sizes = [1, 64, 512], strides = [1, 1, 1]} : vector<2x64x512xf32> to vector<1x64x512xf32>
    %46 = vector.shape_cast %45 : vector<1x64x512xf32> to vector<64x512xf32>
    %47 = arith.maximumf %44, %46 : vector<64x512xf32>
    %48 = vector.extract_strided_slice %47 {offsets = [0, 0], sizes = [64, 256], strides = [1, 1]} : vector<64x512xf32> to vector<64x256xf32>
    %49 = vector.extract_strided_slice %47 {offsets = [0, 256], sizes = [64, 256], strides = [1, 1]} : vector<64x512xf32> to vector<64x256xf32>
    %50 = arith.maximumf %48, %49 : vector<64x256xf32>
    %c0_11 = arith.constant 0 : index
    %c0_12 = arith.constant 0 : index
    %51 = vector.load %arg5[%c0_11, %c0_12] : memref<1x256xf32, #tpu.memory_space<vmem>>, vector<1x256xf32>
    %52 = vector.broadcast %51 : vector<1x256xf32> to vector<64x256xf32>
    %53 = arith.addf %50, %52 : vector<64x256xf32>
    %cst_13 = arith.constant 1.000000e+00 : f32
    %54 = vector.broadcast %cst_13 : f32 to vector<64x256xf32>
    %55 = arith.cmpf ogt, %53, %54 : vector<64x256xf32>
    %56 = arith.extui %55 : vector<64x256xi1> to vector<64x256xi32>
    %57 = arith.sitofp %56 : vector<64x256xi32> to vector<64x256xf32>
    %58 = arith.truncf %57 : vector<64x256xf32> to vector<64x256xbf16>
    %59 = vector.shape_cast %58 : vector<64x256xbf16> to vector<4x16x256xbf16>
    %60 = vector.extract_strided_slice %59 {offsets = [0, 0, 0], sizes = [1, 16, 256], strides = [1, 1, 1]} : vector<4x16x256xbf16> to vector<1x16x256xbf16>
    %61 = vector.shape_cast %60 : vector<1x16x256xbf16> to vector<16x256xbf16>
    %62 = vector.extract_strided_slice %59 {offsets = [1, 0, 0], sizes = [1, 16, 256], strides = [1, 1, 1]} : vector<4x16x256xbf16> to vector<1x16x256xbf16>
    %63 = vector.shape_cast %62 : vector<1x16x256xbf16> to vector<16x256xbf16>
    %64 = vector.extract_strided_slice %59 {offsets = [2, 0, 0], sizes = [1, 16, 256], strides = [1, 1, 1]} : vector<4x16x256xbf16> to vector<1x16x256xbf16>
    %65 = vector.shape_cast %64 : vector<1x16x256xbf16> to vector<16x256xbf16>
    %66 = vector.extract_strided_slice %59 {offsets = [3, 0, 0], sizes = [1, 16, 256], strides = [1, 1, 1]} : vector<4x16x256xbf16> to vector<1x16x256xbf16>
    %67 = vector.shape_cast %66 : vector<1x16x256xbf16> to vector<16x256xbf16>
    %68 = tpu.concatenate %61, %63, %65, %67 in 1 : vector<16x256xbf16>, vector<16x256xbf16>, vector<16x256xbf16>, vector<16x256xbf16> -> vector<16x1024xbf16>
    %c0_14 = arith.constant 0 : index
    %c0_15 = arith.constant 0 : index
    %69 = vector.load %arg6[%c0_14, %c0_15] : memref<1024x128xbf16, #tpu.memory_space<vmem>>, vector<1024x128xbf16>
    %cst_16 = arith.constant dense<0.000000e+00> : vector<16x128xf32>
    %70 = tpu.matmul %68, %69, %cst_16 {dimension_numbers = #tpu.dot_dimension_numbers<[1], [0], [0], [1], [0, 0, 1, 1], [], []>} : vector<16x1024xbf16>, vector<1024x128xbf16>, vector<16x128xf32> -> vector<16x128xf32>
    %c0_17 = arith.constant 0 : index
    %c0_18 = arith.constant 0 : index
    %71 = vector.load %arg7[%c0_17, %c0_18] : memref<1x128xf32, #tpu.memory_space<vmem>>, vector<1x128xf32>
    %72 = vector.broadcast %71 : vector<1x128xf32> to vector<16x128xf32>
    %73 = arith.addf %70, %72 : vector<16x128xf32>
    %c0_19 = arith.constant 0 : index
    %c0_20 = arith.constant 0 : index
    %74 = vector.load %arg9[%c0_19, %c0_20] : memref<16x128xf32, #tpu.memory_space<vmem>>, vector<16x128xf32>
    tpu.vector_store %arg9[%c0_19, %c0_20], %73 {strides = array<i32>} : memref<16x128xf32, #tpu.memory_space<vmem>>, vector<16x128xf32>,
    %cst_21 = arith.constant 1.000000e+00 : f32
    %75 = vector.broadcast %cst_21 : f32 to vector<16x128xf32>
    %76 = arith.cmpf ogt, %73, %75 : vector<16x128xf32>
    %77 = arith.extui %76 : vector<16x128xi1> to vector<16x128xi32>
    %78 = arith.sitofp %77 : vector<16x128xi32> to vector<16x128xf32>
    %c0_22 = arith.constant 0 : index
    %c0_23 = arith.constant 0 : index
    %79 = vector.load %arg8[%c0_22, %c0_23] : memref<16x128xf32, #tpu.memory_space<vmem>>, vector<16x128xf32>
    tpu.vector_store %arg8[%c0_22, %c0_23], %78 {strides = array<i32>} : memref<16x128xf32, #tpu.memory_space<vmem>>, vector<16x128xf32>,
    return
  }
  func.func @transform_0(%arg0: i32) -> (i32, i32, i32, i32) {
    %c0_i32 = arith.constant 0 : i32
    %c0_i32_0 = arith.constant 0 : i32
    %c0_i32_1 = arith.constant 0 : i32
    %c0_i32_2 = arith.constant 0 : i32
    return %c0_i32, %c0_i32_0, %arg0, %c0_i32_1 : i32, i32, i32, i32
  }
  func.func @transform_1(%arg0: i32) -> (i32, i32) {
    %c0_i32 = arith.constant 0 : i32
    %c0_i32_0 = arith.constant 0 : i32
    %c0_i32_1 = arith.constant 0 : i32
    return %c0_i32, %c0_i32_0 : i32, i32
  }
  func.func @transform_2(%arg0: i32) -> (i32, i32) {
    %c0_i32 = arith.constant 0 : i32
    %c0_i32_0 = arith.constant 0 : i32
    %c0_i32_1 = arith.constant 0 : i32
    return %c0_i32, %c0_i32_0 : i32, i32
  }
  func.func @transform_3(%arg0: i32) -> (i32, i32) {
    %c0_i32 = arith.constant 0 : i32
    %c0_i32_0 = arith.constant 0 : i32
    %c0_i32_1 = arith.constant 0 : i32
    return %c0_i32, %c0_i32_0 : i32, i32
  }
  func.func @transform_4(%arg0: i32) -> (i32, i32) {
    %c0_i32 = arith.constant 0 : i32
    %c0_i32_0 = arith.constant 0 : i32
    %c0_i32_1 = arith.constant 0 : i32
    return %c0_i32, %c0_i32_0 : i32, i32
  }
  func.func @transform_5(%arg0: i32) -> (i32, i32) {
    %c0_i32 = arith.constant 0 : i32
    %c0_i32_0 = arith.constant 0 : i32
    %c0_i32_1 = arith.constant 0 : i32
    return %c0_i32, %c0_i32_0 : i32, i32
  }
  func.func @transform_6(%arg0: i32) -> (i32, i32) {
    %c0_i32 = arith.constant 0 : i32
    %c0_i32_0 = arith.constant 0 : i32
    %c0_i32_1 = arith.constant 0 : i32
    return %c0_i32, %c0_i32_0 : i32, i32
  }
  func.func @transform_7(%arg0: i32) -> (i32, i32) {
    %c0_i32 = arith.constant 0 : i32
    %c0_i32_0 = arith.constant 0 : i32
    return %arg0, %c0_i32 : i32, i32
  }
  func.func @transform_8(%arg0: i32) -> (i32, i32) {
    %c0_i32 = arith.constant 0 : i32
    %c0_i32_0 = arith.constant 0 : i32
    return %arg0, %c0_i32 : i32, i32
  }
}

</mosaic_0001>

<bundles_post_ra>
// kernel: tile.13
= control target key start
LH: loop header
LB: loop body
LE: loop exit
PB: predicated region body
PF: predicated region fallthrough
CT: control target
= control target key end

     0   :  { %s28_s0 = inlined_call_operand.vmem [shape: f32[12], index: 0, kind: input, shape index: {}]   ;;  %s29_s1 = inlined_call_operand.vmem [shape: f32[12,12], index: 1, kind: output, shape index: {}]  }
   0x1   :  { %v4_v0 = vld [vmem:[%s28_s0] ss:$0 sm:$0xff] }
   0x2   :  { %5 = vst [vmem:[%s29_s1] sm:$0xff] %v4_v0  ;;  %8 = vst [vmem:[%s29_s1 + $0x8] sm:$0xff] %v4_v0 }

// kernel: tile.14
= control target key start
LH: loop header
LB: loop body
LE: loop exit
PB: predicated region body
PF: predicated region fallthrough
CT: control target
= control target key end

     0   :  { %vm9_vm0 = vcmask 64512   ;;  %s114_s12 = smov 120   ;;  %s115_s13 = smov 96   ;;  %vm3_vm1 = vcmask 97280   ;;  %vm13_vm2 = vcmask 31744   ;;  %vm16_vm3 = vcmask 1048512   ;;  %s180_s0 = inlined_call_operand.vmem [shape: f32[12,12], index: 0, kind: input, shape index: {}]   ;;  %s181_s1 = inlined_call_operand.vmem [shape: f32[1,144], index: 1, kind: output, shape index: {}]  }
   0x1   :  { %v90_v0 = vld [vmem:[%s180_s0 + $0xa] sm:$0x1]   ;;  %v93_v3 = vld [vmem:[%s180_s0 + $0x8] sm:$0x1]   ;;  %v92_v4 = vld [vmem:[%s180_s0 + $0x9] sm:$0x1]  }
   0x2   :  { %v91_v1 = vld [vmem:[%s180_s0 + $0xa] sm:$0x1]   ;;  %26 = vrot.lane.b32.xlu1 %v93_v3, %s115_s13  ;;  %v94_v5 = vld [vmem:[%s180_s0 + $0x7] sm:$0x1]   ;;  %s116_s18 = smov 108   ;;  %s117_s19 = smov 84  }
   0x3   :  { %v10_v2 = vsel %vm9_vm0, %v91_v1, %v90_v0  ;;  %v2_v6 = vld [vmem:[%s180_s0] sm:$0x1]   ;;  %v95_v7 = vld [vmem:[%s180_s0 + $0x6] sm:$0x1]   ;;  %v96_v8 = vld [vmem:[%s180_s0 + $0x5] sm:$0x1]  }
   0x4   :  { %11 = vrot.lane.b32.xlu0 %v10_v2, %s114_s12  ;;  %4 = vst.msk [vmem:[#allocation0] sm:$0x1] %vm3_vm1, %v2_v6   ;;  %s118_s26 = smov 72   ;;  %s119_s27 = smov 60   ;;  %v97_v9 = vld [vmem:[%s180_s0 + $0x4] sm:$0x1]  }
   0x5   :  { %v98_v10 = vld [vmem:[%s180_s0 + $0x3] sm:$0x1]   ;;  %s120_s3 = smov 48   ;;  %s121_s4 = smov 36   ;;  %v99_v11 = vld [vmem:[%s180_s0 + $0x2] sm:$0x1]  }
   0x6   :  { %32 = vrot.lane.b32.xlu1 %v94_v5, %s117_s19  ;;  %v100_v12 = vld [vmem:[%s180_s0 + $0x1] sm:$0x1]   ;;  %s122_s9 = smov 24   ;;  %s123_s10 = smov 12   ;;  %v101_v13 = vld [vmem:[%s180_s0 + $0xb] sm:$0x1]  }
   0x7   :  { %s124_s0 = smov 4   ;;  %vm22_vm4 = vcmask 982880   ;;  %vm28_vm5 = vcmask 884480   ;;  %vm34_vm6 = vcmask 786080   ;;  %vm40_vm7 = vcmask 687680  }
   0x8   :  { %20 = vrot.lane.b32.xlu0 %v92_v4, %s116_s18  ;;  %vm46_vm8 = vcmask 589280   ;;  %vm52_vm9 = vcmask 490880   ;;  %vm58_vm10 = vcmask 392480   ;;  %vm64_vm11 = vcmask 294080  }
   0x9   :  { %vm70_vm12 = vcmask 195680   ;;  %vm76_vm13 = vcmask 130080  }
   0xa   :  { %44 = vrot.lane.b32.xlu1 %v96_v8, %s119_s27 }
   0xc   :  { %38 = vrot.lane.b32.xlu0 %v95_v7, %s118_s26 }
   0xe   :  { %56 = vrot.lane.b32.xlu1 %v98_v10, %s121_s4 }
  0x10   :  { %50 = vrot.lane.b32.xlu0 %v97_v9, %s120_s3 }
  0x12   :  { %68 = vrot.lane.b32.xlu1 %v100_v12, %s123_s10 }
  0x14   :  { %62 = vrot.lane.b32.xlu0 %v99_v11, %s122_s9 }
  0x18   :  { %74 = vrot.lane.b32.xlu0 %v101_v13, %s124_s0 }
  0x74   :  { %v27_v15 = vpop.permute.xlu1 %26  }
  0x76   :  { %v12_v14 = vpop.permute.xlu0 %11  }
  0x77   :  { %15 = vst.msk [vmem:[#allocation0 + $0x8] sm:$0x1] %vm13_vm2, %v12_v14  }
  0x78   :  { %17 = vst.msk [vmem:[#allocation0] sm:$0x1] %vm16_vm3, %v12_v14   ;;  %v33_v17 = vpop.permute.xlu1 %32  }
  0x7a   :  { %v21_v16 = vpop.permute.xlu0 %20  }
  0x7b   :  { %23 = vst.msk [vmem:[#allocation0] sm:$0x1] %vm22_vm4, %v21_v16  }
  0x7c   :  { %29 = vst.msk [vmem:[#allocation0] sm:$0x1] %vm28_vm5, %v27_v15   ;;  %v45_v19 = vpop.permute.xlu1 %44  }
  0x7d   :  { %35 = vst.msk [vmem:[#allocation0] sm:$0x1] %vm34_vm6, %v33_v17  }
  0x7e   :  { %v39_v18 = vpop.permute.xlu0 %38  }
  0x7f   :  { %41 = vst.msk [vmem:[#allocation0] sm:$0x1] %vm40_vm7, %v39_v18  }
  0x80   :  { %47 = vst.msk [vmem:[#allocation0] sm:$0x1] %vm46_vm8, %v45_v19   ;;  %v57_v21 = vpop.permute.xlu1 %56  }
  0x82   :  { %v51_v20 = vpop.permute.xlu0 %50  }
  0x83   :  { %53 = vst.msk [vmem:[#allocation0] sm:$0x1] %vm52_vm9, %v51_v20  }
  0x84   :  { %59 = vst.msk [vmem:[#allocation0] sm:$0x1] %vm58_vm10, %v57_v21   ;;  %v69_v23 = vpop.permute.xlu1 %68  }
  0x86   :  { %v63_v22 = vpop.permute.xlu0 %62  }
  0x87   :  { %65 = vst.msk [vmem:[#allocation0] sm:$0x1] %vm64_vm11, %v63_v22  }
  0x88   :  { %71 = vst.msk [vmem:[#allocation0] sm:$0x1] %vm70_vm12, %v69_v23  }
  0x8a   :  { %v75_v24 = vpop.permute.xlu0 %74  }
  0x8b   :  { %78 = vst.msk [vmem:[#allocation0 + $0x8] sm:$0x1] %vm76_vm13, %v75_v24  }
  0x8f   :  { %v82_v25 = vld [vmem:[#allocation0] sm:$0x1] }
  0x90   :  { %84 = vst [vmem:[%s181_s1] sm:$0x1] %v82_v25 }
  0x92   :  { %v86_v26 = vld [vmem:[#allocation0 + $0x8] sm:$0x1] }
  0x93   :  { %102 = vst [vmem:[%s181_s1 + $0x1] sm:$0x1] %v86_v26 }

// kernel: tile.18
= control target key start
LH: loop header
LB: loop body
LE: loop exit
PB: predicated region body
PF: predicated region fallthrough
CT: control target
= control target key end

     0   :  { %s22_s0 = inlined_call_operand.vmem [shape: f32[64], index: 0, kind: input, shape index: {}]   ;;  %s23_s1 = inlined_call_operand.vmem [shape: f32[4,64], index: 1, kind: output, shape index: {}]  }
   0x1   :  { %v4_v0 = vld [vmem:[%s22_s0] ss:$0 sm:$0xff] }
   0x2   :  { %5 = vst [vmem:[%s23_s1] sm:$0xf] %v4_v0 }

// kernel: tile.19
= control target key start
LH: loop header
LB: loop body
LE: loop exit
PB: predicated region body
PF: predicated region fallthrough
CT: control target
= control target key end

     0   :  { %s6_s8 = smov 3  ;;  %vm8_vm0 = vcmask 523264   ;;  %s30_s9 = smov 64   ;;  %vm15_vm1 = vcmask 1048064   ;;  %s50_s0 = inlined_call_operand.vmem [shape: f32[4,64], index: 0, kind: input, shape index: {}]   ;;  %s51_s1 = inlined_call_operand.vmem [shape: f32[1,256], index: 1, kind: output, shape index: {}]  }
   0x1   :  { %v4_v0 = vld [vmem:[%s50_s0] sm:$0xf]  ;;  %s11_s0 = smov 3 }
   0x2   :  { %5 = vst [vmem:[#allocation1] sm:$0xf] %v4_v0 }
   0x9   :  { %v12_v1 = vld [vmem:[#allocation1 + $0x1] ss:$2 sm:%s11_s0]   ;;  %v7_v2 = vld [vmem:[#allocation1] ss:$2 sm:%s6_s8]  }
   0xa   :  { %13 = vrot.lane.b32.xlu0 %v12_v1, %s30_s9  ;;  %9 = vst.msk [vmem:[#allocation0] ss:$8 sm:$0x3] %vm8_vm0, %v7_v2  }
  0x7c   :  { %v14_v3 = vpop.permute.xlu0 %13  }
  0x7d   :  { %16 = vst.msk [vmem:[#allocation0] ss:$8 sm:$0x3] %vm15_vm1, %v14_v3  }
  0x84   :  { %v20_v4 = vld [vmem:[#allocation0] sm:$0x1]  ;;  %v24_v5 = vld [vmem:[#allocation0 + $0x8] sm:$0x1] }
  0x85   :  { %22 = vst [vmem:[%s51_s1] sm:$0x1] %v20_v4  ;;  %28 = vst [vmem:[%s51_s1 + $0x1] sm:$0x1] %v24_v5 }

// kernel: conv_snn_forward.1
= control target key start
LH: loop header
LB: loop body
LE: loop exit
PB: predicated region body
PF: predicated region fallthrough
CT: control target
= control target key end

     0   :  { %v5715_v0 = vmov 0   ;;  %vm470_vm0 = vcmask 97280   ;;  %vm543_vm1 = vcmask 1045504   ;;  %vm1267_vm2 = vcmask 916480   ;;  %s5719_s15 = smov 32   ;;  %s5720_s16 = smov 48   ;;  %s8145_s1 = inlined_call_operand.vmem [shape: bf16[140,288], index: 1, kind: input, shape index: {}]   ;;  %s8146_s0 = inlined_call_operand.vmem [shape: bf16[2,12,16,140], index: 0, kind: input, shape index: {}]   ;;  %s8147_s3 = inlined_call_operand.vmem [shape: bf16[720,512], index: 3, kind: input, shape index: {}]   ;;  %s8148_s2 = inlined_call_operand.vmem [shape: f32[1,144], index: 2, kind: input, shape index: {}]   ;;  %s8149_s5 = inlined_call_operand.vmem [shape: bf16[1024,128], index: 5, kind: input, shape index: {}]   ;;  %s8150_s4 = inlined_call_operand.vmem [shape: f32[1,256], index: 4, kind: input, shape index: {}]   ;;  %s8151_s6 = inlined_call_operand.vmem [shape: f32[1,128], index: 6, kind: input, shape index: {}]   ;;  %s8152_s8 = inlined_call_operand.vmem [shape: f32[16,128], index: 8, kind: output, shape index: {1}]   ;;  %s8153_s7 = inlined_call_operand.vmem [shape: f32[16,128], index: 7, kind: output, shape index: {0}]  }
   0x1   :  { %826 = vmatprep.subr.bf16.mxu1 %v5715_v0  ;;  %v5273_v1 = vld [vmem:[%s8145_s1 + $0x4] ss:$12 sps:$4 sm:$0xff]   ;;  %v5275_v2 = vld [vmem:[%s8145_s1 + $0x8] ss:$12 sps:$4 sm:$0xff]   ;;  %v5276_v3 = vld [vmem:[%s8145_s1] ss:$12 sps:$4 sm:$0xff]  }
   0x2   :  { %553 = vmatprep.subr.bf16.mxu0 %v5273_v1  ;;  %827 = vmatpush1.bf16.msra.mxu1 %v5275_v2  ;;  %v5277_v4 = vld [vmem:[%s8145_s1 + $0x1c] ss:$12 sps:$4 sm:$0xff]   ;;  %v5279_v5 = vld [vmem:[%s8145_s1 + $0x20] ss:$12 sps:$4 sm:$0xff]   ;;  %v5280_v6 = vld [vmem:[%s8145_s1 + $0x18] ss:$12 sps:$4 sm:$0xff]  }
   0x3   :  { %554 = vmatpush1.bf16.msra.mxu0 %v5276_v3  ;;  %828 = vmatprep.subr.bf16.mxu1 %v5715_v0  ;;  %v5281_v7 = vld [vmem:[%s8145_s1 + $0x34] ss:$12 sps:$4 sm:$0xff]   ;;  %v5283_v8 = vld [vmem:[%s8145_s1 + $0x38] ss:$12 sps:$4 sm:$0xff]   ;;  %v5284_v9 = vld [vmem:[%s8145_s1 + $0x30] ss:$12 sps:$4 sm:$0xff]  }
   0x4   :  { %555 = vmatprep.subr.bf16.mxu0 %v5277_v4  ;;  %v5285_v10 = vld [vmem:[%s8145_s1 + $0x4c] ss:$12 sps:$4 sm:$0xff]   ;;  %v5287_v11 = vld [vmem:[%s8145_s1 + $0x50] ss:$12 sps:$4 sm:$0xff]   ;;  %v5288_v12 = vld [vmem:[%s8145_s1 + $0x48] ss:$12 sps:$4 sm:$0xff]  }
   0x5   :  { %v5289_v13 = vld [vmem:[%s8145_s1 + $0x64] ss:$12 sps:$4 sm:$0xff]   ;;  %v5291_v14 = vld [vmem:[%s8145_s1 + $0x68] ss:$12 sps:$4 sm:$0xff]   ;;  %v5292_v15 = vld [vmem:[%s8145_s1 + $0x60] ss:$12 sps:$4 sm:$0xff]  }
   0x6   :  { %829 = vmatpush1.bf16.msra.mxu1 %v5279_v5  ;;  %v5293_v16 = vld [vmem:[%s8145_s1 + $0x7c] ss:$12 sps:$4 sm:$0xff]   ;;  %v5295_v17 = vld [vmem:[%s8145_s1 + $0x80] ss:$12 sps:$4 sm:$0xff]   ;;  %v5296_v18 = vld [vmem:[%s8145_s1 + $0x78] ss:$12 sps:$4 sm:$0xff]  }
   0x7   :  { %556 = vmatpush1.bf16.msra.mxu0 %v5280_v6  ;;  %830 = vmatprep.subr.bf16.mxu1 %v5715_v0  ;;  %v5297_v19 = vld [vmem:[%s8145_s1 + $0x94] ss:$12 sps:$4 sm:$0xff]   ;;  %v5311_v20 = vld [vmem:[%s8146_s0 + $0x4] ss:$8 sps:$4 sm:$0xff]   ;;  %v5300_v22 = vld [vmem:[%s8145_s1 + $0x90] ss:$12 sps:$4 sm:$0xff]  }
   0x8   :  { %557 = vmatprep.subr.bf16.mxu0 %v5281_v7  ;;  %v5299_v21 = vld [vmem:[%s8145_s1 + $0x98] ss:$12 sps:$4 sm:$0xff]   ;;  %4650 = vmatprep.mubr.msk.bf16.mxu1 %vm470_vm0, %v5311_v20  ;;  %v5303_v24 = vld [vmem:[%s8145_s1 + $0xb0] ss:$12 sps:$4 sm:$0xff]   ;;  %v5304_v25 = vld [vmem:[%s8145_s1 + $0xa8] ss:$12 sps:$4 sm:$0xff]  }
   0x9   :  { %v5301_v23 = vld [vmem:[%s8145_s1 + $0xac] ss:$12 sps:$4 sm:$0xff]   ;;  %4626 = vmatprep.mubr.msk.bf16.mxu0 %vm470_vm0, %v5311_v20  ;;  %v5305_v26 = vld [vmem:[%s8145_s1 + $0xc4] ss:$12 sps:$4 sm:$0x3f]   ;;  %s5722_s17 = smov 64  }
   0xa   :  { %831 = vmatpush1.bf16.msra.mxu1 %v5283_v8  ;;  %v5307_v27 = vld [vmem:[%s8145_s1 + $0xc8] ss:$12 sps:$4 sm:$0x3f]   ;;  %v5308_v28 = vld [vmem:[%s8145_s1 + $0xc0] ss:$12 sps:$4 sm:$0x3f]  }
   0xb   :  { %558 = vmatpush1.bf16.msra.mxu0 %v5284_v9  ;;  %832 = vmatprep.subr.bf16.mxu1 %v5715_v0  ;;  %v551_v29 = vsel %vm543_vm1, %v5307_v27, 0  ;;  %v545_v30 = vsel %vm543_vm1, %v5308_v28, 0  ;;  %v5309_v31 = vld [vmem:[%s8146_s0] ss:$8 sps:$4 sm:$0xff]   ;;  %v5312_v32 = vld [vmem:[%s8146_s0 + $0x14] ss:$8 sps:$4 sm:$0xff]  }
   0xc   :  { %559 = vmatprep.subr.bf16.mxu0 %v5285_v10  ;;  %v5314_v33 = vld [vmem:[%s8146_s0 + $0x10] ss:$8 sps:$4 sm:$0xff]   ;;  %v5315_v34 = vld [vmem:[%s8146_s0 + $0x24] ss:$8 sps:$4 sm:$0xff]   ;;  %v5317_v35 = vld [vmem:[%s8146_s0 + $0x20] ss:$8 sps:$4 sm:$0xff]  }
   0xd   :  { %v5318_v36 = vld [vmem:[%s8146_s0 + $0x34] ss:$8 sps:$4 sm:$0xff]   ;;  %v5320_v37 = vld [vmem:[%s8146_s0 + $0x30] ss:$8 sps:$4 sm:$0xff]   ;;  %v5321_v38 = vld [vmem:[%s8146_s0 + $0x44] ss:$8 sps:$4 sm:$0xff]  }
   0xe   :  { %833 = vmatpush1.bf16.msra.mxu1 %v5287_v11  ;;  %v5323_v39 = vld [vmem:[%s8146_s0 + $0x40] ss:$8 sps:$4 sm:$0xff]   ;;  %v5324_v40 = vld [vmem:[%s8146_s0 + $0x54] ss:$8 sps:$4 sm:$0xff]   ;;  %v5326_v41 = vld [vmem:[%s8146_s0 + $0x50] ss:$8 sps:$4 sm:$0xff]  }
   0xf   :  { %560 = vmatpush1.bf16.msra.mxu0 %v5288_v12  ;;  %834 = vmatprep.subr.bf16.mxu1 %v5715_v0  ;;  %v5327_v42 = vld [vmem:[%s8146_s0 + $0x64] ss:$8 sps:$4 sm:$0xff]   ;;  %v5329_v43 = vld [vmem:[%s8146_s0 + $0x60] ss:$8 sps:$4 sm:$0xff]   ;;  %v5330_v44 = vld [vmem:[%s8146_s0 + $0x74] ss:$8 sps:$4 sm:$0xff]  }
  0x10   :  { %561 = vmatprep.subr.bf16.mxu0 %v5289_v13  ;;  %v5332_v45 = vld [vmem:[%s8146_s0 + $0x70] ss:$8 sps:$4 sm:$0xff]   ;;  %v5333_v46 = vld [vmem:[%s8146_s0 + $0x84] ss:$8 sps:$4 sm:$0xff]   ;;  %v5335_v47 = vld [vmem:[%s8146_s0 + $0x80] ss:$8 sps:$4 sm:$0xff]  }
  0x11   :  { %v5336_v48 = vld [vmem:[%s8146_s0 + $0x94] ss:$8 sps:$4 sm:$0xff]   ;;  %v5338_v49 = vld [vmem:[%s8146_s0 + $0x90] ss:$8 sps:$4 sm:$0xff]   ;;  %v5339_v50 = vld [vmem:[%s8146_s0 + $0xa4] ss:$8 sps:$4 sm:$0xff]  }
  0x12   :  { %835 = vmatpush1.bf16.msra.mxu1 %v5291_v14  ;;  %v5341_v51 = vld [vmem:[%s8146_s0 + $0xa0] ss:$8 sps:$4 sm:$0xff]   ;;  %v5342_v52 = vld [vmem:[%s8146_s0 + $0xb4] ss:$8 sps:$4 sm:$0xff]   ;;  %v5344_v53 = vld [vmem:[%s8146_s0 + $0xb0] ss:$8 sps:$4 sm:$0xff]  }
  0x13   :  { %562 = vmatpush1.bf16.msra.mxu0 %v5292_v15  ;;  %836 = vmatprep.subr.bf16.mxu1 %v5715_v0  ;;  %v5345_v54 = vld [vmem:[%s8146_s0 + $0xc4] ss:$8 sps:$4 sm:$0xff]   ;;  %v5347_v55 = vld [vmem:[%s8146_s0 + $0xc0] ss:$8 sps:$4 sm:$0xff]   ;;  %v5348_v56 = vld [vmem:[%s8146_s0 + $0xd4] ss:$8 sps:$4 sm:$0xff]  }
  0x14   :  { %563 = vmatprep.subr.bf16.mxu0 %v5293_v16  ;;  %v5350_v57 = vld [vmem:[%s8146_s0 + $0xd0] ss:$8 sps:$4 sm:$0xff]   ;;  %v5351_v58 = vld [vmem:[%s8146_s0 + $0xe4] ss:$8 sps:$4 sm:$0xff]   ;;  %v5353_v59 = vld [vmem:[%s8146_s0 + $0xe0] ss:$8 sps:$4 sm:$0xff]  }
  0x15   :  { %v5354_v60 = vld [vmem:[%s8146_s0 + $0xf4] ss:$8 sps:$4 sm:$0xff]   ;;  %v5356_v61 = vld [vmem:[%s8146_s0 + $0xf0] ss:$8 sps:$4 sm:$0xff]   ;;  %v5357_v62 = vld [vmem:[%s8146_s0 + $0x104] ss:$8 sps:$4 sm:$0xff]  }
  0x16   :  { %837 = vmatpush1.bf16.msra.mxu1 %v5295_v17  ;;  %v5359_v63 = vld [vmem:[%s8146_s0 + $0x100] ss:$8 sps:$4 sm:$0xff]   ;;  %v5362_v1 = vld [vmem:[%s8146_s0 + $0x110] ss:$8 sps:$4 sm:$0xff]   ;;  %v5363_v2 = vld [vmem:[%s8146_s0 + $0x124] ss:$8 sps:$4 sm:$0xff]  }
  0x17   :  { %564 = vmatpush1.bf16.msra.mxu0 %v5296_v18  ;;  %838 = vmatprep.subr.bf16.mxu1 %v5715_v0  ;;  %v5365_v3 = vld [vmem:[%s8146_s0 + $0x120] ss:$8 sps:$4 sm:$0xff]   ;;  %v5366_v4 = vld [vmem:[%s8146_s0 + $0x134] ss:$8 sps:$4 sm:$0xff]   ;;  %v5368_v5 = vld [vmem:[%s8146_s0 + $0x130] ss:$8 sps:$4 sm:$0xff]  }
  0x18   :  { %565 = vmatprep.subr.bf16.mxu0 %v5297_v19  ;;  %v5369_v6 = vld [vmem:[%s8146_s0 + $0x144] ss:$8 sps:$4 sm:$0xff]   ;;  %v5371_v7 = vld [vmem:[%s8146_s0 + $0x140] ss:$8 sps:$4 sm:$0xff]   ;;  %v5372_v8 = vld [vmem:[%s8146_s0 + $0x154] ss:$8 sps:$4 sm:$0xff]  }
  0x19   :  { %v5374_v9 = vld [vmem:[%s8146_s0 + $0x150] ss:$8 sps:$4 sm:$0xff]   ;;  %v5375_v10 = vld [vmem:[%s8146_s0 + $0x164] ss:$8 sps:$4 sm:$0xff]   ;;  %v5377_v11 = vld [vmem:[%s8146_s0 + $0x160] ss:$8 sps:$4 sm:$0xff]  }
  0x1a   :  { %839 = vmatpush1.bf16.msra.mxu1 %v5299_v21  ;;  %v5378_v12 = vld [vmem:[%s8146_s0 + $0x174] ss:$8 sps:$4 sm:$0xff]   ;;  %v5380_v13 = vld [vmem:[%s8146_s0 + $0x170] ss:$8 sps:$4 sm:$0xff]  }
  0x1b   :  { %566 = vmatpush1.bf16.msra.mxu0 %v5300_v22  ;;  %840 = vmatprep.subr.bf16.mxu1 %v5715_v0 }
  0x1c   :  { %567 = vmatprep.subr.bf16.mxu0 %v5301_v23 }
  0x1e   :  { %841 = vmatpush1.bf16.msra.mxu1 %v5303_v24 }
  0x1f   :  { %568 = vmatpush1.bf16.msra.mxu0 %v5304_v25  ;;  %842 = vmatprep.subr.bf16.mxu1 %v5715_v0  ;;  %v5360_v0 = vld [vmem:[%s8146_s0 + $0x114] ss:$8 sps:$4 sm:$0xff]   ;;  %s5716_s0 = smov 112  }
  0x20   :  { %4625 = vmatprep.subr.msk.bf16.mxu0 %vm543_vm1, %v5305_v26 }
  0x22   :  { %843 = vmatpush1.bf16.msra.mxu1 %v551_v29 }
  0x23   :  { %570 = vmatpush1.bf16.msra.mxu0 %v545_v30 }
  0x25   :  { %859 = vmatmul.mubr.bf16.vlgmr.msra.gmra.mrb[0].mxu1 %v5309_v31 }
  0x26   :  { %586 = vmatmul.mubr.bf16.vlgmr.msra.gmra.mrb[0].mxu0 %v5309_v31  ;;  %4651 = vmatprep.mubr.msk.bf16.mxu1 %vm470_vm0, %v5312_v32 }
  0x27   :  { %4627 = vmatprep.mubr.msk.bf16.mxu0 %vm470_vm0, %v5312_v32 }
  0x2d   :  { %867 = vmatmul.mubr.bf16.gmra.mrb[4].mxu1 %v5314_v33 }
  0x2e   :  { %596 = vmatmul.mubr.bf16.gmra.mrb[4].mxu0 %v5314_v33  ;;  %4652 = vmatprep.mubr.msk.bf16.mxu1 %vm470_vm0, %v5315_v34 }
  0x2f   :  { %4628 = vmatprep.mubr.msk.bf16.mxu0 %vm470_vm0, %v5315_v34 }
  0x35   :  { %875 = vmatmul.mubr.bf16.gmra.mrb[8].mxu1 %v5317_v35 }
  0x36   :  { %606 = vmatmul.mubr.bf16.gmra.mrb[8].mxu0 %v5317_v35  ;;  %4653 = vmatprep.mubr.msk.bf16.mxu1 %vm470_vm0, %v5318_v36 }
  0x37   :  { %4629 = vmatprep.mubr.msk.bf16.mxu0 %vm470_vm0, %v5318_v36 }
  0x3d   :  { %883 = vmatmul.mubr.bf16.gmra.mrb[12].mxu1 %v5320_v37 }
  0x3e   :  { %616 = vmatmul.mubr.bf16.gmra.mrb[12].mxu0 %v5320_v37  ;;  %4654 = vmatprep.mubr.msk.bf16.mxu1 %vm470_vm0, %v5321_v38 }
  0x3f   :  { %4630 = vmatprep.mubr.msk.bf16.mxu0 %vm470_vm0, %v5321_v38 }
  0x45   :  { %891 = vmatmul.mubr.bf16.gmra.mrb[16].mxu1 %v5323_v39 }
  0x46   :  { %626 = vmatmul.mubr.bf16.gmra.mrb[16].mxu0 %v5323_v39  ;;  %4655 = vmatprep.mubr.msk.bf16.mxu1 %vm470_vm0, %v5324_v40 }
  0x47   :  { %4631 = vmatprep.mubr.msk.bf16.mxu0 %vm470_vm0, %v5324_v40 }
  0x4d   :  { %899 = vmatmul.mubr.bf16.gmra.mrb[20].mxu1 %v5326_v41 }
  0x4e   :  { %636 = vmatmul.mubr.bf16.gmra.mrb[20].mxu0 %v5326_v41  ;;  %4656 = vmatprep.mubr.msk.bf16.mxu1 %vm470_vm0, %v5327_v42 }
  0x4f   :  { %4632 = vmatprep.mubr.msk.bf16.mxu0 %vm470_vm0, %v5327_v42 }
  0x55   :  { %907 = vmatmul.mubr.bf16.gmra.mrb[24].mxu1 %v5329_v43 }
  0x56   :  { %646 = vmatmul.mubr.bf16.gmra.mrb[24].mxu0 %v5329_v43  ;;  %4657 = vmatprep.mubr.msk.bf16.mxu1 %vm470_vm0, %v5330_v44 }
  0x57   :  { %4633 = vmatprep.mubr.msk.bf16.mxu0 %vm470_vm0, %v5330_v44 }
  0x5d   :  { %915 = vmatmul.mubr.bf16.gmra.mrb[28].mxu1 %v5332_v45 }
  0x5e   :  { %656 = vmatmul.mubr.bf16.gmra.mrb[28].mxu0 %v5332_v45  ;;  %4658 = vmatprep.mubr.msk.bf16.mxu1 %vm470_vm0, %v5333_v46 }
  0x5f   :  { %4634 = vmatprep.mubr.msk.bf16.mxu0 %vm470_vm0, %v5333_v46 }
  0x65   :  { %923 = vmatmul.mubr.bf16.gmra.mrb[32].mxu1 %v5335_v47 }
  0x66   :  { %666 = vmatmul.mubr.bf16.gmra.mrb[32].mxu0 %v5335_v47  ;;  %4659 = vmatprep.mubr.msk.bf16.mxu1 %vm470_vm0, %v5336_v48 }
  0x67   :  { %4635 = vmatprep.mubr.msk.bf16.mxu0 %vm470_vm0, %v5336_v48 }
  0x6d   :  { %931 = vmatmul.mubr.bf16.gmra.mrb[36].mxu1 %v5338_v49 }
  0x6e   :  { %676 = vmatmul.mubr.bf16.gmra.mrb[36].mxu0 %v5338_v49  ;;  %4660 = vmatprep.mubr.msk.bf16.mxu1 %vm470_vm0, %v5339_v50 }
  0x6f   :  { %4636 = vmatprep.mubr.msk.bf16.mxu0 %vm470_vm0, %v5339_v50 }
  0x75   :  { %939 = vmatmul.mubr.bf16.gmra.mrb[40].mxu1 %v5341_v51 }
  0x76   :  { %686 = vmatmul.mubr.bf16.gmra.mrb[40].mxu0 %v5341_v51  ;;  %4661 = vmatprep.mubr.msk.bf16.mxu1 %vm470_vm0, %v5342_v52 }
  0x77   :  { %4637 = vmatprep.mubr.msk.bf16.mxu0 %vm470_vm0, %v5342_v52 }
  0x7d   :  { %947 = vmatmul.mubr.bf16.gmra.mrb[44].mxu1 %v5344_v53 }
  0x7e   :  { %696 = vmatmul.mubr.bf16.gmra.mrb[44].mxu0 %v5344_v53  ;;  %4662 = vmatprep.mubr.msk.bf16.mxu1 %vm470_vm0, %v5345_v54 }
  0x7f   :  { %4638 = vmatprep.mubr.msk.bf16.mxu0 %vm470_vm0, %v5345_v54 }
  0x85   :  { %955 = vmatmul.mubr.bf16.gmra.mrb[48].mxu1 %v5347_v55 }
  0x86   :  { %706 = vmatmul.mubr.bf16.gmra.mrb[48].mxu0 %v5347_v55  ;;  %4663 = vmatprep.mubr.msk.bf16.mxu1 %vm470_vm0, %v5348_v56 }
  0x87   :  { %4639 = vmatprep.mubr.msk.bf16.mxu0 %vm470_vm0, %v5348_v56 }
  0x8d   :  { %963 = vmatmul.mubr.bf16.gmra.mrb[52].mxu1 %v5350_v57 }
  0x8e   :  { %716 = vmatmul.mubr.bf16.gmra.mrb[52].mxu0 %v5350_v57  ;;  %4664 = vmatprep.mubr.msk.bf16.mxu1 %vm470_vm0, %v5351_v58 }
  0x8f   :  { %4640 = vmatprep.mubr.msk.bf16.mxu0 %vm470_vm0, %v5351_v58 }
  0x95   :  { %971 = vmatmul.mubr.bf16.gmra.mrb[56].mxu1 %v5353_v59 }
  0x96   :  { %726 = vmatmul.mubr.bf16.gmra.mrb[56].mxu0 %v5353_v59  ;;  %4665 = vmatprep.mubr.msk.bf16.mxu1 %vm470_vm0, %v5354_v60 }
  0x97   :  { %4641 = vmatprep.mubr.msk.bf16.mxu0 %vm470_vm0, %v5354_v60 }
  0x9d   :  { %979 = vmatmul.mubr.bf16.gmra.mrb[60].mxu1 %v5356_v61 }
  0x9e   :  { %736 = vmatmul.mubr.bf16.gmra.mrb[60].mxu0 %v5356_v61  ;;  %4666 = vmatprep.mubr.msk.bf16.mxu1 %vm470_vm0, %v5357_v62 }
  0x9f   :  { %4642 = vmatprep.mubr.msk.bf16.mxu0 %vm470_vm0, %v5357_v62 }
  0xa5   :  { %987 = vmatmul.mubr.bf16.gmra.mrb[64].mxu1 %v5359_v63 }
  0xa6   :  { %746 = vmatmul.mubr.bf16.gmra.mrb[64].mxu0 %v5359_v63  ;;  %4667 = vmatprep.mubr.msk.bf16.mxu1 %vm470_vm0, %v5360_v0 }
  0xa7   :  { %4643 = vmatprep.mubr.msk.bf16.mxu0 %vm470_vm0, %v5360_v0 }
  0xad   :  { %995 = vmatmul.mubr.bf16.gmra.mrb[68].mxu1 %v5362_v1 }
  0xae   :  { %756 = vmatmul.mubr.bf16.gmra.mrb[68].mxu0 %v5362_v1  ;;  %4668 = vmatprep.mubr.msk.bf16.mxu1 %vm470_vm0, %v5363_v2 }
  0xaf   :  { %4644 = vmatprep.mubr.msk.bf16.mxu0 %vm470_vm0, %v5363_v2 }
  0xb5   :  { %1003 = vmatmul.mubr.bf16.gmra.mrb[72].mxu1 %v5365_v3 }
  0xb6   :  { %766 = vmatmul.mubr.bf16.gmra.mrb[72].mxu0 %v5365_v3  ;;  %4669 = vmatprep.mubr.msk.bf16.mxu1 %vm470_vm0, %v5366_v4 }
  0xb7   :  { %4645 = vmatprep.mubr.msk.bf16.mxu0 %vm470_vm0, %v5366_v4 }
  0xbd   :  { %1011 = vmatmul.mubr.bf16.gmra.mrb[76].mxu1 %v5368_v5 }
  0xbe   :  { %776 = vmatmul.mubr.bf16.gmra.mrb[76].mxu0 %v5368_v5  ;;  %4670 = vmatprep.mubr.msk.bf16.mxu1 %vm470_vm0, %v5369_v6 }
  0xbf   :  { %4646 = vmatprep.mubr.msk.bf16.mxu0 %vm470_vm0, %v5369_v6 }
  0xc5   :  { %1019 = vmatmul.mubr.bf16.gmra.mrb[80].mxu1 %v5371_v7 }
  0xc6   :  { %786 = vmatmul.mubr.bf16.gmra.mrb[80].mxu0 %v5371_v7  ;;  %4671 = vmatprep.mubr.msk.bf16.mxu1 %vm470_vm0, %v5372_v8 }
  0xc7   :  { %4647 = vmatprep.mubr.msk.bf16.mxu0 %vm470_vm0, %v5372_v8 }
  0xcd   :  { %1027 = vmatmul.mubr.bf16.gmra.mrb[84].mxu1 %v5374_v9 }
  0xce   :  { %796 = vmatmul.mubr.bf16.gmra.mrb[84].mxu0 %v5374_v9  ;;  %4672 = vmatprep.mubr.msk.bf16.mxu1 %vm470_vm0, %v5375_v10 }
  0xcf   :  { %4648 = vmatprep.mubr.msk.bf16.mxu0 %vm470_vm0, %v5375_v10 }
  0xd5   :  { %1035 = vmatmul.mubr.bf16.gmra.mrb[88].mxu1 %v5377_v11 }
  0xd6   :  { %806 = vmatmul.mubr.bf16.gmra.mrb[88].mxu0 %v5377_v11  ;;  %4673 = vmatprep.mubr.msk.bf16.mxu1 %vm470_vm0, %v5378_v12 }
  0xd7   :  { %4649 = vmatprep.mubr.msk.bf16.mxu0 %vm470_vm0, %v5378_v12 }
  0xdd   :  { %1043 = vmatmul.mubr.bf16.gmra.mrb[92].mxu1 %v5380_v13 }
  0xde   :  { %816 = vmatmul.mubr.bf16.gmra.mrb[92].mxu0 %v5380_v13 }
  0xf8   :  { %v6050_v14 = vpop.f32.mrb[0].mxu1 }
  0xf9   :  { %v6052_v15 = vpop.f32.mrb[0].mxu0  ;;  %v862_v16 = vpop.f32.mrb[1].mxu1 }
  0xfa   :  { %8207 = vst [vmem:[#allocation2_spill] sm:$0xff] %v6052_v15  ;;  %v6054_v17 = vpop.f32.mrb[1].mxu0  ;;  %v6056_v18 = vpop.f32.mrb[2].mxu1 }
  0xfb   :  { %v6058_v19 = vpop.f32.mrb[2].mxu0  ;;  %v865_v20 = vpop.f32.mrb[3].mxu1 }
  0xfc   :  { %8208 = vst [vmem:[#allocation3_spill] sm:$0xff] %v6058_v19  ;;  %v6060_v21 = vpop.f32.mrb[3].mxu0 }
 0x100   :  { %v6062_v22 = vpop.f32.mrb[4].mxu1 }
 0x101   :  { %v6064_v23 = vpop.f32.mrb[4].mxu0  ;;  %v870_v24 = vpop.f32.mrb[5].mxu1 }
 0x102   :  { %v6066_v25 = vpop.f32.mrb[5].mxu0  ;;  %v6068_v26 = vpop.f32.mrb[6].mxu1 }
 0x103   :  { %v6070_v27 = vpop.f32.mrb[6].mxu0  ;;  %v873_v28 = vpop.f32.mrb[7].mxu1 }
 0x104   :  { %v6072_v29 = vpop.f32.mrb[7].mxu0 }
 0x108   :  { %v6074_v30 = vpop.f32.mrb[8].mxu1 }
 0x109   :  { %v6076_v31 = vpop.f32.mrb[8].mxu0  ;;  %v878_v32 = vpop.f32.mrb[9].mxu1 }
 0x10a   :  { %v6078_v33 = vpop.f32.mrb[9].mxu0  ;;  %v6080_v34 = vpop.f32.mrb[10].mxu1 }
 0x10b   :  { %v6082_v35 = vpop.f32.mrb[10].mxu0  ;;  %v881_v36 = vpop.f32.mrb[11].mxu1 }
 0x10c   :  { %v6084_v37 = vpop.f32.mrb[11].mxu0 }
 0x110   :  { %v6086_v38 = vpop.f32.mrb[12].mxu1 }
 0x111   :  { %v6088_v39 = vpop.f32.mrb[12].mxu0  ;;  %v886_v40 = vpop.f32.mrb[13].mxu1 }
 0x112   :  { %v6090_v41 = vpop.f32.mrb[13].mxu0  ;;  %v6092_v42 = vpop.f32.mrb[14].mxu1 }
 0x113   :  { %v6094_v43 = vpop.f32.mrb[14].mxu0  ;;  %v889_v44 = vpop.f32.mrb[15].mxu1 }
 0x114   :  { %v6096_v45 = vpop.f32.mrb[15].mxu0 }
 0x118   :  { %v6098_v46 = vpop.f32.mrb[16].mxu1 }
 0x119   :  { %v6100_v47 = vpop.f32.mrb[16].mxu0  ;;  %v894_v48 = vpop.f32.mrb[17].mxu1 }
 0x11a   :  { %v6102_v49 = vpop.f32.mrb[17].mxu0  ;;  %v6104_v50 = vpop.f32.mrb[18].mxu1 }
 0x11b   :  { %v6106_v51 = vpop.f32.mrb[18].mxu0  ;;  %v897_v52 = vpop.f32.mrb[19].mxu1 }
 0x11c   :  { %v6108_v53 = vpop.f32.mrb[19].mxu0 }
 0x120   :  { %v6110_v54 = vpop.f32.mrb[20].mxu1 }
 0x121   :  { %v6112_v55 = vpop.f32.mrb[20].mxu0  ;;  %v902_v56 = vpop.f32.mrb[21].mxu1 }
 0x122   :  { %v6114_v57 = vpop.f32.mrb[21].mxu0  ;;  %v6116_v58 = vpop.f32.mrb[22].mxu1 }
 0x123   :  { %v6118_v59 = vpop.f32.mrb[22].mxu0  ;;  %v905_v60 = vpop.f32.mrb[23].mxu1 }
 0x124   :  { %v6120_v61 = vpop.f32.mrb[23].mxu0 }
 0x128   :  { %v6122_v62 = vpop.f32.mrb[24].mxu1 }
 0x129   :  { %v6124_v63 = vpop.f32.mrb[24].mxu0  ;;  %v910_v0 = vpop.f32.mrb[25].mxu1 }
 0x12a   :  { %v6126_v1 = vpop.f32.mrb[25].mxu0  ;;  %v6128_v2 = vpop.f32.mrb[26].mxu1 }
 0x12b   :  { %v6130_v3 = vpop.f32.mrb[26].mxu0  ;;  %v913_v4 = vpop.f32.mrb[27].mxu1 }
 0x12c   :  { %8209 = vst [vmem:[#allocation4_spill] sm:$0xff] %v6130_v3  ;;  %v6132_v5 = vpop.f32.mrb[27].mxu0 }
 0x130   :  { %v6134_v6 = vpop.f32.mrb[28].mxu1 }
 0x131   :  { %v6136_v7 = vpop.f32.mrb[28].mxu0  ;;  %v918_v8 = vpop.f32.mrb[29].mxu1 }
 0x132   :  { %v6138_v9 = vpop.f32.mrb[29].mxu0  ;;  %v6140_v10 = vpop.f32.mrb[30].mxu1 }
 0x133   :  { %v6142_v11 = vpop.f32.mrb[30].mxu0  ;;  %v921_v12 = vpop.f32.mrb[31].mxu1 }
 0x134   :  { %v6144_v13 = vpop.f32.mrb[31].mxu0 }
 0x138   :  { %v6146_v16 = vpop.f32.mrb[32].mxu1 }
 0x139   :  { %v6148_v20 = vpop.f32.mrb[32].mxu0  ;;  %v926_v24 = vpop.f32.mrb[33].mxu1 }
 0x13a   :  { %8210 = vst [vmem:[#allocation5_spill] sm:$0xff] %v6148_v20  ;;  %v6150_v28 = vpop.f32.mrb[33].mxu0  ;;  %v6152_v32 = vpop.f32.mrb[34].mxu1 }
 0x13b   :  { %v6154_v36 = vpop.f32.mrb[34].mxu0  ;;  %v929_v40 = vpop.f32.mrb[35].mxu1 }
 0x13c   :  { %8211 = vst [vmem:[#allocation6_spill] sm:$0xff] %v6154_v36  ;;  %v6156_v44 = vpop.f32.mrb[35].mxu0 }
 0x13d   :  { %8212 = vst [vmem:[#allocation7_spill] sm:$0xff] %v6156_v44 }
 0x140   :  { %v6158_v48 = vpop.f32.mrb[36].mxu1 }
 0x141   :  { %8213 = vst [vmem:[#allocation8_spill] sm:$0xff] %v6158_v48  ;;  %v6160_v52 = vpop.f32.mrb[36].mxu0  ;;  %v934_v56 = vpop.f32.mrb[37].mxu1 }
 0x142   :  { %8214 = vst [vmem:[#allocation9_spill] sm:$0xff] %v6160_v52  ;;  %v6162_v60 = vpop.f32.mrb[37].mxu0  ;;  %v6164_v0 = vpop.f32.mrb[38].mxu1 }
 0x143   :  { %8215 = vst [vmem:[#allocation10_spill] sm:$0xff] %v6162_v60  ;;  %8216 = vst [vmem:[#allocation11_spill] sm:$0xff] %v6164_v0  ;;  %v6166_v4 = vpop.f32.mrb[38].mxu0  ;;  %v937_v8 = vpop.f32.mrb[39].mxu1 }
 0x144   :  { %8217 = vst [vmem:[#allocation12_spill] sm:$0xff] %v6166_v4  ;;  %v6168_v12 = vpop.f32.mrb[39].mxu0 }
 0x145   :  { %8218 = vst [vmem:[#allocation13_spill] sm:$0xff] %v6168_v12 }
 0x148   :  { %v6170_v24 = vpop.f32.mrb[40].mxu1 }
 0x149   :  { %8219 = vst [vmem:[#allocation14_spill] sm:$0xff] %v6170_v24  ;;  %v6172_v36 = vpop.f32.mrb[40].mxu0  ;;  %v942_v40 = vpop.f32.mrb[41].mxu1 }
 0x14a   :  { %8220 = vst [vmem:[#allocation15_spill] sm:$0xff] %v6172_v36  ;;  %v6174_v44 = vpop.f32.mrb[41].mxu0  ;;  %v6176_v48 = vpop.f32.mrb[42].mxu1 }
 0x14b   :  { %8221 = vst [vmem:[#allocation16_spill] sm:$0xff] %v6174_v44  ;;  %8222 = vst [vmem:[#allocation17_spill] sm:$0xff] %v6176_v48  ;;  %v6178_v52 = vpop.f32.mrb[42].mxu0  ;;  %v945_v56 = vpop.f32.mrb[43].mxu1 }
 0x14c   :  { %8223 = vst [vmem:[#allocation18_spill] sm:$0xff] %v6178_v52  ;;  %v6180_v60 = vpop.f32.mrb[43].mxu0 }
 0x14d   :  { %8224 = vst [vmem:[#allocation19_spill] sm:$0xff] %v6180_v60 }
 0x150   :  { %v6182_v0 = vpop.f32.mrb[44].mxu1 }
 0x151   :  { %8225 = vst [vmem:[#allocation20_spill] sm:$0xff] %v6182_v0  ;;  %v6184_v4 = vpop.f32.mrb[44].mxu0  ;;  %v950_v8 = vpop.f32.mrb[45].mxu1 }
 0x152   :  { %8226 = vst [vmem:[#allocation21_spill] sm:$0xff] %v6184_v4  ;;  %v6186_v12 = vpop.f32.mrb[45].mxu0  ;;  %v6188_v24 = vpop.f32.mrb[46].mxu1 }
 0x153   :  { %8227 = vst [vmem:[#allocation22_spill] sm:$0xff] %v6186_v12  ;;  %8228 = vst [vmem:[#allocation23_spill] sm:$0xff] %v6188_v24  ;;  %v6190_v36 = vpop.f32.mrb[46].mxu0  ;;  %v953_v40 = vpop.f32.mrb[47].mxu1 }
 0x154   :  { %8229 = vst [vmem:[#allocation24_spill] sm:$0xff] %v6190_v36  ;;  %v6192_v44 = vpop.f32.mrb[47].mxu0 }
 0x155   :  { %8230 = vst [vmem:[#allocation25_spill] sm:$0xff] %v6192_v44 }
 0x158   :  { %v6194_v48 = vpop.f32.mrb[48].mxu1 }
 0x159   :  { %8231 = vst [vmem:[#allocation26_spill] sm:$0xff] %v6194_v48  ;;  %v6198_v60 = vpop.f32.mrb[48].mxu0  ;;  %v958_v0 = vpop.f32.mrb[49].mxu1 }
 0x15a   :  { %8232 = vst [vmem:[#allocation27_spill] sm:$0xff] %v6198_v60  ;;  %v709_v4 = vpop.f32.mrb[49].mxu0  ;;  %v6202_v12 = vpop.f32.mrb[50].mxu1 }
 0x15b   :  { %v6205_v24 = vmax.f32 %v6054_v17, %v709_v4  ;;  %v6209_v44 = vpop.f32.mrb[50].mxu0  ;;  %v961_v36 = vpop.f32.mrb[51].mxu1 }
 0x15c   :  { %8234 = vst [vmem:[#allocation29_spill] sm:$0xff] %v6209_v44  ;;  %v713_v48 = vpop.f32.mrb[51].mxu0 }
 0x15d   :  { %8233 = vst [vmem:[#allocation28_spill] sm:$0xff] %v6205_v24  ;;  %v6214_v0 = vmax.f32 %v6060_v21, %v713_v48 }
 0x160   :  { %v964_v8 = vpop.f32.mrb[52].mxu1 }
 0x161   :  { %v1059_v60 = vmax.f32 %v6062_v22, %v964_v8  ;;  %v6217_v15 = vpop.f32.mrb[52].mxu0  ;;  %v966_v17 = vpop.f32.mrb[53].mxu1 }
 0x162   :  { %v719_v40 = vpop.f32.mrb[53].mxu0  ;;  %v967_v24 = vpop.f32.mrb[54].mxu1 }
 0x163   :  { %v6222_v36 = vmax.f32 %v6066_v25, %v719_v40  ;;  %v1062_v56 = vmax.f32 %v6068_v26, %v967_v24  ;;  %1181 = vrot.lane.b32.xlu0 %v1059_v60, %s5716_s0  ;;  %v6226_v21 = vpop.f32.mrb[54].mxu0  ;;  %v969_v48 = vpop.f32.mrb[55].mxu1 }
 0x164   :  { %v723_v8 = vpop.f32.mrb[55].mxu0 }
 0x165   :  { %8235 = vst [vmem:[#allocation30_spill] sm:$0xff] %v6222_v36  ;;  %v6231_v17 = vmax.f32 %v6072_v29, %v723_v8  ;;  %1185 = vrot.lane.b32.xlu1 %v1062_v56, %s5716_s0 }
 0x167   :  { %8236 = vst [vmem:[#allocation31_spill] sm:$0xff] %v6231_v17  ;;  %1179 = vrot.lane.b32.xlu0 %v6222_v36, %s5716_s0 }
 0x168   :  { %v6236_v25 = vpop.f32.mrb[56].mxu1 }
 0x169   :  { %v974_v60 = vpop.f32.mrb[57].mxu1  ;;  %1183 = vrot.lane.b32.xlu1 %v6231_v17, %s5716_s0  ;;  %v6242_v24 = vpop.f32.mrb[56].mxu0 }
 0x16a   :  { %v729_v40 = vpop.f32.mrb[57].mxu0  ;;  %v6246_v48 = vpop.f32.mrb[58].mxu1 }
 0x16b   :  { %v6249_v56 = vmax.f32 %v6078_v33, %v729_v40  ;;  %v6253_v22 = vpop.f32.mrb[58].mxu0  ;;  %v977_v60 = vpop.f32.mrb[59].mxu1 }
 0x16c   :  { %8238 = vst [vmem:[#allocation33_spill] sm:$0xff] %v6253_v22  ;;  %v733_v26 = vpop.f32.mrb[59].mxu0 }
 0x16d   :  { %8237 = vst [vmem:[#allocation32_spill] sm:$0xff] %v6249_v56  ;;  %v6258_v44 = vmax.f32 %v6084_v37, %v733_v26 }
 0x170   :  { %v980_v29 = vpop.f32.mrb[60].mxu1 }
 0x171   :  { %v1071_v19 = vmax.f32 %v6086_v38, %v980_v29  ;;  %v6261_v36 = vpop.f32.mrb[60].mxu0  ;;  %v982_v33 = vpop.f32.mrb[61].mxu1 }
 0x172   :  { %v739_v8 = vpop.f32.mrb[61].mxu0  ;;  %v983_v17 = vpop.f32.mrb[62].mxu1 }
 0x173   :  { %v6266_v60 = vmax.f32 %v6090_v41, %v739_v8  ;;  %v1074_v4 = vmax.f32 %v6092_v42, %v983_v17  ;;  %v985_v22 = vpop.f32.mrb[63].mxu1  ;;  %1197 = vrot.lane.b32.xlu1 %v1071_v19, %s5716_s0  ;;  %v6270_v37 = vpop.f32.mrb[62].mxu0 }
 0x174   :  { %v743_v26 = vpop.f32.mrb[63].mxu0 }
 0x175   :  { %8239 = vst [vmem:[#allocation34_spill] sm:$0xff] %v6266_v60  ;;  %v6275_v29 = vmax.f32 %v6096_v45, %v743_v26  ;;  %1195 = vrot.lane.b32.xlu0 %v6266_v60, %s5716_s0 }
 0x177   :  { %8240 = vst [vmem:[#allocation35_spill] sm:$0xff] %v6275_v29  ;;  %1201 = vrot.lane.b32.xlu1 %v1074_v4, %s5716_s0 }
 0x178   :  { %v6280_v41 = vpop.f32.mrb[64].mxu1 }
 0x179   :  { %v990_v19 = vpop.f32.mrb[65].mxu1  ;;  %1199 = vrot.lane.b32.xlu0 %v6275_v29, %s5716_s0  ;;  %v6286_v22 = vpop.f32.mrb[64].mxu0  ;;  %v8260_v20 = vmax.f32 %v6098_v46, %v6280_v41  ;;  %v5399_v46 = vld [vmem:[%s8147_s3 + $0x60] ss:$16 sps:$4 sm:$0xff]  }
 0x17a   :  { %8241 = vst [vmem:[#allocation36_spill] sm:$0xff] %v6286_v22  ;;  %v749_v17 = vpop.f32.mrb[65].mxu0  ;;  %v6290_v8 = vpop.f32.mrb[66].mxu1 }
 0x17b   :  { %v6293_v33 = vmax.f32 %v6102_v49, %v749_v17  ;;  %v6297_v26 = vpop.f32.mrb[66].mxu0  ;;  %v993_v19 = vpop.f32.mrb[67].mxu1 }
 0x17c   :  { %8242 = vst [vmem:[#allocation37_spill] sm:$0xff] %v6297_v26  ;;  %v753_v40 = vpop.f32.mrb[67].mxu0 }
 0x17d   :  { %v6302_v42 = vmax.f32 %v6108_v53, %v753_v40 }
 0x180   :  { %v996_v45 = vpop.f32.mrb[68].mxu1 }
 0x181   :  { %v1083_v60 = vmax.f32 %v6110_v54, %v996_v45  ;;  %v6305_v29 = vpop.f32.mrb[68].mxu0  ;;  %v998_v49 = vpop.f32.mrb[69].mxu1 }
 0x182   :  { %v759_v4 = vpop.f32.mrb[69].mxu0  ;;  %v999_v22 = vpop.f32.mrb[70].mxu1 }
 0x183   :  { %v6310_v19 = vmax.f32 %v6114_v57, %v759_v4  ;;  %v1086_v38 = vmax.f32 %v6116_v58, %v999_v22  ;;  %v1001_v26 = vpop.f32.mrb[71].mxu1  ;;  %1213 = vrot.lane.b32.xlu1 %v1083_v60, %s5716_s0  ;;  %v6314_v53 = vpop.f32.mrb[70].mxu0 }
 0x184   :  { %v763_v40 = vpop.f32.mrb[71].mxu0 }
 0x185   :  { %8243 = vst [vmem:[#allocation38_spill] sm:$0xff] %v6310_v19  ;;  %v6319_v45 = vmax.f32 %v6120_v61, %v763_v40  ;;  %1211 = vrot.lane.b32.xlu0 %v6310_v19, %s5716_s0 }
 0x187   :  { %8244 = vst [vmem:[#allocation39_spill] sm:$0xff] %v6319_v45  ;;  %1217 = vrot.lane.b32.xlu1 %v1086_v38, %s5716_s0 }
 0x188   :  { %v6324_v57 = vpop.f32.mrb[72].mxu1 }
 0x189   :  { %v1006_v60 = vpop.f32.mrb[73].mxu1  ;;  %1215 = vrot.lane.b32.xlu0 %v6319_v45, %s5716_s0  ;;  %v6330_v22 = vpop.f32.mrb[72].mxu0 }
 0x18a   :  { %8245 = vst [vmem:[#allocation40_spill] sm:$0xff] %v6330_v22  ;;  %v769_v4 = vpop.f32.mrb[73].mxu0  ;;  %v6334_v26 = vpop.f32.mrb[74].mxu1 }
 0x18b   :  { %v6337_v49 = vmax.f32 %v6126_v1, %v769_v4  ;;  %v6341_v40 = vpop.f32.mrb[74].mxu0  ;;  %v1009_v60 = vpop.f32.mrb[75].mxu1  ;;  %v8253_v4 = vld [vmem:[#allocation7_spill] sm:$0xff] }
 0x18c   :  { %8246 = vst [vmem:[#allocation41_spill] sm:$0xff] %v6341_v40  ;;  %v773_v17 = vpop.f32.mrb[75].mxu0 }
 0x18d   :  { %v6346_v58 = vmax.f32 %v6132_v5, %v773_v17 }
 0x190   :  { %v1012_v61 = vpop.f32.mrb[76].mxu1 }
 0x191   :  { %v1095_v19 = vmax.f32 %v6134_v6, %v1012_v61  ;;  %v6349_v45 = vpop.f32.mrb[76].mxu0  ;;  %v1014_v1 = vpop.f32.mrb[77].mxu1 }
 0x192   :  { %v779_v38 = vpop.f32.mrb[77].mxu0  ;;  %v1015_v22 = vpop.f32.mrb[78].mxu1 }
 0x193   :  { %v6354_v60 = vmax.f32 %v6138_v9, %v779_v38  ;;  %v1098_v54 = vmax.f32 %v6140_v10, %v1015_v22  ;;  %v1017_v40 = vpop.f32.mrb[79].mxu1  ;;  %1229 = vrot.lane.b32.xlu1 %v1095_v19, %s5716_s0  ;;  %v6358_v5 = vpop.f32.mrb[78].mxu0  ;;  %v5383_v10 = vld [vmem:[%s8147_s3 + $0x4] ss:$16 sps:$4 sm:$0xff]   ;;  %v5381_v38 = vld [vmem:[%s8147_s3] ss:$16 sps:$4 sm:$0xff]  }
 0x194   :  { %v783_v17 = vpop.f32.mrb[79].mxu0  ;;  %3039 = vmatprep.subr.bf16.mxu0 %v5383_v10 }
 0x195   :  { %8247 = vst [vmem:[#allocation42_spill] sm:$0xff] %v6354_v60  ;;  %v6363_v61 = vmax.f32 %v6144_v13, %v783_v17  ;;  %1227 = vrot.lane.b32.xlu0 %v6354_v60, %s5716_s0  ;;  %v5384_v17 = vld [vmem:[%s8147_s3 + $0x8] ss:$16 sps:$4 sm:$0xff]   ;;  %3040 = vmatpush1.bf16.msra.mxu0 %v5381_v38  ;;  %v8254_v38 = vmax.f32 %v6080_v34, %v6246_v48  ;;  %v5393_v48 = vld [vmem:[%s8147_s3 + $0x40] ss:$16 sps:$4 sm:$0xff]  }
 0x197   :  { %8248 = vst [vmem:[#allocation43_spill] sm:$0xff] %v6363_v61  ;;  %1233 = vrot.lane.b32.xlu1 %v1098_v54, %s5716_s0  ;;  %v8250_v54 = vmax.f32 %v6074_v30, %v6236_v25  ;;  %v5387_v25 = vld [vmem:[%s8147_s3 + $0x20] ss:$16 sps:$4 sm:$0xff]  }
 0x198   :  { %v6368_v9 = vpop.f32.mrb[80].mxu1 }
 0x199   :  { %v1022_v22 = vpop.f32.mrb[81].mxu1  ;;  %1231 = vrot.lane.b32.xlu0 %v6363_v61, %s5716_s0  ;;  %v6377_v13 = vpop.f32.mrb[80].mxu0 }
 0x19a   :  { %8249 = vst [vmem:[#allocation44_spill] sm:$0xff] %v6377_v13  ;;  %v789_v40 = vpop.f32.mrb[81].mxu0  ;;  %v6384_v1 = vpop.f32.mrb[82].mxu1  ;;  %v5386_v22 = vld [vmem:[%s8147_s3 + $0xc] ss:$16 sps:$4 sm:$0xff]  }
 0x19b   :  { %v6393_v6 = vmax.f32 %v6150_v28, %v789_v40  ;;  %1189 = vrot.lane.b32.xlu1 %v8250_v54, %s5716_s0  ;;  %v6401_v10 = vpop.f32.mrb[82].mxu0  ;;  %v1025_v19 = vpop.f32.mrb[83].mxu1  ;;  %3378 = vmatprep.subr.bf16.mxu1 %v5386_v22  ;;  %v5389_v28 = vld [vmem:[%s8147_s3 + $0x24] ss:$16 sps:$4 sm:$0xff]   ;;  %v5392_v40 = vld [vmem:[%s8147_s3 + $0x2c] ss:$16 sps:$4 sm:$0xff]  }
 0x19c   :  { %8251 = vst [vmem:[#allocation45_spill] sm:$0xff] %v6401_v10  ;;  %v793_v13 = vpop.f32.mrb[83].mxu0  ;;  %3379 = vmatpush1.bf16.msra.mxu1 %v5384_v17  ;;  %v5390_v19 = vld [vmem:[%s8147_s3 + $0x28] ss:$16 sps:$4 sm:$0xff]   ;;  %3041 = vmatprep.subr.bf16.mxu0 %v5389_v28  ;;  %v5398_v54 = vld [vmem:[%s8147_s3 + $0x4c] ss:$16 sps:$4 sm:$0xff]  }
 0x19d   :  { %v6412_v30 = vmax.f32 %v8253_v4, %v793_v13  ;;  %1187 = vrot.lane.b32.xlu0 %v6249_v56, %s5716_s0  ;;  %3380 = vmatprep.subr.bf16.mxu1 %v5392_v40  ;;  %v5395_v13 = vld [vmem:[%s8147_s3 + $0x44] ss:$16 sps:$4 sm:$0xff]   ;;  %v5396_v40 = vld [vmem:[%s8147_s3 + $0x48] ss:$16 sps:$4 sm:$0xff]  }
 0x19e   :  { %3042 = vmatpush1.bf16.msra.mxu0 %v5387_v25  ;;  %v8255_v17 = vld [vmem:[#allocation8_spill] sm:$0xff]  ;;  %v8272_v25 = vmax.f32 %v6122_v62, %v6324_v57  ;;  %v5414_v57 = vld [vmem:[%s8147_s3 + $0xa8] ss:$16 sps:$4 sm:$0xff]  }
 0x19f   :  { %1193 = vrot.lane.b32.xlu1 %v8254_v38, %s5716_s0  ;;  %3043 = vmatprep.subr.bf16.mxu0 %v5395_v13  ;;  %v5411_v62 = vld [vmem:[%s8147_s3 + $0xa0] ss:$16 sps:$4 sm:$0xff]  }
 0x1a0   :  { %v6426_v4 = vpop.f32.mrb[84].mxu1  ;;  %3381 = vmatpush1.bf16.msra.mxu1 %v5390_v19  ;;  %v8259_v19 = vld [vmem:[#allocation11_spill] sm:$0xff] }
 0x1a1   :  { %v1030_v28 = vpop.f32.mrb[85].mxu1  ;;  %1191 = vrot.lane.b32.xlu0 %v6258_v44, %s5716_s0  ;;  %v6438_v34 = vpop.f32.mrb[84].mxu0  ;;  %3382 = vmatprep.subr.bf16.mxu1 %v5398_v54  ;;  %v5404_v54 = vld [vmem:[%s8147_s3 + $0x6c] ss:$16 sps:$4 sm:$0xff]  }
 0x1a2   :  { %8256 = vst [vmem:[#allocation7_spill] sm:$0xff] %v6438_v34  ;;  %v799_v61 = vpop.f32.mrb[85].mxu0  ;;  %v6448_v22 = vpop.f32.mrb[86].mxu1  ;;  %v8258_v28 = vld [vmem:[#allocation10_spill] sm:$0xff]  ;;  %3044 = vmatpush1.bf16.msra.mxu0 %v5393_v48 }
 0x1a3   :  { %v6451_v10 = vmax.f32 %v8258_v28, %v799_v61  ;;  %1205 = vrot.lane.b32.xlu1 %v8260_v20, %s5716_s0  ;;  %v6459_v3 = vpop.f32.mrb[86].mxu0  ;;  %v1033_v56 = vpop.f32.mrb[87].mxu1  ;;  %v5401_v61 = vld [vmem:[%s8147_s3 + $0x64] ss:$16 sps:$4 sm:$0xff]   ;;  %v8263_v28 = vld [vmem:[#allocation13_spill] sm:$0xff] }
 0x1a4   :  { %8261 = vst [vmem:[#allocation8_spill] sm:$0xff] %v6459_v3  ;;  %v803_v13 = vpop.f32.mrb[87].mxu0  ;;  %3383 = vmatpush1.bf16.msra.mxu1 %v5396_v40  ;;  %v5402_v20 = vld [vmem:[%s8147_s3 + $0x68] ss:$16 sps:$4 sm:$0xff]   ;;  %3045 = vmatprep.subr.bf16.mxu0 %v5401_v61  ;;  %v8264_v56 = vmax.f32 %v6104_v50, %v6290_v8  ;;  %v5407_v48 = vld [vmem:[%s8147_s3 + $0x84] ss:$16 sps:$4 sm:$0xff]  }
 0x1a5   :  { %v6470_v60 = vmax.f32 %v8263_v28, %v803_v13  ;;  %1203 = vrot.lane.b32.xlu0 %v6293_v33, %s5716_s0  ;;  %3384 = vmatprep.subr.bf16.mxu1 %v5404_v54  ;;  %v5410_v40 = vld [vmem:[%s8147_s3 + $0x8c] ss:$16 sps:$4 sm:$0xff]   ;;  %v5405_v8 = vld [vmem:[%s8147_s3 + $0x80] ss:$16 sps:$4 sm:$0xff]   ;;  %v5408_v28 = vld [vmem:[%s8147_s3 + $0x88] ss:$16 sps:$4 sm:$0xff]  }
 0x1a6   :  { %3046 = vmatpush1.bf16.msra.mxu0 %v5399_v46 }
 0x1a7   :  { %1209 = vrot.lane.b32.xlu1 %v8264_v56, %s5716_s0  ;;  %3047 = vmatprep.subr.bf16.mxu0 %v5407_v48 }
 0x1a8   :  { %v6484_v41 = vpop.f32.mrb[88].mxu1  ;;  %3385 = vmatpush1.bf16.msra.mxu1 %v5402_v20  ;;  %v8271_v20 = vld [vmem:[#allocation17_spill] sm:$0xff] }
 0x1a9   :  { %8265 = vst [vmem:[#allocation10_spill] sm:$0xff] %v6484_v41  ;;  %v1038_v54 = vpop.f32.mrb[89].mxu1  ;;  %1207 = vrot.lane.b32.xlu0 %v6302_v42, %s5716_s0  ;;  %v6496_v50 = vpop.f32.mrb[88].mxu0  ;;  %3386 = vmatprep.subr.bf16.mxu1 %v5410_v40  ;;  %v5416_v40 = vld [vmem:[%s8147_s3 + $0xac] ss:$16 sps:$4 sm:$0xff]  }
 0x1aa   :  { %8267 = vst [vmem:[#allocation11_spill] sm:$0xff] %v6496_v50  ;;  %v809_v34 = vpop.f32.mrb[89].mxu0  ;;  %v6506_v61 = vpop.f32.mrb[90].mxu1  ;;  %v8269_v54 = vld [vmem:[#allocation16_spill] sm:$0xff]  ;;  %3048 = vmatpush1.bf16.msra.mxu0 %v5405_v8  ;;  %v8282_v50 = vmax.f32 %v6146_v16, %v6368_v9  ;;  %v5426_v9 = vld [vmem:[%s8147_s3 + $0xe8] ss:$16 sps:$4 sm:$0xff]  }
 0x1ab   :  { %v6509_v3 = vmax.f32 %v8269_v54, %v809_v34  ;;  %1221 = vrot.lane.b32.xlu1 %v8272_v25, %s5716_s0  ;;  %v6517_v41 = vpop.f32.mrb[90].mxu0  ;;  %v1041_v13 = vpop.f32.mrb[91].mxu1  ;;  %v5413_v34 = vld [vmem:[%s8147_s3 + $0xa4] ss:$16 sps:$4 sm:$0xff]   ;;  %v8274_v54 = vld [vmem:[#allocation19_spill] sm:$0xff]  ;;  %v8276_v25 = vmax.f32 %v6128_v2, %v6334_v26 }
 0x1ac   :  { %8273 = vst [vmem:[#allocation16_spill] sm:$0xff] %v6517_v41  ;;  %v813_v48 = vpop.f32.mrb[91].mxu0  ;;  %3387 = vmatpush1.bf16.msra.mxu1 %v5408_v28  ;;  %3049 = vmatprep.subr.bf16.mxu0 %v5413_v34  ;;  %v5419_v8 = vld [vmem:[%s8147_s3 + $0xc4] ss:$16 sps:$4 sm:$0xff]   ;;  %v5422_v28 = vld [vmem:[%s8147_s3 + $0xcc] ss:$16 sps:$4 sm:$0xff]  }
 0x1ad   :  { %8270 = vst [vmem:[#allocation13_spill] sm:$0xff] %v6509_v3  ;;  %v6528_v38 = vmax.f32 %v8274_v54, %v813_v48  ;;  %1219 = vrot.lane.b32.xlu0 %v6337_v49, %s5716_s0  ;;  %3388 = vmatprep.subr.bf16.mxu1 %v5416_v40  ;;  %v8277_v48 = vld [vmem:[#allocation20_spill] sm:$0xff]  ;;  %v5420_v54 = vld [vmem:[%s8147_s3 + $0xc8] ss:$16 sps:$4 sm:$0xff]  }
 0x1ae   :  { %3050 = vmatpush1.bf16.msra.mxu0 %v5411_v62  ;;  %v5417_v26 = vld [vmem:[%s8147_s3 + $0xc0] ss:$16 sps:$4 sm:$0xff]   ;;  %v8294_v62 = vmax.f32 %v6070_v27, %v6226_v21 }
 0x1af   :  { %8275 = vst [vmem:[#allocation17_spill] sm:$0xff] %v6528_v38  ;;  %1225 = vrot.lane.b32.xlu1 %v8276_v25, %s5716_s0  ;;  %3051 = vmatprep.subr.bf16.mxu0 %v5419_v8  ;;  %v5423_v16 = vld [vmem:[%s8147_s3 + $0xe0] ss:$16 sps:$4 sm:$0xff]  }
 0x1b0   :  { %v6542_v13 = vpop.f32.mrb[92].mxu1  ;;  %3389 = vmatpush1.bf16.msra.mxu1 %v5414_v57  ;;  %v8281_v57 = vld [vmem:[#allocation23_spill] sm:$0xff] }
 0x1b1   :  { %v1046_v40 = vpop.f32.mrb[93].mxu1  ;;  %1223 = vrot.lane.b32.xlu0 %v6346_v58, %s5716_s0  ;;  %v6554_v2 = vpop.f32.mrb[92].mxu0  ;;  %3390 = vmatprep.subr.bf16.mxu1 %v5422_v28  ;;  %v5428_v28 = vld [vmem:[%s8147_s3 + $0xec] ss:$16 sps:$4 sm:$0xff]  }
 0x1b2   :  { %8278 = vst [vmem:[#allocation19_spill] sm:$0xff] %v6554_v2  ;;  %v819_v56 = vpop.f32.mrb[93].mxu0  ;;  %v6564_v34 = vpop.f32.mrb[94].mxu1  ;;  %v8280_v40 = vld [vmem:[#allocation22_spill] sm:$0xff]  ;;  %3052 = vmatpush1.bf16.msra.mxu0 %v5417_v26 }
 0x1b3   :  { %v6567_v41 = vmax.f32 %v8280_v40, %v819_v56  ;;  %1237 = vrot.lane.b32.xlu1 %v8282_v50, %s5716_s0  ;;  %v6575_v46 = vpop.f32.mrb[94].mxu0  ;;  %v1049_v25 = vpop.f32.mrb[95].mxu1  ;;  %v5425_v56 = vld [vmem:[%s8147_s3 + $0xe4] ss:$16 sps:$4 sm:$0xff]   ;;  %v8285_v40 = vld [vmem:[#allocation25_spill] sm:$0xff]  ;;  %v8287_v50 = vmax.f32 %v6152_v32, %v6384_v1  ;;  %v8288_v1 = vmax.f32 %v6056_v18, %v6202_v12 }
 0x1b4   :  { %8283 = vst [vmem:[#allocation20_spill] sm:$0xff] %v6575_v46  ;;  %v823_v8 = vpop.f32.mrb[95].mxu0  ;;  %3391 = vmatpush1.bf16.msra.mxu1 %v5420_v54  ;;  %3053 = vmatprep.subr.bf16.mxu0 %v5425_v56  ;;  %v5431_v26 = vld [vmem:[%s8147_s3 + $0x104] ss:$16 sps:$4 sm:$0xff]   ;;  %v5434_v54 = vld [vmem:[%s8147_s3 + $0x10c] ss:$16 sps:$4 sm:$0xff]  }
 0x1b5   :  { %v6586_v52 = vmax.f32 %v8285_v40, %v823_v8  ;;  %1235 = vrot.lane.b32.xlu0 %v6393_v6, %s5716_s0  ;;  %3392 = vmatprep.subr.bf16.mxu1 %v5428_v28  ;;  %v5429_v25 = vld [vmem:[%s8147_s3 + $0x100] ss:$16 sps:$4 sm:$0xff]   ;;  %v5432_v32 = vld [vmem:[%s8147_s3 + $0x108] ss:$16 sps:$4 sm:$0xff]   ;;  %v5437_v8 = vld [vmem:[%s8147_s3 + $0x124] ss:$16 sps:$4 sm:$0xff]  }
 0x1b6   :  { %3054 = vmatpush1.bf16.msra.mxu0 %v5423_v16  ;;  %v5440_v56 = vld [vmem:[%s8147_s3 + $0x12c] ss:$16 sps:$4 sm:$0xff]   ;;  %v8289_v28 = vld [vmem:[#allocation26_spill] sm:$0xff]  ;;  %v5438_v12 = vld [vmem:[%s8147_s3 + $0x128] ss:$16 sps:$4 sm:$0xff]   ;;  %v8199_v46 = vmov 0.0  }
 0x1b7   :  { %8286 = vst [vmem:[#allocation22_spill] sm:$0xff] %v6586_v52  ;;  %1241 = vrot.lane.b32.xlu1 %v8287_v50, %s5716_s0  ;;  %3055 = vmatprep.subr.bf16.mxu0 %v5431_v26  ;;  %v8290_v40 = vmax.f32 %v6050_v14, %v8289_v28  ;;  %v5435_v18 = vld [vmem:[%s8147_s3 + $0x120] ss:$16 sps:$4 sm:$0xff]   ;;  %v5443_v14 = vld [vmem:[%s8147_s3 + $0x144] ss:$16 sps:$4 sm:$0xff]  }
 0x1b8   :  { %3393 = vmatpush1.bf16.msra.mxu1 %v5426_v9  ;;  %v5446_v16 = vld [vmem:[%s8147_s3 + $0x14c] ss:$16 sps:$4 sm:$0xff]   ;;  %v8291_v9 = vld [vmem:[#allocation28_spill] sm:$0xff]  ;;  %v5444_v26 = vld [vmem:[%s8147_s3 + $0x148] ss:$16 sps:$4 sm:$0xff]  }
 0x1b9   :  { %1239 = vrot.lane.b32.xlu0 %v6412_v30, %s5716_s0  ;;  %3394 = vmatprep.subr.bf16.mxu1 %v5434_v54  ;;  %v5441_v50 = vld [vmem:[%s8147_s3 + $0x140] ss:$16 sps:$4 sm:$0xff]   ;;  %v5449_v54 = vld [vmem:[%s8147_s3 + $0x164] ss:$16 sps:$4 sm:$0xff]  }
 0x1ba   :  { %3056 = vmatpush1.bf16.msra.mxu0 %v5429_v25  ;;  %v5452_v25 = vld [vmem:[%s8147_s3 + $0x16c] ss:$16 sps:$4 sm:$0xff]   ;;  %v5453_v28 = vld [vmem:[%s8147_s3 + $0x180] ss:$16 sps:$4 sm:$0xff]  }
 0x1bb   :  { %1177 = vrot.lane.b32.xlu1 %v8288_v1, %s5716_s0  ;;  %3057 = vmatprep.subr.bf16.mxu0 %v5437_v8  ;;  %v5450_v1 = vld [vmem:[%s8147_s3 + $0x168] ss:$16 sps:$4 sm:$0xff]   ;;  %v5455_v8 = vld [vmem:[%s8147_s3 + $0x184] ss:$16 sps:$4 sm:$0xff]  }
 0x1bc   :  { %3395 = vmatpush1.bf16.msra.mxu1 %v5432_v32  ;;  %v5447_v32 = vld [vmem:[%s8147_s3 + $0x160] ss:$16 sps:$4 sm:$0xff]  }
 0x1bd   :  { %1173 = vrot.lane.b32.xlu0 %v8290_v40, %s5716_s0  ;;  %3396 = vmatprep.subr.bf16.mxu1 %v5440_v56  ;;  %v5458_v56 = vld [vmem:[%s8147_s3 + $0x18c] ss:$16 sps:$4 sm:$0xff]   ;;  %v5456_v40 = vld [vmem:[%s8147_s3 + $0x188] ss:$16 sps:$4 sm:$0xff]  }
 0x1be   :  { %3058 = vmatpush1.bf16.msra.mxu0 %v5435_v18  ;;  %v5461_v18 = vld [vmem:[%s8147_s3 + $0x1a4] ss:$16 sps:$4 sm:$0xff]  }
 0x1bf   :  { %1175 = vrot.lane.b32.xlu1 %v6214_v0, %s5716_s0  ;;  %3059 = vmatprep.subr.bf16.mxu0 %v5443_v14  ;;  %v5459_v14 = vld [vmem:[%s8147_s3 + $0x1a0] ss:$16 sps:$4 sm:$0xff]  }
 0x1c0   :  { %3397 = vmatpush1.bf16.msra.mxu1 %v5438_v12  ;;  %v5464_v12 = vld [vmem:[%s8147_s3 + $0x1ac] ss:$16 sps:$4 sm:$0xff]  }
 0x1c1   :  { %1171 = vrot.lane.b32.xlu0 %v8291_v9, %s5716_s0  ;;  %3398 = vmatprep.subr.bf16.mxu1 %v5446_v16  ;;  %v5462_v16 = vld [vmem:[%s8147_s3 + $0x1a8] ss:$16 sps:$4 sm:$0xff]  }
 0x1c2   :  { %3060 = vmatpush1.bf16.msra.mxu0 %v5441_v50  ;;  %v1390_v50 = vlaneseq }
 0x1c3   :  { %3061 = vmatprep.subr.bf16.mxu0 %v5449_v54  ;;  %v5470_v54 = vld [vmem:[%s8147_s3 + $0x1cc] ss:$16 sps:$4 sm:$0xff]  }
 0x1c4   :  { %3399 = vmatpush1.bf16.msra.mxu1 %v5444_v26  ;;  %v5467_v26 = vld [vmem:[%s8147_s3 + $0x1c4] ss:$16 sps:$4 sm:$0xff]  }
 0x1c5   :  { %3400 = vmatprep.subr.bf16.mxu1 %v5452_v25  ;;  %v5465_v25 = vld [vmem:[%s8147_s3 + $0x1c0] ss:$16 sps:$4 sm:$0xff]  }
 0x1c6   :  { %3062 = vmatpush1.bf16.msra.mxu0 %v5447_v32  ;;  %v5468_v32 = vld [vmem:[%s8147_s3 + $0x1c8] ss:$16 sps:$4 sm:$0xff]  }
 0x1c7   :  { %3063 = vmatprep.subr.bf16.mxu0 %v5455_v8  ;;  %v5473_v8 = vld [vmem:[%s8147_s3 + $0x1e4] ss:$16 sps:$4 sm:$0xff]  }
 0x1c8   :  { %3401 = vmatpush1.bf16.msra.mxu1 %v5450_v1  ;;  %v6698_v1 = vshrl.u32 %v1390_v50, 7 }
 0x1c9   :  { %3402 = vmatprep.subr.bf16.mxu1 %v5458_v56  ;;  %v5476_v56 = vld [vmem:[%s8147_s3 + $0x1ec] ss:$16 sps:$4 sm:$0xff]  }
 0x1ca   :  { %3064 = vmatpush1.bf16.msra.mxu0 %v5453_v28  ;;  %8292 = vst [vmem:[#allocation23_spill] sm:$0xff] %v6698_v1 }
 0x1cb   :  { %3065 = vmatprep.subr.bf16.mxu0 %v5461_v18  ;;  %v5471_v18 = vld [vmem:[%s8147_s3 + $0x1e0] ss:$16 sps:$4 sm:$0xff]  }
 0x1cc   :  { %3403 = vmatpush1.bf16.msra.mxu1 %v5456_v40  ;;  %v8197_v40 = vsub.s32 0, %v6698_v1 }
 0x1cd   :  { %3404 = vmatprep.subr.bf16.mxu1 %v5464_v12  ;;  %v5474_v12 = vld [vmem:[%s8147_s3 + $0x1e8] ss:$16 sps:$4 sm:$0xff]  }
 0x1ce   :  { %3066 = vmatpush1.bf16.msra.mxu0 %v5459_v14  ;;  %v6718_v14 = vld [vmem:[%s8148_s2] sm:$0x3]  ;;  %s5718_s2 = smov 16  }
 0x1cf   :  { %3067 = vmatprep.subr.bf16.mxu0 %v5467_v26  ;;  %v6725_v50 = vrot.slane %v6718_v14, %v8197_v40 }
 0x1d0   :  { %3405 = vmatpush1.bf16.msra.mxu1 %v5462_v16 }
 0x1d1   :  { %3406 = vmatprep.subr.bf16.mxu1 %v5470_v54 }
 0x1d2   :  { %3068 = vmatpush1.bf16.msra.mxu0 %v5465_v25  ;;  %v8293_v25 = vmax.f32 %v6064_v23, %v6217_v15 }
 0x1d3   :  { %3069 = vmatprep.subr.bf16.mxu0 %v5473_v8 }
 0x1d4   :  { %3407 = vmatpush1.bf16.msra.mxu1 %v5468_v32 }
 0x1d5   :  { %v6706_v28 = vpop.permute.xlu0 %1181  ;;  %3408 = vmatprep.subr.bf16.mxu1 %v5476_v56 }
 0x1d6   :  { %3070 = vmatpush1.bf16.msra.mxu0 %v5471_v18 }
 0x1d7   :  { %v6720_v16 = vpop.permute.xlu1 %1185 }
 0x1d8   :  { %3409 = vmatpush1.bf16.msra.mxu1 %v5474_v12 }
 0x1d9   :  { %v1180_v26 = vpop.permute.xlu0 %1179 }
 0x1da   :  { %v1270_v54 = vsel %vm1267_vm2, %v1180_v26, %v6706_v28 }
 0x1db   :  { %v1344_v32 = vmax.f32 %v8293_v25, %v1270_v54  ;;  %v1184_v8 = vpop.permute.xlu1 %1183 }
 0x1dc   :  { %v1271_v56 = vsel %vm1267_vm2, %v1184_v8, %v6720_v16 }
 0x1dd   :  { %v1404_v18 = vadd.f32 %v6725_v50, %v1344_v32  ;;  %v1346_v40 = vmax.f32 %v8294_v62, %v1271_v56  ;;  %v8297_v62 = vmax.f32 %v6088_v39, %v6261_v36  ;;  %v5479_v39 = vld [vmem:[%s8147_s3 + $0x204] ss:$16 sps:$4 sm:$0xff]  }
 0x1de   :  { %3152 = vmatprep.subr.bf16.mxu0 %v5479_v39  ;;  %v8302_v39 = vmax.f32 %v6118_v59, %v6314_v53 }
 0x1df   :  { %vm1452_vm3 = vcmp.gt.f32.partialorder %v1404_v18, 1.0  ;;  %v1406_v12 = vadd.f32 %v6725_v50, %v1346_v40 }
 0x1e0   :  { %v4678_v26 = vsel %vm1452_vm3, 1.0, %v8199_v46 }
 0x1e1   :  { %vm1454_vm4 = vcmp.gt.f32.partialorder %v1406_v12, 1.0  ;;  %v8298_v12 = vmax.f32 %v6094_v43, %v6270_v37 }
 0x1e2   :  { %v4680_v15 = vsel %vm1454_vm4, 1.0, %v8199_v46  ;;  %vm6741_vm5 = vmpackc.low %vm1454_vm4, %vm1452_vm3 }
 0x1e3   :  { %v1594_v54 = vpack.c.bf16 %v4680_v15, %v4678_v26 }
 0x1e5   :  { %v6745_v25 = vpop.permute.xlu1 %1197  ;;  %1624 = vrot.lane.b32.xlu0 %v1594_v54, %s5718_s2 }
 0x1e7   :  { %v1196_v27 = vpop.permute.xlu0 %1195 }
 0x1e8   :  { %v1274_v21 = vsel %vm1267_vm2, %v1196_v27, %v6745_v25  ;;  %v5482_v27 = vld [vmem:[%s8147_s3 + $0x20c] ss:$16 sps:$4 sm:$0xff]  }
 0x1e9   :  { %v1352_v40 = vmax.f32 %v8297_v62, %v1274_v21  ;;  %v6754_v8 = vpop.permute.xlu1 %1201  ;;  %3491 = vmatprep.subr.bf16.mxu1 %v5482_v27 }
 0x1eb   :  { %v1412_v32 = vadd.f32 %v6725_v50, %v1352_v40  ;;  %v1200_v56 = vpop.permute.xlu0 %1199 }
 0x1ec   :  { %v1275_v18 = vsel %vm1267_vm2, %v1200_v56, %v6754_v8 }
 0x1ed   :  { %v1354_v26 = vmax.f32 %v8298_v12, %v1275_v18  ;;  %vm1460_vm6 = vcmp.gt.f32.partialorder %v1412_v32, 1.0  ;;  %v8301_v32 = vmax.f32 %v6112_v55, %v6305_v29 }
 0x1ee   :  { %v4686_v36 = vsel %vm1460_vm6, 1.0, %v8199_v46 }
 0x1ef   :  { %v1414_v15 = vadd.f32 %v6725_v50, %v1354_v26 }
 0x1f1   :  { %vm1462_vm7 = vcmp.gt.f32.partialorder %v1414_v15, 1.0 }
 0x1f2   :  { %v4688_v54 = vsel %vm1462_vm7, 1.0, %v8199_v46  ;;  %vm6770_vm8 = vmpackc.low %vm1462_vm7, %vm1460_vm6 }
 0x1f3   :  { %v6774_v43 = vpack.c.bf16 %v4688_v54, %v4686_v36 }
 0x1f5   :  { %v6776_v37 = vpop.permute.xlu1 %1213  ;;  %1628 = vrot.lane.b32.xlu1 %v6774_v43, %s5718_s2 }
 0x1f7   :  { %v1212_v62 = vpop.permute.xlu0 %1211 }
 0x1f8   :  { %v1278_v40 = vsel %vm1267_vm2, %v1212_v62, %v6776_v37 }
 0x1f9   :  { %v1360_v56 = vmax.f32 %v8301_v32, %v1278_v40  ;;  %1243 = vrot.lane.b32.xlu1 %v6451_v10, %s5716_s0  ;;  %v6788_v12 = vpop.permute.xlu1 %1217  ;;  %v8305_v32 = vmax.f32 %v6136_v7, %v6349_v45  ;;  %v8308_v7 = vmax.f32 %v8259_v19, %v6448_v22 }
 0x1fb   :  { %v1420_v18 = vadd.f32 %v6725_v50, %v1360_v56  ;;  %v1216_v26 = vpop.permute.xlu0 %1215 }
 0x1fc   :  { %v1279_v15 = vsel %vm1267_vm2, %v1216_v26, %v6788_v12  ;;  %v8306_v26 = vmax.f32 %v8255_v17, %v6426_v4 }
 0x1fd   :  { %v1362_v36 = vmax.f32 %v8302_v39, %v1279_v15  ;;  %1247 = vrot.lane.b32.xlu1 %v6470_v60, %s5716_s0  ;;  %vm1468_vm9 = vcmp.gt.f32.partialorder %v1420_v18, 1.0 }
 0x1fe   :  { %v4694_v29 = vsel %vm1468_vm9, 1.0, %v8199_v46 }
 0x1ff   :  { %v1422_v55 = vadd.f32 %v6725_v50, %v1362_v36 }
 0x201   :  { %vm1470_vm10 = vcmp.gt.f32.partialorder %v1422_v55, 1.0  ;;  %v8307_v55 = vmax.f32 %v6142_v11, %v6358_v5 }
 0x202   :  { %v4696_v54 = vsel %vm1470_vm10, 1.0, %v8199_v46  ;;  %vm6800_vm11 = vmpackc.low %vm1470_vm10, %vm1468_vm9 }
 0x203   :  { %v6804_v62 = vpack.c.bf16 %v4696_v54, %v4694_v29 }
 0x205   :  { %v6806_v40 = vpop.permute.xlu1 %1229  ;;  %1632 = vrot.lane.b32.xlu0 %v6804_v62, %s5718_s2 }
 0x207   :  { %v1228_v59 = vpop.permute.xlu0 %1227 }
 0x208   :  { %v1282_v53 = vsel %vm1267_vm2, %v1228_v59, %v6806_v40  ;;  %v8309_v59 = vmax.f32 %v6076_v31, %v6242_v24 }
 0x209   :  { %v1368_v56 = vmax.f32 %v8305_v32, %v1282_v53  ;;  %v6815_v18 = vpop.permute.xlu1 %1233  ;;  %1245 = vrot.lane.b32.xlu0 %v8306_v26, %s5716_s0 }
 0x20b   :  { %v1428_v15 = vadd.f32 %v6725_v50, %v1368_v56  ;;  %v1232_v39 = vpop.permute.xlu0 %1231 }
 0x20c   :  { %v1283_v36 = vsel %vm1267_vm2, %v1232_v39, %v6815_v18  ;;  %v8312_v39 = vld [vmem:[#allocation33_spill] sm:$0xff] }
 0x20d   :  { %v1370_v29 = vmax.f32 %v8307_v55, %v1283_v36  ;;  %v1190_v54 = vpop.permute.xlu1 %1189  ;;  %1249 = vrot.lane.b32.xlu0 %v8308_v7, %s5716_s0  ;;  %vm1476_vm12 = vcmp.gt.f32.partialorder %v1428_v15, 1.0  ;;  %v8313_v31 = vmax.f32 %v6082_v35, %v8312_v39 }
 0x20e   :  { %v4702_v11 = vsel %vm1476_vm12, 1.0, %v8199_v46 }
 0x20f   :  { %v1430_v45 = vadd.f32 %v6725_v50, %v1370_v29  ;;  %v1188_v4 = vpop.permute.xlu0 %1187 }
 0x210   :  { %v1272_v17 = vsel %vm1267_vm2, %v1188_v4, %v1190_v54 }
 0x211   :  { %vm1478_vm13 = vcmp.gt.f32.partialorder %v1430_v45, 1.0  ;;  %v1348_v53 = vmax.f32 %v8309_v59, %v1272_v17  ;;  %v1194_v32 = vpop.permute.xlu1 %1193  ;;  %v8314_v45 = vld [vmem:[#allocation36_spill] sm:$0xff] }
 0x212   :  { %v4704_v5 = vsel %vm1478_vm13, 1.0, %v8199_v46  ;;  %vm6838_vm14 = vmpackc.low %vm1478_vm13, %vm1476_vm12  ;;  %v8315_v4 = vmax.f32 %v6100_v47, %v8314_v45  ;;  %v8318_v47 = vld [vmem:[#allocation37_spill] sm:$0xff] }
 0x213   :  { %v6842_v22 = vpack.c.bf16 %v4704_v5, %v4702_v11  ;;  %v1408_v19 = vadd.f32 %v6725_v50, %v1348_v53  ;;  %v1192_v26 = vpop.permute.xlu0 %1191  ;;  %v8319_v39 = vmax.f32 %v6106_v51, %v8318_v47  ;;  %v8320_v51 = vld [vmem:[#allocation40_spill] sm:$0xff] }
 0x214   :  { %v1273_v15 = vsel %vm1267_vm2, %v1192_v26, %v1194_v32  ;;  %v5515_v11 = vld [vmem:[%s8147_s3 + $0x2c4] ss:$16 sps:$4 sm:$0xff]  }
 0x215   :  { %v1350_v24 = vmax.f32 %v8313_v31, %v1273_v15  ;;  %v6849_v36 = vpop.permute.xlu1 %1205  ;;  %1636 = vrot.lane.b32.xlu1 %v6842_v22, %s5718_s2  ;;  %vm1456_vm15 = vcmp.gt.f32.partialorder %v1408_v19, 1.0 }
 0x216   :  { %v4682_v35 = vsel %vm1456_vm15, 1.0, %v8199_v46 }
 0x217   :  { %v1410_v55 = vadd.f32 %v6725_v50, %v1350_v24  ;;  %v1204_v29 = vpop.permute.xlu0 %1203 }
 0x218   :  { %v1276_v7 = vsel %vm1267_vm2, %v1204_v29, %v6849_v36 }
 0x219   :  { %vm1458_vm0 = vcmp.gt.f32.partialorder %v1410_v55, 1.0  ;;  %v1356_v17 = vmax.f32 %v8315_v4, %v1276_v7  ;;  %v6859_v59 = vpop.permute.xlu1 %1209  ;;  %v8203_v55 = vsub.s32 1, %v6698_v1  ;;  %v1351_v4 = vmax.f32 %v6258_v44, %v1194_v32  ;;  %v8324_v44 = vld [vmem:[#allocation32_spill] sm:$0xff] }
 0x21a   :  { %v4684_v53 = vsel %vm1458_vm0, 1.0, %v8199_v46  ;;  %vm6863_vm1 = vmpackc.low %vm1458_vm0, %vm1456_vm15  ;;  %v1349_v32 = vmax.f32 %v8324_v44, %v1190_v54 }
 0x21b   :  { %v1416_v5 = vadd.f32 %v6725_v50, %v1356_v17  ;;  %v1208_v19 = vpop.permute.xlu0 %1207  ;;  %v6868_v26 = vpack.c.bf16 %v4684_v53, %v4682_v35  ;;  %v8321_v17 = vmax.f32 %v6124_v63, %v8320_v51  ;;  %v6898_v47 = vrot.slane %v6718_v14, %v8203_v55  ;;  %v8326_v51 = vld [vmem:[#allocation41_spill] sm:$0xff] }
 0x21c   :  { %v1277_v15 = vsel %vm1267_vm2, %v1208_v19, %v6859_v59  ;;  %v8336_v55 = vld [vmem:[#allocation45_spill] sm:$0xff] }
 0x21d   :  { %v1358_v31 = vmax.f32 %v8319_v39, %v1277_v15  ;;  %v6875_v24 = vpop.permute.xlu1 %1221  ;;  %1788 = vrot.lane.b32.xlu0 %v6868_v26, %s5718_s2  ;;  %vm1464_vm3 = vcmp.gt.f32.partialorder %v1416_v5, 1.0  ;;  %v1409_v14 = vadd.f32 %v6898_v47, %v1349_v32  ;;  %v8358_v5 = vld [vmem:[#allocation7_spill] sm:$0xff] }
 0x21e   :  { %v4690_v19 = vsel %vm1464_vm3, 1.0, %v8199_v46 }
 0x21f   :  { %v1418_v29 = vadd.f32 %v6725_v50, %v1358_v31  ;;  %v1220_v7 = vpop.permute.xlu0 %1219  ;;  %vm1457_vm13 = vcmp.gt.f32.partialorder %v1409_v14, 1.0 }
 0x220   :  { %v1280_v45 = vsel %vm1267_vm2, %v1220_v7, %v6875_v24  ;;  %v1411_v7 = vadd.f32 %v6898_v47, %v1351_v4  ;;  %v8328_v4 = vld [vmem:[#allocation5_spill] sm:$0xff] }
 0x221   :  { %vm1466_vm4 = vcmp.gt.f32.partialorder %v1418_v29, 1.0  ;;  %v1364_v35 = vmax.f32 %v8321_v17, %v1280_v45  ;;  %v6887_v53 = vpop.permute.xlu1 %1225  ;;  %v8325_v45 = vld [vmem:[#allocation4_spill] sm:$0xff] }
 0x222   :  { %v4692_v15 = vsel %vm1466_vm4, 1.0, %v8199_v46  ;;  %vm6891_vm6 = vmpackc.low %vm1466_vm4, %vm1464_vm3  ;;  %v8327_v17 = vmax.f32 %v8325_v45, %v8326_v51  ;;  %vm1459_vm9 = vcmp.gt.f32.partialorder %v1411_v7, 1.0  ;;  %v8331_v45 = vmov 0.0  }
 0x223   :  { %v6901_v39 = vpack.c.bf16 %v4692_v15, %v4690_v19  ;;  %v1424_v63 = vadd.f32 %v6725_v50, %v1364_v35  ;;  %v1224_v31 = vpop.permute.xlu0 %1223  ;;  %v8329_v15 = vld [vmem:[#allocation44_spill] sm:$0xff] }
 0x224   :  { %v1281_v29 = vsel %vm1267_vm2, %v1224_v31, %v6887_v53  ;;  %v8330_v44 = vmax.f32 %v8328_v4, %v8329_v15  ;;  %v4685_v4 = vsel %vm1459_vm9, 1.0, %v8331_v45  ;;  %v1359_v15 = vmax.f32 %v6302_v42, %v6859_v59 }
 0x225   :  { %v1366_v46 = vmax.f32 %v8327_v17, %v1281_v29  ;;  %v6910_v1 = vpop.permute.xlu1 %1237  ;;  %1792 = vrot.lane.b32.xlu1 %v6901_v39, %s5718_s2  ;;  %vm1472_vm7 = vcmp.gt.f32.partialorder %v1424_v63, 1.0  ;;  %v1357_v42 = vmax.f32 %v6293_v33, %v6849_v36 }
 0x226   :  { %v4698_v32 = vsel %vm1472_vm7, 1.0, %v8331_v45 }
 0x227   :  { %v1426_v54 = vadd.f32 %v6725_v50, %v1366_v46  ;;  %v1236_v35 = vpop.permute.xlu0 %1235 }
 0x228   :  { %v1284_v19 = vsel %vm1267_vm2, %v1236_v35, %v6910_v1 }
 0x229   :  { %vm1474_vm10 = vcmp.gt.f32.partialorder %v1426_v54, 1.0  ;;  %v1372_v31 = vmax.f32 %v8330_v44, %v1284_v19  ;;  %v6921_v29 = vpop.permute.xlu1 %1241  ;;  %1251 = vrot.lane.b32.xlu1 %v6509_v3, %s5716_s0  ;;  %v8334_v54 = vld [vmem:[#allocation31_spill] sm:$0xff]  ;;  %v8335_v44 = vld [vmem:[#allocation6_spill] sm:$0xff] }
 0x22a   :  { %v4700_v63 = vsel %vm1474_vm10, 1.0, %v8331_v45  ;;  %vm6927_vm12 = vmpackc.low %vm1474_vm10, %vm1472_vm7  ;;  %v1347_v35 = vmax.f32 %v8334_v54, %v6720_v16  ;;  %v8337_v2 = vmax.f32 %v8335_v44, %v8336_v55  ;;  %v8338_v16 = vld [vmem:[#allocation30_spill] sm:$0xff]  ;;  %v1419_v54 = vadd.f32 %v6898_v47, %v1359_v15 }
 0x22b   :  { %v6931_v7 = vpack.c.bf16 %v4700_v63, %v4698_v32  ;;  %v1432_v51 = vadd.f32 %v6725_v50, %v1372_v31  ;;  %v1240_v17 = vpop.permute.xlu0 %1239  ;;  %v1345_v31 = vmax.f32 %v8338_v16, %v6706_v28  ;;  %v4683_v63 = vsel %vm1457_vm13, 1.0, %v8331_v45  ;;  %v8339_v28 = vld [vmem:[#allocation14_spill] sm:$0xff] }
 0x22c   :  { %v1285_v19 = vsel %vm1267_vm2, %v1240_v17, %v6921_v29  ;;  %v6958_v55 = vpack.c.bf16 %v4685_v4, %v4683_v63  ;;  %v1407_v17 = vadd.f32 %v6898_v47, %v1347_v35  ;;  %v8340_v44 = vld [vmem:[#allocation10_spill] sm:$0xff]  ;;  %v1417_v4 = vadd.f32 %v6898_v47, %v1357_v42  ;;  %v8343_v63 = vld [vmem:[#allocation29_spill] sm:$0xff] }
 0x22d   :  { %v1374_v14 = vmax.f32 %v8337_v2, %v1285_v19  ;;  %v6944_v32 = vpop.permute.xlu1 %1177  ;;  %1796 = vrot.lane.b32.xlu0 %v6931_v7, %s5718_s2  ;;  %1255 = vrot.lane.b32.xlu1 %v6528_v38, %s5716_s0  ;;  %vm1480_vm15 = vcmp.gt.f32.partialorder %v1432_v51, 1.0  ;;  %v8341_v16 = vmax.f32 %v8339_v28, %v8340_v44  ;;  %v1405_v35 = vadd.f32 %v6898_v47, %v1345_v31 }
 0x22e   :  { %v4706_v33 = vsel %vm1480_vm15, 1.0, %v8331_v45  ;;  %vm1455_vm3 = vcmp.gt.f32.partialorder %v1407_v17, 1.0  ;;  %vm1467_vm4 = vcmp.gt.f32.partialorder %v1419_v54, 1.0  ;;  %v1367_v31 = vmax.f32 %v6346_v58, %v6887_v53 }
 0x22f   :  { %v1434_v59 = vadd.f32 %v6725_v50, %v1374_v14  ;;  %v6956_v2 = vpop.permute.xlu0 %1173  ;;  %v8342_v14 = vld [vmem:[#allocation3_spill] sm:$0xff]  ;;  %vm1465_vm7 = vcmp.gt.f32.partialorder %v1417_v4, 1.0  ;;  %v1365_v58 = vmax.f32 %v6337_v49, %v6875_v24  ;;  %vm1453_vm9 = vcmp.gt.f32.partialorder %v1405_v35, 1.0 }
 0x230   :  { %v4693_v54 = vsel %vm1467_vm4, 1.0, %v8331_v45  ;;  %v4691_v49 = vsel %vm1465_vm7, 1.0, %v8331_v45 }
 0x231   :  { %vm1482_vm0 = vcmp.gt.f32.partialorder %v1434_v59, 1.0  ;;  %v1176_v19 = vpop.permute.xlu1 %1175  ;;  %1253 = vrot.lane.b32.xlu0 %v8341_v16, %s5716_s0  ;;  %1655 = vrot.lane.b32.xlu1 %v6958_v55, %s5719_s15  ;;  %v8344_v59 = vmax.f32 %v8342_v14, %v8343_v63  ;;  %v8345_v16 = vld [vmem:[#allocation35_spill] sm:$0xff]  ;;  %v7015_v24 = vpack.c.bf16 %v4693_v54, %v4691_v49  ;;  %v1425_v35 = vadd.f32 %v6898_v47, %v1365_v58 }
 0x232   :  { %v4708_v36 = vsel %vm1482_vm0, 1.0, %v8331_v45  ;;  %v1269_v51 = vsel %vm1267_vm2, %v1176_v19, %v6944_v32  ;;  %v1355_v3 = vmax.f32 %v8345_v16, %v6754_v8  ;;  %v8346_v19 = vld [vmem:[#allocation2_spill] sm:$0xff]  ;;  %v1375_v63 = vmax.f32 %v6412_v30, %v6921_v29 }
 0x233   :  { %v6974_v15 = vpack.c.bf16 %v4708_v36, %v4706_v33  ;;  %v1342_v28 = vmax.f32 %v8344_v59, %v1269_v51  ;;  %v1172_v44 = vpop.permute.xlu0 %1171  ;;  %v8347_v33 = vld [vmem:[#allocation27_spill] sm:$0xff]  ;;  %v8349_v51 = vmax.f32 %v8271_v20, %v6506_v61  ;;  %v8350_v8 = vld [vmem:[#allocation34_spill] sm:$0xff]  ;;  %v4681_v61 = vsel %vm1455_vm3, 1.0, %v8331_v45 }
 0x234   :  { %v1268_v38 = vsel %vm1267_vm2, %v1172_v44, %v6956_v2  ;;  %v8348_v36 = vmax.f32 %v8346_v19, %v8347_v33  ;;  %v1353_v17 = vmax.f32 %v8350_v8, %v6745_v25  ;;  %v1427_v20 = vadd.f32 %v6898_v47, %v1367_v31  ;;  %v8355_v31 = vld [vmem:[#allocation43_spill] sm:$0xff]  ;;  %v8356_v33 = vld [vmem:[#allocation42_spill] sm:$0xff] }
 0x235   :  { %v1402_v42 = vadd.f32 %v6725_v50, %v1342_v28  ;;  %1257 = vrot.lane.b32.xlu0 %v8349_v51, %s5716_s0  ;;  %1800 = vrot.lane.b32.xlu1 %v6974_v15, %s5718_s2  ;;  %v4679_v25 = vsel %vm1453_vm9, 1.0, %v8331_v45  ;;  %v8354_v28 = vld [vmem:[#allocation38_spill] sm:$0xff]  ;;  %vm1473_vm7 = vcmp.gt.f32.partialorder %v1425_v35, 1.0  ;;  %v1435_v19 = vadd.f32 %v6898_v47, %v1375_v63 }
 0x236   :  { %v1340_v52 = vmax.f32 %v8348_v36, %v1268_v38  ;;  %v1415_v38 = vadd.f32 %v6898_v47, %v1355_v3  ;;  %v7018_v4 = vpack.c.bf16 %v4681_v61, %v4679_v25  ;;  %vm1475_vm3 = vcmp.gt.f32.partialorder %v1427_v20, 1.0  ;;  %v5477_v63 = vld [vmem:[%s8147_s3 + $0x200] ss:$16 sps:$4 sm:$0xff]   ;;  %v5494_v3 = vld [vmem:[%s8147_s3 + $0x24c] ss:$16 sps:$4 sm:$0xff]  }
 0x237   :  { %vm1450_vm10 = vcmp.gt.f32.partialorder %v1402_v42, 1.0  ;;  %v1361_v44 = vmax.f32 %v8354_v28, %v6776_v37  ;;  %v4701_v16 = vsel %vm1475_vm3, 1.0, %v8331_v45  ;;  %v1371_v42 = vmax.f32 %v8355_v31, %v6815_v18  ;;  %v5480_v28 = vld [vmem:[%s8147_s3 + $0x208] ss:$16 sps:$4 sm:$0xff]   ;;  %v5489_v31 = vld [vmem:[%s8147_s3 + $0x240] ss:$16 sps:$4 sm:$0xff]  }
 0x238   :  { %v1400_v53 = vadd.f32 %v6725_v50, %v1340_v52  ;;  %v1413_v52 = vadd.f32 %v6898_v47, %v1353_v17  ;;  %vm1463_vm0 = vcmp.gt.f32.partialorder %v1415_v38, 1.0  ;;  %v4699_v37 = vsel %vm1473_vm7, 1.0, %v8331_v45 }
 0x239   :  { %1653 = vrot.lane.b32.xlu0 %v6868_v26, %s5719_s15  ;;  %1676 = vrot.lane.b32.xlu1 %v6774_v43, %s5720_s16  ;;  %v8353_v26 = vld [vmem:[#allocation39_spill] sm:$0xff]  ;;  %v4689_v59 = vsel %vm1463_vm0, 1.0, %v8331_v45  ;;  %v1369_v36 = vmax.f32 %v8356_v33, %v6806_v40  ;;  %v7049_v51 = vpack.c.bf16 %v4701_v16, %v4699_v37  ;;  %v1431_v8 = vadd.f32 %v6898_v47, %v1371_v42 }
 0x23a   :  { %vm1448_vm13 = vcmp.gt.f32.partialorder %v1400_v53, 1.0  ;;  %v1363_v14 = vmax.f32 %v8353_v26, %v6788_v12  ;;  %vm1461_vm4 = vcmp.gt.f32.partialorder %v1413_v52, 1.0  ;;  %v1373_v12 = vmax.f32 %v6393_v6, %v6910_v1  ;;  %v5492_v42 = vld [vmem:[%s8147_s3 + $0x248] ss:$16 sps:$4 sm:$0xff]   ;;  %v5500_v37 = vld [vmem:[%s8147_s3 + $0x26c] ss:$16 sps:$4 sm:$0xff]  }
 0x23b   :  { %vm7010_vm15 = vmpackc.low %vm1450_vm10, %vm1448_vm13  ;;  %v4687_v30 = vsel %vm1461_vm4, 1.0, %v8331_v45  ;;  %v1421_v1 = vadd.f32 %v6898_v47, %v1361_v44  ;;  %vm1483_vm10 = vcmp.gt.f32.partialorder %v1435_v19, 1.0  ;;  %v1429_v17 = vadd.f32 %v6898_v47, %v1369_v36  ;;  %v5485_v44 = vld [vmem:[%s8147_s3 + $0x224] ss:$16 sps:$4 sm:$0xff]   ;;  %v5498_v33 = vld [vmem:[%s8147_s3 + $0x268] ss:$16 sps:$4 sm:$0xff]  }
 0x23c   :  { %v1423_v29 = vadd.f32 %v6898_v47, %v1363_v14  ;;  %v7044_v6 = vpack.c.bf16 %v4689_v59, %v4687_v30  ;;  %v1433_v18 = vadd.f32 %v6898_v47, %v1373_v12  ;;  %v4709_v58 = vsel %vm1483_vm10, 1.0, %v8331_v45  ;;  %v5488_v12 = vld [vmem:[%s8147_s3 + $0x22c] ss:$16 sps:$4 sm:$0xff]   ;;  %v5486_v30 = vld [vmem:[%s8147_s3 + $0x228] ss:$16 sps:$4 sm:$0xff]  }
 0x23d   :  { %1626 = vrot.lane.b32.xlu0 %v7018_v4, %s5718_s2  ;;  %1659 = vrot.lane.b32.xlu1 %v7015_v24, %s5719_s15  ;;  %vm1469_vm13 = vcmp.gt.f32.partialorder %v1421_v1, 1.0  ;;  %v1341_v53 = vmax.f32 %v8291_v9, %v6956_v2  ;;  %vm1479_vm3 = vcmp.gt.f32.partialorder %v1431_v8, 1.0  ;;  %v1343_v61 = vmax.f32 %v6214_v0, %v6944_v32  ;;  %v5497_v19 = vld [vmem:[%s8147_s3 + $0x264] ss:$16 sps:$4 sm:$0xff]   ;;  %v5495_v1 = vld [vmem:[%s8147_s3 + $0x260] ss:$16 sps:$4 sm:$0xff]  }
 0x23e   :  { %vm1471_vm9 = vcmp.gt.f32.partialorder %v1423_v29, 1.0  ;;  %vm1481_vm0 = vcmp.gt.f32.partialorder %v1433_v18, 1.0  ;;  %v4695_v38 = vsel %vm1469_vm13, 1.0, %v8331_v45  ;;  %vm1477_vm4 = vcmp.gt.f32.partialorder %v1429_v17, 1.0  ;;  %v5491_v29 = vld [vmem:[%s8147_s3 + $0x244] ss:$16 sps:$4 sm:$0xff]  }
 0x23f   :  { %v4697_v40 = vsel %vm1471_vm9, 1.0, %v8331_v45  ;;  %v4707_v54 = vsel %vm1481_vm0, 1.0, %v8331_v45  ;;  %v4705_v9 = vsel %vm1479_vm3, 1.0, %v8331_v45  ;;  %v1401_v2 = vadd.f32 %v6898_v47, %v1341_v53  ;;  %v5503_v36 = vld [vmem:[%s8147_s3 + $0x284] ss:$16 sps:$4 sm:$0xff]  }
 0x240   :  { %v7070_v20 = vpack.c.bf16 %v4697_v40, %v4695_v38  ;;  %v7072_v52 = vpack.c.bf16 %v4709_v58, %v4707_v54  ;;  %v4703_v49 = vsel %vm1477_vm4, 1.0, %v8331_v45  ;;  %v1403_v25 = vadd.f32 %v6898_v47, %v1343_v61  ;;  %v5506_v8 = vld [vmem:[%s8147_s3 + $0x28c] ss:$16 sps:$4 sm:$0xff]   ;;  %v5501_v40 = vld [vmem:[%s8147_s3 + $0x280] ss:$16 sps:$4 sm:$0xff]  }
 0x241   :  { %1657 = vrot.lane.b32.xlu0 %v6901_v39, %s5719_s15  ;;  %1680 = vrot.lane.b32.xlu1 %v6804_v62, %s5720_s16  ;;  %v7082_v0 = vpack.c.bf16 %v4705_v9, %v4703_v49  ;;  %vm1449_vm7 = vcmp.gt.f32.partialorder %v1401_v2, 1.0  ;;  %vm1640_vm10 = vcmask 130048   ;;  %v5721_v16 = vmov 1.0|1.0   ;;  %v5504_v58 = vld [vmem:[%s8147_s3 + $0x288] ss:$16 sps:$4 sm:$0xff]  }
 0x242   :  { %vm1451_vm9 = vcmp.gt.f32.partialorder %v1403_v25, 1.0  ;;  %v4675_v32 = vsel %vm1449_vm7, 1.0, %v8331_v45  ;;  %v5509_v53 = vld [vmem:[%s8147_s3 + $0x2a4] ss:$16 sps:$4 sm:$0xff]   ;;  %v5507_v38 = vld [vmem:[%s8147_s3 + $0x2a0] ss:$16 sps:$4 sm:$0xff]  }
 0x243   :  { %v4677_v35 = vsel %vm1451_vm9, 1.0, %v8331_v45  ;;  %v5510_v54 = vld [vmem:[%s8147_s3 + $0x2a8] ss:$16 sps:$4 sm:$0xff]   ;;  %v5518_v61 = vld [vmem:[%s8147_s3 + $0x2cc] ss:$16 sps:$4 sm:$0xff]   ;;  %vm1715_vm7 = vcmask 523264  }
 0x244   :  { %v1593_v26 = vpack.c.bf16 %v4677_v35, %v4675_v32  ;;  %v5513_v9 = vld [vmem:[%s8147_s3 + $0x2c0] ss:$16 sps:$4 sm:$0xff]   ;;  %v5516_v2 = vld [vmem:[%s8147_s3 + $0x2c8] ss:$16 sps:$4 sm:$0xff]   ;;  %v5521_v49 = vld [vmem:[%s8147_s3 + $0x2e4] ss:$16 sps:$4 sm:$0xff]  }
 0x245   :  { %1630 = vrot.lane.b32.xlu0 %v7044_v6, %s5718_s2  ;;  %1663 = vrot.lane.b32.xlu1 %v7049_v51, %s5719_s15  ;;  %v5524_v25 = vld [vmem:[%s8147_s3 + $0x2ec] ss:$16 sps:$4 sm:$0xff]   ;;  %v5519_v32 = vld [vmem:[%s8147_s3 + $0x2e0] ss:$16 sps:$4 sm:$0xff]   ;;  %vm3014_vm9 = vcmask 654336  }
 0x246   :  { %v5522_v35 = vld [vmem:[%s8147_s3 + $0x2e8] ss:$16 sps:$4 sm:$0xff]  }
 0x249   :  { %1661 = vrot.lane.b32.xlu0 %v6931_v7, %s5719_s15  ;;  %1684 = vrot.lane.b32.xlu1 %v6842_v22, %s5720_s16 }
 0x24d   :  { %1634 = vrot.lane.b32.xlu0 %v7070_v20, %s5718_s2  ;;  %1667 = vrot.lane.b32.xlu1 %v7072_v52, %s5719_s15 }
 0x251   :  { %1638 = vrot.lane.b32.xlu0 %v7082_v0, %s5718_s2  ;;  %1810 = vrot.lane.b32.xlu1 %v7044_v6, %s5719_s15 }
 0x255   :  { %1665 = vrot.lane.b32.xlu0 %v6974_v15, %s5719_s15 }
 0x257   :  { %v7092_v14 = vpop.permute.xlu0 %1624 }
 0x258   :  { %v1723_v59 = vsel %vm1640_vm10, %v1593_v26, %v7092_v14 }
 0x259   :  { %1808 = vrot.lane.b32.xlu0 %v6774_v43, %s5719_s15  ;;  %3071 = vmatprep.mubr.bf16.mxu0 %v1723_v59  ;;  %v5483_v43 = vld [vmem:[%s8147_s3 + $0x220] ss:$16 sps:$4 sm:$0xff]  }
 0x25a   :  { %3410 = vmatprep.mubr.bf16.mxu1 %v1723_v59  ;;  %4903 = vmatmul.mubr.msk.bf16.vlgmr.msra.gmra.mrb[96].mxu0 %vm7010_vm15, %v5721_v16  ;;  %v5530_v59 = vld [vmem:[%s8147_s3 + $0x30c] ss:$16 sps:$4 sm:$0xff]  }
 0x25b   :  { %4927 = vmatmul.mubr.msk.bf16.vlgmr.msra.gmra.mrb[96].mxu1 %vm7010_vm15, %v5721_v16  ;;  %3153 = vmatpush1.bf16.msra.mxu0 %v5477_v63  ;;  %v5527_v63 = vld [vmem:[%s8147_s3 + $0x304] ss:$16 sps:$4 sm:$0xff]  }
 0x25c   :  { %3492 = vmatpush1.bf16.msra.mxu1 %v5480_v28  ;;  %3154 = vmatprep.subr.bf16.mxu0 %v5485_v44  ;;  %v5525_v44 = vld [vmem:[%s8147_s3 + $0x300] ss:$16 sps:$4 sm:$0xff]  }
 0x25d   :  { %1790 = vrot.lane.b32.xlu0 %v6958_v55, %s5718_s2  ;;  %3493 = vmatprep.subr.bf16.mxu1 %v5488_v12  ;;  %v5528_v12 = vld [vmem:[%s8147_s3 + $0x308] ss:$16 sps:$4 sm:$0xff]  }
 0x25f   :  { %3155 = vmatpush1.bf16.msra.mxu0 %v5483_v43 }
 0x260   :  { %3494 = vmatpush1.bf16.msra.mxu1 %v5486_v30  ;;  %3156 = vmatprep.subr.bf16.mxu0 %v5491_v29  ;;  %v5533_v30 = vld [vmem:[%s8147_s3 + $0x324] ss:$16 sps:$4 sm:$0xff]   ;;  %v5536_v29 = vld [vmem:[%s8147_s3 + $0x32c] ss:$16 sps:$4 sm:$0xff]  }
 0x261   :  { %1812 = vrot.lane.b32.xlu0 %v6804_v62, %s5719_s15  ;;  %3495 = vmatprep.subr.bf16.mxu1 %v5494_v3 }
 0x263   :  { %3157 = vmatpush1.bf16.msra.mxu0 %v5489_v31 }
 0x264   :  { %3496 = vmatpush1.bf16.msra.mxu1 %v5492_v42  ;;  %3158 = vmatprep.subr.bf16.mxu0 %v5497_v19  ;;  %v5531_v42 = vld [vmem:[%s8147_s3 + $0x320] ss:$16 sps:$4 sm:$0xff]   ;;  %v5534_v19 = vld [vmem:[%s8147_s3 + $0x328] ss:$16 sps:$4 sm:$0xff]  }
 0x265   :  { %1794 = vrot.lane.b32.xlu0 %v7015_v24, %s5718_s2  ;;  %3497 = vmatprep.subr.bf16.mxu1 %v5500_v37  ;;  %v8357_v37 = vld [vmem:[#allocation9_spill] sm:$0xff] }
 0x267   :  { %v7155_v18 = vpop.permute.xlu1 %1628  ;;  %3159 = vmatpush1.bf16.msra.mxu0 %v5495_v1  ;;  %v8359_v1 = vmax.f32 %v8357_v37, %v8358_v5  ;;  %v5555_v5 = vld [vmem:[%s8147_s3 + $0x3a0] ss:$16 sps:$4 sm:$0xff]  }
 0x268   :  { %v1727_v17 = vsel %vm1640_vm10, %v6958_v55, %v7155_v18  ;;  %3498 = vmatpush1.bf16.msra.mxu1 %v5498_v33  ;;  %3160 = vmatprep.subr.bf16.mxu0 %v5503_v36  ;;  %v5512_v55 = vld [vmem:[%s8147_s3 + $0x2ac] ss:$16 sps:$4 sm:$0xff]   ;;  %v5539_v36 = vld [vmem:[%s8147_s3 + $0x344] ss:$16 sps:$4 sm:$0xff]  }
 0x269   :  { %1816 = vrot.lane.b32.xlu0 %v6842_v22, %s5719_s15  ;;  %3081 = vmatprep.mubr.bf16.mxu0 %v1727_v17 }
 0x26a   :  { %3420 = vmatprep.mubr.bf16.mxu1 %v1727_v17  ;;  %4905 = vmatmul.mubr.msk.bf16.gmra.mrb[100].mxu0 %vm6863_vm1, %v5721_v16 }
 0x26b   :  { %4929 = vmatmul.mubr.msk.bf16.gmra.mrb[100].mxu1 %vm6863_vm1, %v5721_v16  ;;  %3499 = vmatprep.subr.bf16.mxu1 %v5506_v8  ;;  %v1244_v43 = vpop.permute.xlu1 %1243  ;;  %v5542_v8 = vld [vmem:[%s8147_s3 + $0x34c] ss:$16 sps:$4 sm:$0xff]  }
 0x26c   :  { %3161 = vmatpush1.bf16.msra.mxu0 %v5501_v40  ;;  %3500 = vmatpush1.bf16.msra.mxu1 %v5504_v58 }
 0x26d   :  { %1798 = vrot.lane.b32.xlu0 %v7049_v51, %s5718_s2  ;;  %3162 = vmatprep.subr.bf16.mxu0 %v5509_v53 }
 0x26e   :  { %3501 = vmatprep.subr.bf16.mxu1 %v5512_v55  ;;  %v5537_v55 = vld [vmem:[%s8147_s3 + $0x340] ss:$16 sps:$4 sm:$0xff]  }
 0x26f   :  { %v1248_v17 = vpop.permute.xlu1 %1247 }
 0x270   :  { %3163 = vmatpush1.bf16.msra.mxu0 %v5507_v38  ;;  %3502 = vmatpush1.bf16.msra.mxu1 %v5510_v54  ;;  %v5540_v38 = vld [vmem:[%s8147_s3 + $0x348] ss:$16 sps:$4 sm:$0xff]   ;;  %v8360_v54 = vld [vmem:[#allocation12_spill] sm:$0xff] }
 0x271   :  { %1802 = vrot.lane.b32.xlu0 %v7072_v52, %s5718_s2  ;;  %3164 = vmatprep.subr.bf16.mxu0 %v5515_v11  ;;  %v8361_v11 = vld [vmem:[#allocation8_spill] sm:$0xff] }
 0x272   :  { %3503 = vmatprep.subr.bf16.mxu1 %v5518_v61  ;;  %v8362_v61 = vmax.f32 %v8360_v54, %v8361_v11 }
 0x274   :  { %3165 = vmatpush1.bf16.msra.mxu0 %v5513_v9  ;;  %3504 = vmatpush1.bf16.msra.mxu1 %v5516_v2  ;;  %v5545_v2 = vld [vmem:[%s8147_s3 + $0x364] ss:$16 sps:$4 sm:$0xff]  }
 0x275   :  { %3166 = vmatprep.subr.bf16.mxu0 %v5521_v49  ;;  %3505 = vmatprep.subr.bf16.mxu1 %v5524_v25  ;;  %v5548_v49 = vld [vmem:[%s8147_s3 + $0x36c] ss:$16 sps:$4 sm:$0xff]  }
 0x277   :  { %v7217_v26 = vpop.permute.xlu0 %1632 }
 0x278   :  { %v1731_v28 = vsel %vm1640_vm10, %v7015_v24, %v7217_v26  ;;  %3167 = vmatpush1.bf16.msra.mxu0 %v5519_v32  ;;  %3506 = vmatpush1.bf16.msra.mxu1 %v5522_v35  ;;  %v5543_v32 = vld [vmem:[%s8147_s3 + $0x360] ss:$16 sps:$4 sm:$0xff]   ;;  %v5546_v35 = vld [vmem:[%s8147_s3 + $0x368] ss:$16 sps:$4 sm:$0xff]  }
 0x279   :  { %3091 = vmatprep.mubr.bf16.mxu0 %v1731_v28  ;;  %3430 = vmatprep.mubr.bf16.mxu1 %v1731_v28 }
 0x27a   :  { %4907 = vmatmul.mubr.msk.bf16.gmra.mrb[104].mxu0 %vm6891_vm6, %v5721_v16  ;;  %4931 = vmatmul.mubr.msk.bf16.gmra.mrb[104].mxu1 %vm6891_vm6, %v5721_v16 }
 0x27b   :  { %v7246_v3 = vpop.permute.xlu0 %1245  ;;  %3168 = vmatprep.subr.bf16.mxu0 %v5527_v63  ;;  %3507 = vmatprep.subr.bf16.mxu1 %v5530_v59 }
 0x27c   :  { %v1286_v31 = vsel %vm1267_vm2, %v1244_v43, %v7246_v3  ;;  %3169 = vmatpush1.bf16.msra.mxu0 %v5525_v44  ;;  %3508 = vmatpush1.bf16.msra.mxu1 %v5528_v12  ;;  %v5551_v43 = vld [vmem:[%s8147_s3 + $0x384] ss:$16 sps:$4 sm:$0xff]  }
 0x27d   :  { %v1376_v33 = vmax.f32 %v8359_v1, %v1286_v31  ;;  %3170 = vmatprep.subr.bf16.mxu0 %v5533_v30  ;;  %3509 = vmatprep.subr.bf16.mxu1 %v5536_v29  ;;  %v5554_v30 = vld [vmem:[%s8147_s3 + $0x38c] ss:$16 sps:$4 sm:$0xff]   ;;  %v5549_v29 = vld [vmem:[%s8147_s3 + $0x380] ss:$16 sps:$4 sm:$0xff]   ;;  %v5552_v31 = vld [vmem:[%s8147_s3 + $0x388] ss:$16 sps:$4 sm:$0xff]  }
 0x27e   :  { %v5558_v1 = vld [vmem:[%s8147_s3 + $0x3a8] ss:$16 sps:$4 sm:$0xff]  }
 0x27f   :  { %v1436_v40 = vadd.f32 %v6725_v50, %v1376_v33  ;;  %v7266_v58 = vpop.permute.xlu0 %1249  ;;  %v5563_v33 = vld [vmem:[%s8147_s3 + $0x3c4] ss:$16 sps:$4 sm:$0xff]  }
 0x280   :  { %v1287_v53 = vsel %vm1267_vm2, %v1248_v17, %v7266_v58  ;;  %3171 = vmatpush1.bf16.msra.mxu0 %v5531_v42  ;;  %3510 = vmatpush1.bf16.msra.mxu1 %v5534_v19  ;;  %v5557_v42 = vld [vmem:[%s8147_s3 + $0x3a4] ss:$16 sps:$4 sm:$0xff]   ;;  %v5560_v19 = vld [vmem:[%s8147_s3 + $0x3ac] ss:$16 sps:$4 sm:$0xff]   ;;  %v5564_v17 = vld [vmem:[%s8147_s3 + $0x3c8] ss:$16 sps:$4 sm:$0xff]  }
 0x281   :  { %v1378_v9 = vmax.f32 %v8362_v61, %v1287_v53  ;;  %3172 = vmatprep.subr.bf16.mxu0 %v5539_v36  ;;  %3511 = vmatprep.subr.bf16.mxu1 %v5542_v8  ;;  %vm1484_vm1 = vcmp.gt.f32.partialorder %v1436_v40, 1.0  ;;  %v5566_v36 = vld [vmem:[%s8147_s3 + $0x3cc] ss:$16 sps:$4 sm:$0xff]   ;;  %v1377_v8 = vmax.f32 %v6451_v10, %v7246_v3  ;;  %v8363_v40 = vmax.f32 %v8277_v48, %v6542_v13  ;;  %v5569_v13 = vld [vmem:[%s8147_s3 + $0x3e4] ss:$16 sps:$4 sm:$0xff]  }
 0x282   :  { %v4710_v63 = vsel %vm1484_vm1, 1.0, %v8331_v45  ;;  %v5572_v48 = vld [vmem:[%s8147_s3 + $0x3ec] ss:$16 sps:$4 sm:$0xff]   ;;  %v8364_v53 = vmax.f32 %v8281_v57, %v6564_v34  ;;  %v5575_v57 = vld [vmem:[%s8147_s3 + $0x404] ss:$16 sps:$4 sm:$0xff]  }
 0x283   :  { %v1438_v25 = vadd.f32 %v6725_v50, %v1378_v9  ;;  %v1437_v3 = vadd.f32 %v6898_v47, %v1377_v8 }
 0x284   :  { %3173 = vmatpush1.bf16.msra.mxu0 %v5537_v55  ;;  %3512 = vmatpush1.bf16.msra.mxu1 %v5540_v38  ;;  %v5570_v55 = vld [vmem:[%s8147_s3 + $0x3e8] ss:$16 sps:$4 sm:$0xff]   ;;  %v5578_v38 = vld [vmem:[%s8147_s3 + $0x40c] ss:$16 sps:$4 sm:$0xff]  }
 0x285   :  { %vm1486_vm6 = vcmp.gt.f32.partialorder %v1438_v25, 1.0  ;;  %3174 = vmatprep.subr.bf16.mxu0 %v5545_v2  ;;  %3513 = vmatprep.subr.bf16.mxu1 %v5548_v49 }
 0x286   :  { %v4712_v59 = vsel %vm1486_vm6, 1.0, %v8331_v45 }
 0x287   :  { %v7294_v28 = vpop.permute.xlu1 %1636  ;;  %v7296_v44 = vpack.c.bf16 %v4712_v59, %v4710_v63 }
 0x288   :  { %v1735_v12 = vsel %vm1640_vm10, %v7049_v51, %v7294_v28  ;;  %3175 = vmatpush1.bf16.msra.mxu0 %v5543_v32  ;;  %3514 = vmatpush1.bf16.msra.mxu1 %v5546_v35  ;;  %v8365_v32 = vld [vmem:[#allocation15_spill] sm:$0xff] }
 0x289   :  { %1820 = vrot.lane.b32.xlu0 %v7296_v44, %s5719_s15  ;;  %3101 = vmatprep.mubr.bf16.mxu0 %v1735_v12  ;;  %v8366_v35 = vld [vmem:[#allocation11_spill] sm:$0xff] }
 0x28a   :  { %3440 = vmatprep.mubr.bf16.mxu1 %v1735_v12  ;;  %1688 = vrot.lane.b32.xlu1 %v7296_v44, %s5720_s16  ;;  %v8367_v63 = vmax.f32 %v8365_v32, %v8366_v35 }
 0x28b   :  { %4909 = vmatmul.mubr.msk.bf16.gmra.mrb[108].mxu0 %vm6927_vm12, %v5721_v16  ;;  %4933 = vmatmul.mubr.msk.bf16.gmra.mrb[108].mxu1 %vm6927_vm12, %v5721_v16  ;;  %vm1485_vm12 = vcmp.gt.f32.partialorder %v1437_v3, 1.0  ;;  %v5576_v3 = vld [vmem:[%s8147_s3 + $0x408] ss:$16 sps:$4 sm:$0xff]  }
 0x28c   :  { %3176 = vmatprep.subr.bf16.mxu0 %v5551_v43  ;;  %3515 = vmatprep.subr.bf16.mxu1 %v5554_v30  ;;  %v4711_v61 = vsel %vm1485_vm12, 1.0, %v8331_v45 }
 0x28d   :  { %1678 = vrot.lane.b32.xlu0 %v7044_v6, %s5720_s16  ;;  %3177 = vmatpush1.bf16.msra.mxu0 %v5549_v29 }
 0x28e   :  { %1828 = vrot.lane.b32.xlu1 %v6901_v39, %s5720_s16  ;;  %3516 = vmatpush1.bf16.msra.mxu1 %v5552_v31  ;;  %v8368_v31 = vld [vmem:[#allocation18_spill] sm:$0xff] }
 0x28f   :  { %v7333_v46 = vpop.permute.xlu0 %1788  ;;  %3178 = vmatprep.subr.bf16.mxu0 %v5557_v42  ;;  %3517 = vmatprep.subr.bf16.mxu1 %v5560_v19  ;;  %v8369_v42 = vld [vmem:[#allocation16_spill] sm:$0xff] }
 0x290   :  { %v1872_v37 = vsel %vm1640_vm10, %v7018_v4, %v7333_v46  ;;  %v1379_v4 = vmax.f32 %v6470_v60, %v7266_v58  ;;  %v5561_v60 = vld [vmem:[%s8147_s3 + $0x3c0] ss:$16 sps:$4 sm:$0xff]   ;;  %v8370_v19 = vmax.f32 %v8368_v31, %v8369_v42  ;;  %v8372_v31 = vld [vmem:[#allocation17_spill] sm:$0xff] }
 0x291   :  { %1701 = vrot.lane.b32.xlu0 %v7015_v24, %s5722_s17  ;;  %3111 = vmatprep.mubr.bf16.mxu0 %v1872_v37 }
 0x292   :  { %3450 = vmatprep.mubr.bf16.mxu1 %v1872_v37  ;;  %1814 = vrot.lane.b32.xlu1 %v7070_v20, %s5719_s15  ;;  %v1439_v23 = vadd.f32 %v6898_v47, %v1379_v4 }
 0x293   :  { %4911 = vmatmul.mubr.msk.bf16.gmra.mrb[112].mxu0 %vm6741_vm5, %v5721_v16  ;;  %4935 = vmatmul.mubr.msk.bf16.gmra.mrb[112].mxu1 %vm6741_vm5, %v5721_v16 }
 0x294   :  { %3179 = vmatpush1.bf16.msra.mxu0 %v5555_v5  ;;  %3518 = vmatpush1.bf16.msra.mxu1 %v5558_v1  ;;  %vm1487_vm5 = vcmp.gt.f32.partialorder %v1439_v23, 1.0  ;;  %v5573_v23 = vld [vmem:[%s8147_s3 + $0x400] ss:$16 sps:$4 sm:$0xff]  }
 0x295   :  { %1261 = vrot.lane.b32.xlu0 %v8363_v40, %s5716_s0  ;;  %3180 = vmatprep.subr.bf16.mxu0 %v5563_v33  ;;  %v4713_v54 = vsel %vm1487_vm5, 1.0, %v8331_v45 }
 0x296   :  { %1832 = vrot.lane.b32.xlu1 %v6931_v7, %s5720_s16  ;;  %3519 = vmatprep.subr.bf16.mxu1 %v5566_v36  ;;  %v7424_v2 = vpack.c.bf16 %v4713_v54, %v4711_v61  ;;  %v5590_v54 = vld [vmem:[%s8147_s3 + $0x44c] ss:$16 sps:$4 sm:$0xff]  }
 0x297   :  { %v7377_v10 = vpop.permute.xlu1 %1792 }
 0x298   :  { %v1876_v58 = vsel %vm1640_vm10, %v7044_v6, %v7377_v10  ;;  %3181 = vmatpush1.bf16.msra.mxu0 %v5561_v60  ;;  %3520 = vmatpush1.bf16.msra.mxu1 %v5564_v17  ;;  %v5567_v6 = vld [vmem:[%s8147_s3 + $0x3e0] ss:$16 sps:$4 sm:$0xff]  }
 0x299   :  { %1265 = vrot.lane.b32.xlu0 %v8364_v53, %s5716_s0  ;;  %3121 = vmatprep.mubr.bf16.mxu0 %v1876_v58  ;;  %v5584_v53 = vld [vmem:[%s8147_s3 + $0x42c] ss:$16 sps:$4 sm:$0xff]  }
 0x29a   :  { %3460 = vmatprep.mubr.bf16.mxu1 %v1876_v58  ;;  %1818 = vrot.lane.b32.xlu1 %v7082_v0, %s5719_s15 }
 0x29b   :  { %4913 = vmatmul.mubr.msk.bf16.gmra.mrb[116].mxu0 %vm6770_vm8, %v5721_v16  ;;  %4937 = vmatmul.mubr.msk.bf16.gmra.mrb[116].mxu1 %vm6770_vm8, %v5721_v16  ;;  %v1252_v34 = vpop.permute.xlu1 %1251  ;;  %vm1669_vm8 = vcmask 261120  }
 0x29c   :  { %3182 = vmatprep.subr.bf16.mxu0 %v5569_v13  ;;  %3521 = vmatprep.subr.bf16.mxu1 %v5572_v48 }
 0x29d   :  { %1703 = vrot.lane.b32.xlu0 %v6931_v7, %s5722_s17  ;;  %3183 = vmatpush1.bf16.msra.mxu0 %v5567_v6 }
 0x29e   :  { %1836 = vrot.lane.b32.xlu1 %v6974_v15, %s5720_s16  ;;  %3522 = vmatpush1.bf16.msra.mxu1 %v5570_v55  ;;  %v5579_v55 = vld [vmem:[%s8147_s3 + $0x420] ss:$16 sps:$4 sm:$0xff]  }
 0x29f   :  { %v7418_v21 = vpop.permute.xlu0 %1796  ;;  %v1256_v11 = vpop.permute.xlu1 %1255  ;;  %3265 = vmatprep.subr.bf16.mxu0 %v5575_v57  ;;  %3604 = vmatprep.subr.bf16.mxu1 %v5578_v38  ;;  %v5587_v38 = vld [vmem:[%s8147_s3 + $0x444] ss:$16 sps:$4 sm:$0xff]  }
 0x2a0   :  { %v1880_v9 = vsel %vm1640_vm10, %v7070_v20, %v7418_v21 }
 0x2a1   :  { %1686 = vrot.lane.b32.xlu0 %v7082_v0, %s5720_s16  ;;  %3131 = vmatprep.mubr.bf16.mxu0 %v1880_v9 }
 0x2a2   :  { %3470 = vmatprep.mubr.bf16.mxu1 %v1880_v9  ;;  %1822 = vrot.lane.b32.xlu1 %v7424_v2, %s5719_s15  ;;  %v5585_v9 = vld [vmem:[%s8147_s3 + $0x440] ss:$16 sps:$4 sm:$0xff]  }
 0x2a3   :  { %4915 = vmatmul.mubr.msk.bf16.gmra.mrb[120].mxu0 %vm6800_vm11, %v5721_v16  ;;  %4939 = vmatmul.mubr.msk.bf16.gmra.mrb[120].mxu1 %vm6800_vm11, %v5721_v16  ;;  %v7436_v7 = vpop.permute.xlu0 %1253  ;;  %v1656_v49 = vpop.permute.xlu1 %1655  ;;  %vm1692_vm11 = vcmask 392192  }
 0x2a4   :  { %v1288_v25 = vsel %vm1267_vm2, %v1252_v34, %v7436_v7  ;;  %v5582_v34 = vld [vmem:[%s8147_s3 + $0x428] ss:$16 sps:$4 sm:$0xff]  }
 0x2a5   :  { %v1380_v59 = vmax.f32 %v8367_v63, %v1288_v25  ;;  %1709 = vrot.lane.b32.xlu0 %v7072_v52, %s5722_s17  ;;  %v8371_v25 = vld [vmem:[#allocation22_spill] sm:$0xff] }
 0x2a6   :  { %1699 = vrot.lane.b32.xlu1 %v6901_v39, %s5722_s17  ;;  %v5593_v63 = vld [vmem:[%s8147_s3 + $0x464] ss:$16 sps:$4 sm:$0xff]  }
 0x2a7   :  { %v1440_v12 = vadd.f32 %v6725_v50, %v1380_v59  ;;  %v7448_v27 = vpop.permute.xlu0 %1257  ;;  %v7450_v43 = vpop.permute.xlu1 %1800  ;;  %v5596_v59 = vld [vmem:[%s8147_s3 + $0x46c] ss:$16 sps:$4 sm:$0xff]  }
 0x2a8   :  { %v1289_v30 = vsel %vm1267_vm2, %v1256_v11, %v7448_v27  ;;  %v1884_v29 = vsel %vm1640_vm10, %v7082_v0, %v7450_v43  ;;  %v1383_v42 = vmax.f32 %v8372_v31, %v7448_v27  ;;  %v8373_v27 = vld [vmem:[#allocation13_spill] sm:$0xff]  ;;  %v5647_v31 = vld [vmem:[%s8147_s3 + $0x584] ss:$16 sps:$4 sm:$0xff]  }
 0x2a9   :  { %v1382_v37 = vmax.f32 %v8370_v19, %v1289_v30  ;;  %3141 = vmatprep.mubr.bf16.mxu0 %v1884_v29  ;;  %3480 = vmatprep.mubr.bf16.mxu1 %v1884_v29  ;;  %vm1488_vm15 = vcmp.gt.f32.partialorder %v1440_v12, 1.0  ;;  %v5591_v30 = vld [vmem:[%s8147_s3 + $0x460] ss:$16 sps:$4 sm:$0xff]   ;;  %v5594_v29 = vld [vmem:[%s8147_s3 + $0x468] ss:$16 sps:$4 sm:$0xff]  }
 0x2aa   :  { %v4714_v36 = vsel %vm1488_vm15, 1.0, %v8331_v45 }
 0x2ab   :  { %v1442_v39 = vadd.f32 %v6725_v50, %v1382_v37  ;;  %4917 = vmatmul.mubr.msk.bf16.gmra.mrb[124].mxu0 %vm6838_vm14, %v5721_v16  ;;  %4941 = vmatmul.mubr.msk.bf16.gmra.mrb[124].mxu1 %vm6838_vm14, %v5721_v16  ;;  %v1654_v5 = vpop.permute.xlu0 %1653  ;;  %v7467_v1 = vpop.permute.xlu1 %1676  ;;  %v5599_v37 = vld [vmem:[%s8147_s3 + $0x484] ss:$16 sps:$4 sm:$0xff]  }
 0x2ac   :  { %v1670_v33 = vsel %vm1669_vm8, %v1654_v5, %v1656_v49  ;;  %v5588_v49 = vld [vmem:[%s8147_s3 + $0x448] ss:$16 sps:$4 sm:$0xff]  }
 0x2ad   :  { %vm1490_vm13 = vcmp.gt.f32.partialorder %v1442_v39, 1.0  ;;  %v1757_v4 = vsel %vm1692_vm11, %v1670_v33, %v7467_v1  ;;  %v5602_v39 = vld [vmem:[%s8147_s3 + $0x48c] ss:$16 sps:$4 sm:$0xff]   ;;  %v5597_v33 = vld [vmem:[%s8147_s3 + $0x480] ss:$16 sps:$4 sm:$0xff]  }
 0x2ae   :  { %v4716_v8 = vsel %vm1490_vm13, 1.0, %v8331_v45  ;;  %3184 = vmatprep.mubr.bf16.mxu0 %v1757_v4  ;;  %3523 = vmatprep.mubr.bf16.mxu1 %v1757_v4  ;;  %v5600_v4 = vld [vmem:[%s8147_s3 + $0x488] ss:$16 sps:$4 sm:$0xff]  }
 0x2af   :  { %v1612_v60 = vpack.c.bf16 %v4716_v8, %v4714_v36  ;;  %v1627_v17 = vpop.permute.xlu0 %1626  ;;  %v1660_v40 = vpop.permute.xlu1 %1659  ;;  %v1443_v36 = vadd.f32 %v6898_v47, %v1383_v42  ;;  %v5608_v8 = vld [vmem:[%s8147_s3 + $0x4ac] ss:$16 sps:$4 sm:$0xff]  }
 0x2b0   :  { %v1641_v56 = vsel %vm1640_vm10, %v7092_v14, %v1627_v17  ;;  %v5581_v14 = vld [vmem:[%s8147_s3 + $0x424] ss:$16 sps:$4 sm:$0xff]   ;;  %v5606_v17 = vld [vmem:[%s8147_s3 + $0x4a8] ss:$16 sps:$4 sm:$0xff]   ;;  %v5650_v42 = vld [vmem:[%s8147_s3 + $0x58c] ss:$16 sps:$4 sm:$0xff]  }
 0x2b1   :  { %v1740_v58 = vsel %vm1669_vm8, %v1641_v56, %v1654_v5  ;;  %1711 = vrot.lane.b32.xlu0 %v1612_v60, %s5722_s17  ;;  %1840 = vrot.lane.b32.xlu1 %v1612_v60, %s5720_s16  ;;  %v1381_v5 = vmax.f32 %v8373_v27, %v7436_v7  ;;  %v5605_v7 = vld [vmem:[%s8147_s3 + $0x4a4] ss:$16 sps:$4 sm:$0xff]   ;;  %vm1491_vm14 = vcmp.gt.f32.partialorder %v1443_v36, 1.0  ;;  %v5614_v56 = vld [vmem:[%s8147_s3 + $0x4cc] ss:$16 sps:$4 sm:$0xff]  }
 0x2b3   :  { %3185 = vmatmul.mubr.bf16.vlgmr.msra.gmra.mrb[96].mxu0 %v1740_v58  ;;  %3524 = vmatmul.mubr.bf16.vlgmr.msra.gmra.mrb[96].mxu1 %v1740_v58  ;;  %v1658_v13 = vpop.permute.xlu0 %1657  ;;  %v7485_v48 = vpop.permute.xlu1 %1680  ;;  %v1441_v60 = vadd.f32 %v6898_v47, %v1381_v5  ;;  %v5612_v58 = vld [vmem:[%s8147_s3 + $0x4c8] ss:$16 sps:$4 sm:$0xff]  }
 0x2b4   :  { %v1671_v6 = vsel %vm1669_vm8, %v1658_v13, %v1660_v40  ;;  %3266 = vmatpush1.bf16.msra.mxu0 %v5573_v23  ;;  %3605 = vmatpush1.bf16.msra.mxu1 %v5576_v3  ;;  %v5611_v40 = vld [vmem:[%s8147_s3 + $0x4c4] ss:$16 sps:$4 sm:$0xff]   ;;  %v4717_v3 = vsel %vm1491_vm14, 1.0, %v8331_v45 }
 0x2b5   :  { %1830 = vrot.lane.b32.xlu0 %v7015_v24, %s5720_s16  ;;  %1259 = vrot.lane.b32.xlu1 %v6567_v41, %s5716_s0  ;;  %v1761_v57 = vsel %vm1692_vm11, %v1671_v6, %v7485_v48  ;;  %vm1489_vm0 = vcmp.gt.f32.partialorder %v1441_v60, 1.0 }
 0x2b6   :  { %3194 = vmatprep.mubr.bf16.mxu0 %v1761_v57  ;;  %3533 = vmatprep.mubr.bf16.mxu1 %v1761_v57  ;;  %v5623_v57 = vld [vmem:[%s8147_s3 + $0x504] ss:$16 sps:$4 sm:$0xff]  }
 0x2b7   :  { %v1631_v11 = vpop.permute.xlu0 %1630  ;;  %v1664_v61 = vpop.permute.xlu1 %1663  ;;  %3267 = vmatprep.subr.bf16.mxu0 %v5581_v14  ;;  %3606 = vmatprep.subr.bf16.mxu1 %v5584_v53  ;;  %v4715_v14 = vsel %vm1489_vm0, 1.0, %v8331_v45  ;;  %v5620_v53 = vld [vmem:[%s8147_s3 + $0x4ec] ss:$16 sps:$4 sm:$0xff]  }
 0x2b8   :  { %v1642_v24 = vsel %vm1640_vm10, %v7155_v18, %v1631_v11  ;;  %3268 = vmatpush1.bf16.msra.mxu0 %v5579_v55  ;;  %3607 = vmatpush1.bf16.msra.mxu1 %v5582_v34  ;;  %v1613_v6 = vpack.c.bf16 %v4717_v3, %v4715_v14  ;;  %v5615_v55 = vld [vmem:[%s8147_s3 + $0x4e0] ss:$16 sps:$4 sm:$0xff]   ;;  %v5624_v11 = vld [vmem:[%s8147_s3 + $0x508] ss:$16 sps:$4 sm:$0xff]  }
 0x2b9   :  { %1852 = vrot.lane.b32.xlu0 %v7070_v20, %s5722_s17  ;;  %1263 = vrot.lane.b32.xlu1 %v8371_v25, %s5716_s0  ;;  %v1744_v32 = vsel %vm1669_vm8, %v1642_v24, %v1658_v13  ;;  %v5617_v13 = vld [vmem:[%s8147_s3 + $0x4e4] ss:$16 sps:$4 sm:$0xff]   ;;  %v5632_v24 = vld [vmem:[%s8147_s3 + $0x52c] ss:$16 sps:$4 sm:$0xff]  }
 0x2ba   :  { %3269 = vmatprep.subr.bf16.mxu0 %v5587_v38  ;;  %3608 = vmatprep.subr.bf16.mxu1 %v5590_v54  ;;  %v5626_v38 = vld [vmem:[%s8147_s3 + $0x50c] ss:$16 sps:$4 sm:$0xff]   ;;  %v5621_v54 = vld [vmem:[%s8147_s3 + $0x500] ss:$16 sps:$4 sm:$0xff]  }
 0x2bb   :  { %3195 = vmatmul.mubr.bf16.gmra.mrb[100].mxu0 %v1744_v32  ;;  %3534 = vmatmul.mubr.bf16.gmra.mrb[100].mxu1 %v1744_v32  ;;  %v1662_v18 = vpop.permute.xlu0 %1661  ;;  %v7525_v35 = vpop.permute.xlu1 %1684  ;;  %v5635_v32 = vld [vmem:[%s8147_s3 + $0x544] ss:$16 sps:$4 sm:$0xff]  }
 0x2bc   :  { %v1672_v12 = vsel %vm1669_vm8, %v1662_v18, %v1664_v61  ;;  %3270 = vmatpush1.bf16.msra.mxu0 %v5585_v9  ;;  %3609 = vmatpush1.bf16.msra.mxu1 %v5588_v49  ;;  %v5629_v61 = vld [vmem:[%s8147_s3 + $0x524] ss:$16 sps:$4 sm:$0xff]   ;;  %v5627_v49 = vld [vmem:[%s8147_s3 + $0x520] ss:$16 sps:$4 sm:$0xff]  }
 0x2bd   :  { %1854 = vrot.lane.b32.xlu0 %v6842_v22, %s5722_s17  ;;  %1682 = vrot.lane.b32.xlu1 %v7070_v20, %s5720_s16  ;;  %v1765_v19 = vsel %vm1692_vm11, %v1672_v12, %v7525_v35  ;;  %v5641_v12 = vld [vmem:[%s8147_s3 + $0x564] ss:$16 sps:$4 sm:$0xff]  }
 0x2be   :  { %3204 = vmatprep.mubr.bf16.mxu0 %v1765_v19  ;;  %3543 = vmatprep.mubr.bf16.mxu1 %v1765_v19 }
 0x2bf   :  { %v1635_v22 = vpop.permute.xlu0 %1634  ;;  %3271 = vmatprep.subr.bf16.mxu0 %v5593_v63  ;;  %3610 = vmatprep.subr.bf16.mxu1 %v5596_v59  ;;  %v5633_v63 = vld [vmem:[%s8147_s3 + $0x540] ss:$16 sps:$4 sm:$0xff]  }
 0x2c0   :  { %v1643_v20 = vsel %vm1640_vm10, %v7217_v26, %v1635_v22  ;;  %3272 = vmatpush1.bf16.msra.mxu0 %v5591_v30  ;;  %3611 = vmatpush1.bf16.msra.mxu1 %v5594_v29  ;;  %v5644_v30 = vld [vmem:[%s8147_s3 + $0x56c] ss:$16 sps:$4 sm:$0xff]   ;;  %v5639_v29 = vld [vmem:[%s8147_s3 + $0x560] ss:$16 sps:$4 sm:$0xff]   ;;  %v1668_v22 = vpop.permute.xlu1 %1667 }
 0x2c1   :  { %1838 = vrot.lane.b32.xlu0 %v7072_v52, %s5720_s16  ;;  %1705 = vrot.lane.b32.xlu1 %v7049_v51, %s5722_s17  ;;  %v1748_v26 = vsel %vm1669_vm8, %v1643_v20, %v1662_v18  ;;  %v5603_v52 = vld [vmem:[%s8147_s3 + $0x4a0] ss:$16 sps:$4 sm:$0xff]   ;;  %v5638_v18 = vld [vmem:[%s8147_s3 + $0x54c] ss:$16 sps:$4 sm:$0xff]  }
 0x2c2   :  { %3273 = vmatprep.subr.bf16.mxu0 %v5599_v37  ;;  %3612 = vmatprep.subr.bf16.mxu1 %v5602_v39  ;;  %v5645_v37 = vld [vmem:[%s8147_s3 + $0x580] ss:$16 sps:$4 sm:$0xff]  }
 0x2c3   :  { %3205 = vmatmul.mubr.bf16.gmra.mrb[104].mxu0 %v1748_v26  ;;  %3544 = vmatmul.mubr.bf16.gmra.mrb[104].mxu1 %v1748_v26  ;;  %v7593_v23 = vpop.permute.xlu0 %1638 }
 0x2c4   :  { %3274 = vmatpush1.bf16.msra.mxu0 %v5597_v33  ;;  %3613 = vmatpush1.bf16.msra.mxu1 %v5600_v4  ;;  %v1811_v33 = vpop.permute.xlu1 %1810 }
 0x2c5   :  { %1860 = vrot.lane.b32.xlu0 %v7424_v2, %s5722_s17  ;;  %1707 = vrot.lane.b32.xlu1 %v6974_v15, %s5722_s17  ;;  %v5609_v15 = vld [vmem:[%s8147_s3 + $0x4c0] ss:$16 sps:$4 sm:$0xff]  }
 0x2c6   :  { %3275 = vmatprep.subr.bf16.mxu0 %v5605_v7  ;;  %3614 = vmatprep.subr.bf16.mxu1 %v5608_v8  ;;  %v1644_v7 = vsel %vm1640_vm10, %v7294_v28, %v7593_v23 }
 0x2c7   :  { %v7617_v34 = vpop.permute.xlu0 %1665 }
 0x2c8   :  { %3276 = vmatpush1.bf16.msra.mxu0 %v5603_v52  ;;  %3615 = vmatpush1.bf16.msra.mxu1 %v5606_v17  ;;  %v1673_v36 = vsel %vm1669_vm8, %v7617_v34, %v1668_v22  ;;  %v1752_v60 = vsel %vm1669_vm8, %v1644_v7, %v7617_v34  ;;  %v8377_v22 = vld [vmem:[#allocation24_spill] sm:$0xff] }
 0x2c9   :  { %1690 = vrot.lane.b32.xlu1 %v7424_v2, %s5720_s16  ;;  %3277 = vmatprep.subr.bf16.mxu0 %v5611_v40  ;;  %v5618_v2 = vld [vmem:[%s8147_s3 + $0x4e8] ss:$16 sps:$4 sm:$0xff]  }
 0x2ca   :  { %3616 = vmatprep.subr.bf16.mxu1 %v5614_v56 }
 0x2cb   :  { %v7640_v9 = vpop.permute.xlu0 %1808 }
 0x2cc   :  { %3278 = vmatpush1.bf16.msra.mxu0 %v5609_v15  ;;  %3617 = vmatpush1.bf16.msra.mxu1 %v5612_v58  ;;  %v1824_v17 = vsel %vm1669_vm8, %v7640_v9, %v1811_v33 }
 0x2cd   :  { %1713 = vrot.lane.b32.xlu1 %v1613_v6, %s5722_s17  ;;  %3279 = vmatprep.subr.bf16.mxu0 %v5617_v13 }
 0x2ce   :  { %3618 = vmatprep.subr.bf16.mxu1 %v5620_v53 }
 0x2cf   :  { %v1791_v59 = vpop.permute.xlu0 %1790 }
 0x2d0   :  { %3280 = vmatpush1.bf16.msra.mxu0 %v5615_v55  ;;  %3619 = vmatpush1.bf16.msra.mxu1 %v5618_v2  ;;  %v1804_v56 = vsel %vm1640_vm10, %v7333_v46, %v1791_v59 }
 0x2d1   :  { %1850 = vrot.lane.b32.xlu1 %v6804_v62, %s5722_s17  ;;  %3281 = vmatprep.subr.bf16.mxu0 %v5623_v57  ;;  %v5630_v62 = vld [vmem:[%s8147_s3 + $0x528] ss:$16 sps:$4 sm:$0xff]   ;;  %v1888_v15 = vsel %vm1669_vm8, %v1804_v56, %v7640_v9 }
 0x2d2   :  { %3620 = vmatprep.subr.bf16.mxu1 %v5626_v38 }
 0x2d3   :  { %v1813_v19 = vpop.permute.xlu0 %1812 }
 0x2d4   :  { %3282 = vmatpush1.bf16.msra.mxu0 %v5621_v54  ;;  %3621 = vmatpush1.bf16.msra.mxu1 %v5624_v11 }
 0x2d5   :  { %1834 = vrot.lane.b32.xlu1 %v7049_v51, %s5720_s16  ;;  %3283 = vmatprep.subr.bf16.mxu0 %v5629_v61  ;;  %v5636_v51 = vld [vmem:[%s8147_s3 + $0x548] ss:$16 sps:$4 sm:$0xff]  }
 0x2d6   :  { %3622 = vmatprep.subr.bf16.mxu1 %v5632_v24 }
 0x2d7   :  { %v1795_v39 = vpop.permute.xlu0 %1794 }
 0x2d8   :  { %3284 = vmatpush1.bf16.msra.mxu0 %v5627_v49  ;;  %3623 = vmatpush1.bf16.msra.mxu1 %v5630_v62  ;;  %v1805_v46 = vsel %vm1640_vm10, %v7377_v10, %v1795_v39 }
 0x2d9   :  { %1856 = vrot.lane.b32.xlu1 %v7082_v0, %s5722_s17  ;;  %3285 = vmatprep.subr.bf16.mxu0 %v5635_v32  ;;  %v5642_v0 = vld [vmem:[%s8147_s3 + $0x568] ss:$16 sps:$4 sm:$0xff]  }
 0x2da   :  { %3624 = vmatprep.subr.bf16.mxu1 %v5638_v18 }
 0x2db   :  { %v1817_v27 = vpop.permute.xlu0 %1816 }
 0x2dc   :  { %3286 = vmatpush1.bf16.msra.mxu0 %v5633_v63  ;;  %3625 = vmatpush1.bf16.msra.mxu1 %v5636_v51 }
 0x2dd   :  { %1858 = vrot.lane.b32.xlu1 %v7296_v44, %s5722_s17  ;;  %3287 = vmatprep.subr.bf16.mxu0 %v5641_v12  ;;  %v5648_v44 = vld [vmem:[%s8147_s3 + $0x588] ss:$16 sps:$4 sm:$0xff]  }
 0x2de   :  { %3626 = vmatprep.subr.bf16.mxu1 %v5644_v30 }
 0x2df   :  { %v1799_v5 = vpop.permute.xlu0 %1798 }
 0x2e0   :  { %3288 = vmatpush1.bf16.msra.mxu0 %v5639_v29  ;;  %3627 = vmatpush1.bf16.msra.mxu1 %v5642_v0  ;;  %v8374_v29 = vld [vmem:[#allocation21_spill] sm:$0xff]  ;;  %v8375_v0 = vld [vmem:[#allocation19_spill] sm:$0xff] }
 0x2e1   :  { %1842 = vrot.lane.b32.xlu1 %v1613_v6, %s5720_s16  ;;  %3289 = vmatprep.subr.bf16.mxu0 %v5647_v31  ;;  %v8376_v31 = vmax.f32 %v8374_v29, %v8375_v0  ;;  %v5660_v29 = vld [vmem:[%s8149_s5 + $0x18] sm:$0xff]   ;;  %v5661_v0 = vld [vmem:[%s8149_s5 + $0xc8] sm:$0xff]  }
 0x2e2   :  { %3628 = vmatprep.subr.bf16.mxu1 %v5650_v42 }
 0x2e3   :  { %v1803_v20 = vpop.permute.xlu0 %1802 }
 0x2e4   :  { %3290 = vmatpush1.bf16.msra.mxu0 %v5645_v37  ;;  %3629 = vmatpush1.bf16.msra.mxu1 %v5648_v44  ;;  %v1807_v63 = vsel %vm1640_vm10, %v7450_v43, %v1803_v20  ;;  %v8378_v20 = vld [vmem:[#allocation20_spill] sm:$0xff] }
 0x2e5   :  { %v8379_v33 = vmax.f32 %v8377_v22, %v8378_v20  ;;  %v5670_v22 = vld [vmem:[%s8149_s5 + $0x98] sm:$0xff]  }
 0x2fb   :  { %v7691_v4 = vpop.permute.xlu0 %1820 }
 0x2fc   :  { %v7695_v26 = vpop.permute.xlu1 %1688  ;;  %v1900_v51 = vsel %vm1669_vm8, %v1807_v63, %v7691_v4  ;;  %v5652_v63 = vld [vmem:[%s8149_s5] sm:$0xff]  }
 0x2fd   :  { %v1769_v8 = vsel %vm1692_vm11, %v1673_v36, %v7695_v26 }
 0x2fe   :  { %3214 = vmatprep.mubr.bf16.mxu0 %v1769_v8  ;;  %3553 = vmatprep.mubr.bf16.mxu1 %v1769_v8 }
 0x2ff   :  { %3215 = vmatmul.mubr.bf16.gmra.mrb[108].mxu0 %v1752_v60  ;;  %3554 = vmatmul.mubr.bf16.gmra.mrb[108].mxu1 %v1752_v60  ;;  %v7704_v52 = vpop.permute.xlu0 %1678 }
 0x300   :  { %v7708_v40 = vpop.permute.xlu1 %1828  ;;  %v1693_v44 = vsel %vm1692_vm11, %v7467_v1, %v7704_v52 }
 0x301   :  { %v1904_v28 = vsel %vm1692_vm11, %v1824_v17, %v7708_v40 }
 0x302   :  { %3224 = vmatprep.mubr.bf16.mxu0 %v1904_v28  ;;  %3563 = vmatprep.mubr.bf16.mxu1 %v1904_v28 }
 0x303   :  { %v1702_v23 = vpop.permute.xlu0 %1701 }
 0x304   :  { %v1815_v3 = vpop.permute.xlu1 %1814 }
 0x305   :  { %v1825_v13 = vsel %vm1669_vm8, %v1813_v19, %v1815_v3 }
 0x307   :  { %3225 = vmatmul.mubr.bf16.gmra.mrb[112].mxu0 %v1888_v15  ;;  %3564 = vmatmul.mubr.bf16.gmra.mrb[112].mxu1 %v1888_v15  ;;  %v1262_v58 = vpop.permute.xlu0 %1261 }
 0x308   :  { %v1385_v14 = vmax.f32 %v6567_v41, %v1262_v58  ;;  %v7718_v53 = vpop.permute.xlu1 %1832  ;;  %v1892_v41 = vsel %vm1669_vm8, %v1805_v46, %v1813_v19 }
 0x309   :  { %v1908_v6 = vsel %vm1692_vm11, %v1825_v13, %v7718_v53 }
 0x30a   :  { %v1445_v55 = vadd.f32 %v6898_v47, %v1385_v14  ;;  %3234 = vmatprep.mubr.bf16.mxu0 %v1908_v6  ;;  %3573 = vmatprep.mubr.bf16.mxu1 %v1908_v6 }
 0x30b   :  { %v1266_v2 = vpop.permute.xlu0 %1265 }
 0x30c   :  { %v1387_v34 = vmax.f32 %v8371_v25, %v1266_v2  ;;  %v1819_v57 = vpop.permute.xlu1 %1818  ;;  %vm1493_vm3 = vcmp.gt.f32.partialorder %v1445_v55, 1.0 }
 0x30d   :  { %v1826_v54 = vsel %vm1669_vm8, %v1817_v27, %v1819_v57  ;;  %v4719_v61 = vsel %vm1493_vm3, 1.0, %v8331_v45 }
 0x30e   :  { %v1447_v38 = vadd.f32 %v6898_v47, %v1387_v34  ;;  %v1806_v47 = vsel %vm1640_vm10, %v7418_v21, %v1799_v5 }
 0x30f   :  { %3235 = vmatmul.mubr.bf16.gmra.mrb[116].mxu0 %v1892_v41  ;;  %3574 = vmatmul.mubr.bf16.gmra.mrb[116].mxu1 %v1892_v41  ;;  %v1896_v9 = vsel %vm1669_vm8, %v1806_v47, %v1817_v27  ;;  %v1704_v12 = vpop.permute.xlu0 %1703 }
 0x310   :  { %vm1495_vm4 = vcmp.gt.f32.partialorder %v1447_v38, 1.0  ;;  %v7729_v11 = vpop.permute.xlu1 %1836 }
 0x311   :  { %v4721_v10 = vsel %vm1495_vm4, 1.0, %v8331_v45  ;;  %v1912_v25 = vsel %vm1692_vm11, %v1826_v54, %v7729_v11 }
 0x312   :  { %v1615_v24 = vpack.c.bf16 %v4721_v10, %v4719_v61  ;;  %3244 = vmatprep.mubr.bf16.mxu0 %v1912_v25  ;;  %3583 = vmatprep.mubr.bf16.mxu1 %v1912_v25 }
 0x313   :  { %v1687_v27 = vpop.permute.xlu0 %1686 }
 0x314   :  { %1864 = vrot.lane.b32.xlu1 %v1615_v24, %s5722_s17  ;;  %v1823_v49 = vpop.permute.xlu1 %1822 }
 0x315   :  { %v1827_v32 = vsel %vm1669_vm8, %v7691_v4, %v1823_v49 }
 0x317   :  { %3245 = vmatmul.mubr.bf16.gmra.mrb[120].mxu0 %v1896_v9  ;;  %3584 = vmatmul.mubr.bf16.gmra.mrb[120].mxu1 %v1896_v9  ;;  %v1710_v52 = vpop.permute.xlu0 %1709 }
 0x318   :  { %v1700_v62 = vpop.permute.xlu1 %1699 }
 0x319   :  { %v1716_v59 = vsel %vm1715_vm7, %v1700_v62, %v1702_v23  ;;  %v1774_v5 = vsel %vm1715_vm7, %v1693_v44, %v1700_v62  ;;  %v5666_v44 = vld [vmem:[%s8149_s5 + $0x90] sm:$0xff]  }
 0x323   :  { %v7741_v18 = vpop.permute.xlu1 %1840  ;;  %v1712_v23 = vpop.permute.xlu0 %1711 }
 0x324   :  { %v1916_v21 = vsel %vm1692_vm11, %v1827_v32, %v7741_v18 }
 0x325   :  { %3254 = vmatprep.mubr.bf16.mxu0 %v1916_v21  ;;  %3593 = vmatprep.mubr.bf16.mxu1 %v1916_v21  ;;  %v5653_v21 = vld [vmem:[%s8149_s5 + $0x48] sm:$0xff]  }
 0x326   :  { %3255 = vmatmul.mubr.bf16.gmra.mrb[124].mxu0 %v1900_v51  ;;  %3594 = vmatmul.mubr.bf16.gmra.mrb[124].mxu1 %v1900_v51  ;;  %v5655_v51 = vld [vmem:[%s8149_s5 + $0x50] sm:$0xff]  }
 0x327   :  { %4918 = vmatprep.mubr.msk.bf16.mxu0 %vm3014_vm9, %v1716_v59  ;;  %4942 = vmatprep.mubr.msk.bf16.mxu1 %vm3014_vm9, %v1716_v59  ;;  %v1260_v30 = vpop.permute.xlu1 %1259  ;;  %v1831_v13 = vpop.permute.xlu0 %1830  ;;  %v5656_v59 = vld [vmem:[%s8149_s5 + $0x10] sm:$0xff]  }
 0x328   :  { %v1290_v43 = vsel %vm1267_vm2, %v1260_v30, %v1262_v58  ;;  %v1695_v58 = vsel %vm1692_vm11, %v7525_v35, %v1687_v27  ;;  %v1844_v61 = vsel %vm1692_vm11, %v7708_v40, %v1831_v13  ;;  %v5658_v30 = vld [vmem:[%s8149_s5 + $0x80] sm:$0xff]   ;;  %v5668_v27 = vld [vmem:[%s8149_s5 + $0x28] sm:$0xff]  }
 0x329   :  { %v1384_v42 = vmax.f32 %v8376_v31, %v1290_v43  ;;  %v5659_v43 = vld [vmem:[%s8149_s5 + $0x58] sm:$0xff]   ;;  %v5662_v31 = vld [vmem:[%s8149_s5 + $0x88] sm:$0xff]   ;;  %v5699_v13 = vld [vmem:[%s8149_s5 + $0x1c0] sm:$0xff]  }
 0x32b   :  { %v1444_v19 = vadd.f32 %v6725_v50, %v1384_v42  ;;  %v1264_v37 = vpop.permute.xlu1 %1263  ;;  %v5663_v42 = vld [vmem:[%s8149_s5 + $0x60] sm:$0xff]  }
 0x32c   :  { %v1291_v39 = vsel %vm1267_vm2, %v1264_v37, %v1266_v2  ;;  %v1853_v2 = vpop.permute.xlu0 %1852  ;;  %v5665_v37 = vld [vmem:[%s8149_s5 + $0xd0] sm:$0xff]  }
 0x32d   :  { %v1386_v4 = vmax.f32 %v8379_v33, %v1291_v39  ;;  %vm1492_vm10 = vcmp.gt.f32.partialorder %v1444_v19, 1.0  ;;  %v5664_v19 = vld [vmem:[%s8149_s5 + $0x20] sm:$0xff]   ;;  %v5667_v39 = vld [vmem:[%s8149_s5 + $0x68] sm:$0xff]   ;;  %v5671_v33 = vld [vmem:[%s8149_s5 + $0x70] sm:$0xff]  }
 0x32e   :  { %3298 = vmatmul.mubr.bf16.vlgmr.msra.gmra.mrb[96].mxu0 %v1774_v5  ;;  %3637 = vmatmul.mubr.bf16.vlgmr.msra.gmra.mrb[96].mxu1 %v1774_v5  ;;  %v4718_v8 = vsel %vm1492_vm10, 1.0, %v8331_v45  ;;  %v5669_v5 = vld [vmem:[%s8149_s5 + $0xd8] sm:$0xff]  }
 0x32f   :  { %v1446_v36 = vadd.f32 %v6725_v50, %v1386_v4  ;;  %v1683_v7 = vpop.permute.xlu1 %1682  ;;  %v5672_v4 = vld [vmem:[%s8149_s5 + $0x30] sm:$0xff]  }
 0x330   :  { %v1694_v60 = vsel %vm1692_vm11, %v7485_v48, %v1683_v7  ;;  %v1855_v41 = vpop.permute.xlu0 %1854  ;;  %v5674_v7 = vld [vmem:[%s8149_s5 + $0xa0] sm:$0xff]  }
 0x331   :  { %vm1494_vm1 = vcmp.gt.f32.partialorder %v1446_v36, 1.0  ;;  %v1778_v50 = vsel %vm1715_vm7, %v1694_v60, %v1704_v12  ;;  %v5673_v36 = vld [vmem:[%s8149_s5 + $0xe0] sm:$0xff]  }
 0x332   :  { %v4720_v1 = vsel %vm1494_vm1, 1.0, %v8331_v45 }
 0x333   :  { %v1614_v17 = vpack.c.bf16 %v4720_v1, %v4718_v8  ;;  %v1706_v28 = vpop.permute.xlu1 %1705 }
 0x334   :  { %v1717_v56 = vsel %vm1715_vm7, %v1704_v12, %v1706_v28  ;;  %v1839_v25 = vpop.permute.xlu0 %1838  ;;  %v5657_v12 = vld [vmem:[%s8149_s5 + $0xc0] sm:$0xff]   ;;  %v5675_v28 = vld [vmem:[%s8149_s5 + $0x78] sm:$0xff]  }
 0x335   :  { %1862 = vrot.lane.b32.xlu0 %v1614_v17, %s5722_s17  ;;  %4919 = vmatprep.mubr.msk.bf16.mxu0 %vm3014_vm9, %v1717_v56  ;;  %v1846_v62 = vsel %vm1692_vm11, %v7729_v11, %v1839_v25  ;;  %v5654_v11 = vld [vmem:[%s8149_s5 + $0x8] sm:$0xff]  }
 0x336   :  { %4943 = vmatprep.mubr.msk.bf16.mxu1 %vm3014_vm9, %v1717_v56  ;;  %3308 = vmatmul.mubr.bf16.gmra.mrb[100].mxu0 %v1778_v50  ;;  %v5677_v56 = vld [vmem:[%s8149_s5 + $0xe8] sm:$0xff]  }
 0x337   :  { %3647 = vmatmul.mubr.bf16.gmra.mrb[100].mxu1 %v1778_v50  ;;  %v1708_v3 = vpop.permute.xlu1 %1707  ;;  %5071 = vmatprep.subr.bf16.mxu1 %v5657_v12  ;;  %v5678_v50 = vld [vmem:[%s8149_s5 + $0xa8] sm:$0xff]  }
 0x338   :  { %v1718_v15 = vsel %vm1715_vm7, %v1708_v3, %v1710_v52  ;;  %v1782_v14 = vsel %vm1715_vm7, %v1695_v58, %v1708_v3  ;;  %v1861_v9 = vpop.permute.xlu0 %1860  ;;  %5072 = vmatpush3.bf16.msra.mxu1 %v5658_v30  ;;  %v5680_v3 = vld [vmem:[%s8149_s5 + $0xf0] sm:$0xff]   ;;  %v5686_v58 = vld [vmem:[%s8149_s5 + $0xb8] sm:$0xff]  }
 0x339   :  { %4920 = vmatprep.mubr.msk.bf16.mxu0 %vm3014_vm9, %v1718_v15  ;;  %4944 = vmatprep.mubr.msk.bf16.mxu1 %vm3014_vm9, %v1718_v15  ;;  %v5682_v15 = vld [vmem:[%s8149_s5 + $0xb0] sm:$0xff]  }
 0x33a   :  { %5073 = vmatprep.subr.bf16.mxu1 %v5661_v0  ;;  %v3765_v0 = vld [vmem:[%s8150_s4] sm:$0x3] }
 0x33b   :  { %v1691_v48 = vpop.permute.xlu1 %1690 }
 0x33c   :  { %v1696_v46 = vsel %vm1692_vm11, %v7695_v26, %v1691_v48  ;;  %5074 = vmatpush3.bf16.msra.mxu1 %v5662_v31  ;;  %v5684_v48 = vld [vmem:[%s8149_s5 + $0xf8] sm:$0xff]  }
 0x33d   :  { %v1786_v57 = vsel %vm1715_vm7, %v1696_v46, %v1712_v23  ;;  %5075 = vmatprep.subr.bf16.mxu1 %v5665_v37 }
 0x33e   :  { %3318 = vmatmul.mubr.bf16.gmra.mrb[104].mxu0 %v1782_v14 }
 0x33f   :  { %3657 = vmatmul.mubr.bf16.gmra.mrb[104].mxu1 %v1782_v14  ;;  %v1714_v6 = vpop.permute.xlu1 %1713 }
 0x340   :  { %v1719_v55 = vsel %vm1715_vm7, %v1712_v23, %v1714_v6  ;;  %5076 = vmatpush3.bf16.msra.mxu1 %v5666_v44  ;;  %v5679_v23 = vld [vmem:[%s8149_s5 + $0x140] sm:$0xff]  }
 0x341   :  { %4921 = vmatprep.mubr.msk.bf16.mxu0 %vm3014_vm9, %v1719_v55  ;;  %4945 = vmatprep.mubr.msk.bf16.mxu1 %vm3014_vm9, %v1719_v55 }
 0x342   :  { %5077 = vmatprep.subr.bf16.mxu1 %v5669_v5 }
 0x343   :  { %v1851_v34 = vpop.permute.xlu1 %1850 }
 0x344   :  { %v1866_v35 = vsel %vm1715_vm7, %v1851_v34, %v1853_v2  ;;  %v1920_v26 = vsel %vm1715_vm7, %v1844_v61, %v1851_v34  ;;  %5078 = vmatpush3.bf16.msra.mxu1 %v5670_v22 }
 0x345   :  { %5079 = vmatprep.subr.bf16.mxu1 %v5673_v36 }
 0x346   :  { %3328 = vmatmul.mubr.bf16.gmra.mrb[108].mxu0 %v1786_v57 }
 0x347   :  { %3667 = vmatmul.mubr.bf16.gmra.mrb[108].mxu1 %v1786_v57  ;;  %4922 = vmatprep.mubr.msk.bf16.mxu0 %vm3014_vm9, %v1866_v35  ;;  %v1835_v38 = vpop.permute.xlu1 %1834 }
 0x348   :  { %4946 = vmatprep.mubr.msk.bf16.mxu1 %vm3014_vm9, %v1866_v35  ;;  %v1845_v24 = vsel %vm1692_vm11, %v7718_v53, %v1835_v38  ;;  %v5651_v53 = vld [vmem:[%s8149_s5 + $0x40] sm:$0xff]   ;;  %5080 = vmatpush3.bf16.msra.mxu1 %v5674_v7 }
 0x349   :  { %v1924_v49 = vsel %vm1715_vm7, %v1845_v24, %v1855_v41  ;;  %5049 = vmatprep.subr.bf16.mxu0 %v5651_v53  ;;  %5081 = vmatprep.subr.bf16.mxu1 %v5677_v56 }
 0x34a   :  { %5050 = vmatpush3.bf16.msra.mxu0 %v5652_v63 }
 0x34b   :  { %v1857_v54 = vpop.permute.xlu1 %1856  ;;  %5051 = vmatprep.subr.bf16.mxu0 %v5653_v21 }
 0x34c   :  { %v1867_v10 = vsel %vm1715_vm7, %v1855_v41, %v1857_v54  ;;  %5082 = vmatpush3.bf16.msra.mxu1 %v5678_v50 }
 0x34d   :  { %5083 = vmatprep.subr.bf16.mxu1 %v5680_v3 }
 0x34e   :  { %3338 = vmatmul.mubr.bf16.gmra.mrb[112].mxu0 %v1920_v26 }
 0x34f   :  { %3677 = vmatmul.mubr.bf16.gmra.mrb[112].mxu1 %v1920_v26  ;;  %4923 = vmatprep.mubr.msk.bf16.mxu0 %vm3014_vm9, %v1867_v10  ;;  %v1859_v47 = vpop.permute.xlu1 %1858 }
 0x350   :  { %4947 = vmatprep.mubr.msk.bf16.mxu1 %vm3014_vm9, %v1867_v10  ;;  %v1868_v40 = vsel %vm1715_vm7, %v1859_v47, %v1861_v9  ;;  %v1928_v32 = vsel %vm1715_vm7, %v1846_v62, %v1859_v47  ;;  %5052 = vmatpush3.bf16.msra.mxu0 %v5654_v11 }
 0x351   :  { %5053 = vmatprep.subr.bf16.mxu0 %v5655_v51  ;;  %5084 = vmatpush3.bf16.msra.mxu1 %v5682_v15 }
 0x352   :  { %5085 = vmatprep.subr.bf16.mxu1 %v5684_v48 }
 0x353   :  { %v1843_v20 = vpop.permute.xlu1 %1842 }
 0x354   :  { %5054 = vmatpush3.bf16.msra.mxu0 %v5656_v59  ;;  %v1847_v8 = vsel %vm1692_vm11, %v7741_v18, %v1843_v20  ;;  %v5676_v18 = vld [vmem:[%s8149_s5 + $0x38] sm:$0xff]  }
 0x355   :  { %5055 = vmatprep.subr.bf16.mxu0 %v5659_v43  ;;  %5086 = vmatpush3.bf16.msra.mxu1 %v5686_v58 }
 0x356   :  { %3348 = vmatmul.mubr.bf16.gmra.mrb[116].mxu0 %v1924_v49  ;;  %5115 = vmatprep.subr.bf16.mxu1 %v5699_v13 }
 0x357   :  { %3687 = vmatmul.mubr.bf16.gmra.mrb[116].mxu1 %v1924_v49  ;;  %4924 = vmatprep.mubr.msk.bf16.mxu0 %vm3014_vm9, %v1868_v40 }
 0x358   :  { %4948 = vmatprep.mubr.msk.bf16.mxu1 %vm3014_vm9, %v1868_v40  ;;  %5056 = vmatpush3.bf16.msra.mxu0 %v5660_v29 }
 0x359   :  { %5057 = vmatprep.subr.bf16.mxu0 %v5663_v42 }
 0x35c   :  { %5058 = vmatpush3.bf16.msra.mxu0 %v5664_v19 }
 0x35d   :  { %5059 = vmatprep.subr.bf16.mxu0 %v5667_v39  ;;  %v8380_v39 = vld [vmem:[#allocation23_spill] sm:$0xff] }
 0x35e   :  { %3358 = vmatmul.mubr.bf16.gmra.mrb[120].mxu0 %v1928_v32  ;;  %v8382_v36 = vsub.s32 1, %v8380_v39 }
 0x35f   :  { %3697 = vmatmul.mubr.bf16.gmra.mrb[120].mxu1 %v1928_v32 }
 0x360   :  { %5060 = vmatpush3.bf16.msra.mxu0 %v5668_v27  ;;  %v8381_v27 = vsub.s32 0, %v8380_v39  ;;  %v7970_v7 = vrot.slane %v3765_v0, %v8382_v36  ;;  %v5687_v36 = vld [vmem:[%s8149_s5 + $0x150] sm:$0xff]  }
 0x361   :  { %5061 = vmatprep.subr.bf16.mxu0 %v5671_v33 }
 0x362   :  { %v7966_v5 = vrot.slane %v3765_v0, %v8381_v27  ;;  %v5703_v0 = vld [vmem:[%s8149_s5 + $0x1d0] sm:$0xff]  }
 0x364   :  { %5062 = vmatpush3.bf16.msra.mxu0 %v5672_v4 }
 0x365   :  { %5063 = vmatprep.subr.bf16.mxu0 %v5675_v28 }
 0x368   :  { %5064 = vmatpush3.bf16.msra.mxu0 %v5676_v18 }
 0x369   :  { %5093 = vmatprep.subr.bf16.mxu0 %v5679_v23 }
 0x386   :  { %v1865_v1 = vpop.permute.xlu1 %1864 }
 0x3a7   :  { %v1863_v60 = vpop.permute.xlu0 %1862 }
 0x3a8   :  { %v1869_v52 = vsel %vm1715_vm7, %v1863_v60, %v1865_v1  ;;  %v1932_v17 = vsel %vm1715_vm7, %v1847_v8, %v1863_v60 }
 0x3a9   :  { %4925 = vmatprep.mubr.msk.bf16.mxu0 %vm3014_vm9, %v1869_v52  ;;  %4949 = vmatprep.mubr.msk.bf16.mxu1 %vm3014_vm9, %v1869_v52 }
 0x3aa   :  { %3368 = vmatmul.mubr.bf16.gmra.mrb[124].mxu0 %v1932_v17  ;;  %3707 = vmatmul.mubr.bf16.gmra.mrb[124].mxu1 %v1932_v17 }
 0x401   :  { %v3299_v14 = vpop.f32.mrb[96].mxu0  ;;  %v3638_v6 = vpop.f32.mrb[96].mxu1 }
 0x402   :  { %v3301_v55 = vpop.f32.mrb[97].mxu0  ;;  %v3640_v46 = vpop.f32.mrb[97].mxu1 }
 0x403   :  { %v3303_v2 = vpop.f32.mrb[98].mxu0  ;;  %v3642_v34 = vpop.f32.mrb[98].mxu1 }
 0x404   :  { %v3305_v57 = vpop.f32.mrb[99].mxu0  ;;  %v3644_v35 = vpop.f32.mrb[99].mxu1 }
 0x409   :  { %v7913_v38 = vpop.f32.mrb[100].mxu0 }
 0x40a   :  { %v7915_v41 = vpop.f32.mrb[100].mxu1  ;;  %v7917_v54 = vpop.f32.mrb[101].mxu0 }
 0x40b   :  { %v7919_v61 = vpop.f32.mrb[101].mxu1  ;;  %v7921_v26 = vpop.f32.mrb[102].mxu0 }
 0x40c   :  { %v7923_v10 = vpop.f32.mrb[102].mxu1  ;;  %v7925_v25 = vpop.f32.mrb[103].mxu0 }
 0x40d   :  { %v7927_v24 = vpop.f32.mrb[103].mxu1 }
 0x411   :  { %v7929_v47 = vpop.f32.mrb[104].mxu0 }
 0x412   :  { %v7931_v9 = vpop.f32.mrb[104].mxu1  ;;  %v7933_v49 = vpop.f32.mrb[105].mxu0 }
 0x413   :  { %v7935_v40 = vpop.f32.mrb[105].mxu1  ;;  %v7937_v62 = vpop.f32.mrb[106].mxu0 }
 0x414   :  { %v7939_v32 = vpop.f32.mrb[106].mxu1  ;;  %v7941_v53 = vpop.f32.mrb[107].mxu0 }
 0x415   :  { %v7943_v63 = vpop.f32.mrb[107].mxu1 }
 0x419   :  { %v7945_v21 = vpop.f32.mrb[108].mxu0 }
 0x41a   :  { %v7947_v11 = vpop.f32.mrb[108].mxu1  ;;  %v7949_v51 = vpop.f32.mrb[109].mxu0 }
 0x41b   :  { %v7951_v59 = vpop.f32.mrb[109].mxu1  ;;  %v7953_v12 = vpop.f32.mrb[110].mxu0 }
 0x41c   :  { %v7955_v30 = vpop.f32.mrb[110].mxu1  ;;  %v7957_v43 = vpop.f32.mrb[111].mxu0 }
 0x41d   :  { %v7959_v29 = vpop.f32.mrb[111].mxu1 }
 0x421   :  { %v3339_v31 = vpop.f32.mrb[112].mxu0 }
 0x422   :  { %v3717_v42 = vmax.f32 %v3299_v14, %v3339_v31  ;;  %v3678_v19 = vpop.f32.mrb[112].mxu1  ;;  %v3341_v37 = vpop.f32.mrb[113].mxu0 }
 0x423   :  { %v3719_v44 = vmax.f32 %v3638_v6, %v3678_v19  ;;  %v3718_v22 = vmax.f32 %v3301_v55, %v3341_v37  ;;  %v3680_v20 = vpop.f32.mrb[113].mxu1  ;;  %v3343_v33 = vpop.f32.mrb[114].mxu0 }
 0x424   :  { %v3720_v4 = vmax.f32 %v3640_v46, %v3680_v20  ;;  %v3721_v8 = vmax.f32 %v3303_v2, %v3343_v33  ;;  %v3682_v1 = vpop.f32.mrb[114].mxu1  ;;  %v3345_v60 = vpop.f32.mrb[115].mxu0  ;;  %v5685_v33 = vld [vmem:[%s8149_s5 + $0x108] sm:$0xff]  }
 0x425   :  { %v3749_v52 = vmax.f32 %v3717_v42, %v3719_v44  ;;  %v3723_v17 = vmax.f32 %v3642_v34, %v3682_v1  ;;  %v3722_v28 = vmax.f32 %v3305_v57, %v3345_v60  ;;  %v3684_v18 = vpop.f32.mrb[115].mxu1 }
 0x426   :  { %v3750_v56 = vmax.f32 %v3718_v22, %v3720_v4  ;;  %v3724_v50 = vmax.f32 %v3644_v35, %v3684_v18 }
 0x427   :  { %v3777_v23 = vadd.f32 %v7966_v5, %v3749_v52  ;;  %v3751_v3 = vmax.f32 %v3721_v8, %v3723_v17 }
 0x428   :  { %v3778_v15 = vadd.f32 %v7970_v7, %v3750_v56  ;;  %v3752_v48 = vmax.f32 %v3722_v28, %v3724_v50 }
 0x429   :  { %v3779_v58 = vadd.f32 %v7966_v5, %v3751_v3  ;;  %v3349_v13 = vpop.f32.mrb[116].mxu0  ;;  %vm3793_vm2 = vcmp.gt.f32.partialorder %v3777_v23, 1.0 }
 0x42a   :  { %v3780_v14 = vadd.f32 %v7970_v7, %v3752_v48  ;;  %v3725_v6 = vmax.f32 %v7913_v38, %v3349_v13  ;;  %v3688_v55 = vpop.f32.mrb[116].mxu1  ;;  %v3351_v46 = vpop.f32.mrb[117].mxu0  ;;  %vm3794_vm12 = vcmp.gt.f32.partialorder %v3778_v15, 1.0 }
 0x42b   :  { %vm3795_vm6 = vcmp.gt.f32.partialorder %v3779_v58, 1.0  ;;  %v3727_v2 = vmax.f32 %v7915_v41, %v3688_v55  ;;  %v3726_v34 = vmax.f32 %v7917_v54, %v3351_v46  ;;  %v3690_v57 = vpop.f32.mrb[117].mxu1  ;;  %v3353_v35 = vpop.f32.mrb[118].mxu0  ;;  %v5681_v41 = vld [vmem:[%s8149_s5 + $0x100] sm:$0xff]  }
 0x42c   :  { %vm7979_vm5 = vmpackc.low %vm3795_vm6, %vm3793_vm2  ;;  %v3728_v31 = vmax.f32 %v7919_v61, %v3690_v57  ;;  %v3729_v42 = vmax.f32 %v7921_v26, %v3353_v35  ;;  %v3692_v19 = vpop.f32.mrb[118].mxu1  ;;  %v3355_v38 = vpop.f32.mrb[119].mxu0  ;;  %vm3796_vm8 = vcmp.gt.f32.partialorder %v3780_v14, 1.0  ;;  %v5683_v61 = vld [vmem:[%s8149_s5 + $0x148] sm:$0xff]   ;;  %v5691_v35 = vld [vmem:[%s8149_s5 + $0x160] sm:$0xff]  }
 0x42d   :  { %v3753_v37 = vmax.f32 %v3725_v6, %v3727_v2  ;;  %v3731_v54 = vmax.f32 %v7923_v10, %v3692_v19  ;;  %v3730_v44 = vmax.f32 %v7925_v25, %v3355_v38  ;;  %v3694_v39 = vpop.f32.mrb[119].mxu1  ;;  %vm5031_vm11 = vmpackc.low %vm3796_vm8, %vm3794_vm12  ;;  %v5701_v14 = vld [vmem:[%s8149_s5 + $0x1c8] sm:$0xff]   ;;  %v5704_v38 = vld [vmem:[%s8149_s5 + $0x190] sm:$0xff]  }
 0x42e   :  { %v3754_v26 = vmax.f32 %v3726_v34, %v3728_v31  ;;  %v3732_v27 = vmax.f32 %v7927_v24, %v3694_v39  ;;  %5032 = vmatprep.mubr.msk.bf16.mxu0 %vm5031_vm11, %v5721_v16  ;;  %v5690_v34 = vld [vmem:[%s8149_s5 + $0x118] sm:$0xff]   ;;  %v5695_v39 = vld [vmem:[%s8149_s5 + $0x170] sm:$0xff]  }
 0x42f   :  { %v3781_v22 = vadd.f32 %v7966_v5, %v3753_v37  ;;  %v3755_v20 = vmax.f32 %v3729_v42, %v3731_v54  ;;  %5034 = vmatmul.mubr.msk.bf16.vlgmr.msra.gmra.mrb[128].mxu0 %vm7979_vm5, %v5721_v16  ;;  %v5692_v42 = vld [vmem:[%s8149_s5 + $0x120] sm:$0xff]   ;;  %v5705_v37 = vld [vmem:[%s8149_s5 + $0x1d8] sm:$0xff]   ;;  %v5694_v54 = vld [vmem:[%s8149_s5 + $0x128] sm:$0xff]  }
 0x430   :  { %v3782_v10 = vadd.f32 %v7970_v7, %v3754_v26  ;;  %v3756_v25 = vmax.f32 %v3730_v44, %v3732_v27  ;;  %5094 = vmatpush3.bf16.msra.mxu0 %v5681_v41  ;;  %v5693_v41 = vld [vmem:[%s8149_s5 + $0x168] sm:$0xff]   ;;  %v5706_v44 = vld [vmem:[%s8149_s5 + $0x198] sm:$0xff]   ;;  %v5696_v26 = vld [vmem:[%s8149_s5 + $0x130] sm:$0xff]  }
 0x431   :  { %v3783_v4 = vadd.f32 %v7966_v5, %v3755_v20  ;;  %v3359_v24 = vpop.f32.mrb[120].mxu0  ;;  %5095 = vmatprep.subr.bf16.mxu0 %v5683_v61  ;;  %vm3797_vm15 = vcmp.gt.f32.partialorder %v3781_v22, 1.0  ;;  %v5707_v61 = vld [vmem:[%s8149_s5 + $0x1e0] sm:$0xff]   ;;  %v5697_v22 = vld [vmem:[%s8149_s5 + $0x178] sm:$0xff]   ;;  %v5709_v20 = vld [vmem:[%s8149_s5 + $0x1e8] sm:$0xff]  }
 0x432   :  { %v3784_v8 = vadd.f32 %v7970_v7, %v3756_v25  ;;  %v3733_v1 = vmax.f32 %v7929_v47, %v3359_v24  ;;  %v3698_v60 = vpop.f32.mrb[120].mxu1  ;;  %v3361_v52 = vpop.f32.mrb[121].mxu0  ;;  %vm3798_vm0 = vcmp.gt.f32.partialorder %v3782_v10, 1.0  ;;  %v5708_v27 = vld [vmem:[%s8149_s5 + $0x1a0] sm:$0xff]   ;;  %v5698_v10 = vld [vmem:[%s8149_s5 + $0x138] sm:$0xff]   ;;  %v5710_v25 = vld [vmem:[%s8149_s5 + $0x1a8] sm:$0xff]  }
 0x433   :  { %vm3799_vm13 = vcmp.gt.f32.partialorder %v3783_v4, 1.0  ;;  %v3735_v17 = vmax.f32 %v7931_v9, %v3698_v60  ;;  %v3734_v28 = vmax.f32 %v7933_v49, %v3361_v52  ;;  %v3700_v18 = vpop.f32.mrb[121].mxu1  ;;  %v3363_v56 = vpop.f32.mrb[122].mxu0  ;;  %v5688_v9 = vld [vmem:[%s8149_s5 + $0x110] sm:$0xff]   ;;  %v5700_v49 = vld [vmem:[%s8149_s5 + $0x180] sm:$0xff]   ;;  %v5713_v24 = vld [vmem:[%s8149_s5 + $0x1f8] sm:$0xff]  }
 0x434   :  { %vm8011_vm14 = vmpackc.low %vm3799_vm13, %vm3797_vm15  ;;  %v3736_v23 = vmax.f32 %v7935_v40, %v3700_v18  ;;  %5096 = vmatpush3.bf16.msra.mxu0 %v5685_v33  ;;  %v3737_v3 = vmax.f32 %v7937_v62, %v3363_v56  ;;  %v3702_v47 = vpop.f32.mrb[122].mxu1  ;;  %v3365_v15 = vpop.f32.mrb[123].mxu0  ;;  %vm3800_vm3 = vcmp.gt.f32.partialorder %v3784_v8, 1.0  ;;  %v5689_v62 = vld [vmem:[%s8149_s5 + $0x158] sm:$0xff]   ;;  %v5711_v33 = vld [vmem:[%s8149_s5 + $0x1f0] sm:$0xff]  }
 0x435   :  { %v3757_v48 = vmax.f32 %v3733_v1, %v3735_v17  ;;  %v3739_v58 = vmax.f32 %v7939_v32, %v3702_v47  ;;  %v3738_v40 = vmax.f32 %v7941_v53, %v3365_v15  ;;  %v3704_v13 = vpop.f32.mrb[123].mxu1  ;;  %vm5035_vm4 = vmpackc.low %vm3800_vm3, %vm3798_vm0  ;;  %5097 = vmatprep.subr.bf16.mxu0 %v5687_v36  ;;  %v5712_v4 = vld [vmem:[%s8149_s5 + $0x1b0] sm:$0xff]   ;;  %v5714_v36 = vld [vmem:[%s8149_s5 + $0x1b8] sm:$0xff]  }
 0x436   :  { %v3758_v6 = vmax.f32 %v3734_v28, %v3736_v23  ;;  %v3740_v55 = vmax.f32 %v7943_v63, %v3704_v13  ;;  %5036 = vmatprep.mubr.msk.bf16.mxu1 %vm5035_vm4, %v5721_v16  ;;  %v5702_v63 = vld [vmem:[%s8149_s5 + $0x188] sm:$0xff]  }
 0x437   :  { %v3785_v32 = vadd.f32 %v7966_v5, %v3757_v48  ;;  %v3759_v46 = vmax.f32 %v3737_v3, %v3739_v58  ;;  %5038 = vmatmul.mubr.msk.bf16.vlgmr.msra.gmra.mrb[128].mxu1 %vm8011_vm14, %v5721_v16 }
 0x438   :  { %v3786_v53 = vadd.f32 %v7970_v7, %v3758_v6  ;;  %v3760_v2 = vmax.f32 %v3738_v40, %v3740_v55  ;;  %5098 = vmatpush3.bf16.msra.mxu0 %v5688_v9  ;;  %5116 = vmatpush3.bf16.msra.mxu1 %v5700_v49 }
 0x439   :  { %v3787_v57 = vadd.f32 %v7966_v5, %v3759_v46  ;;  %5099 = vmatprep.subr.bf16.mxu0 %v5689_v62  ;;  %5117 = vmatprep.subr.bf16.mxu1 %v5701_v14  ;;  %vm3801_vm7 = vcmp.gt.f32.partialorder %v3785_v32, 1.0 }
 0x43a   :  { %v3788_v31 = vadd.f32 %v7970_v7, %v3760_v2  ;;  %vm3802_vm10 = vcmp.gt.f32.partialorder %v3786_v53, 1.0 }
 0x43b   :  { %vm3803_vm9 = vcmp.gt.f32.partialorder %v3787_v57, 1.0 }
 0x43c   :  { %5100 = vmatpush3.bf16.msra.mxu0 %v5690_v34  ;;  %vm3804_vm1 = vcmp.gt.f32.partialorder %v3788_v31, 1.0  ;;  %vm8055_vm2 = vmpackc.low %vm3803_vm9, %vm3801_vm7  ;;  %5118 = vmatpush3.bf16.msra.mxu1 %v5702_v63 }
 0x43d   :  { %5101 = vmatprep.subr.bf16.mxu0 %v5691_v35  ;;  %vm5039_vm6 = vmpackc.low %vm3804_vm1, %vm3802_vm10  ;;  %5119 = vmatprep.subr.bf16.mxu1 %v5703_v0 }
 0x43e   :  { %5040 = vmatprep.mubr.msk.bf16.mxu0 %vm5039_vm6, %v5721_v16 }
 0x440   :  { %5102 = vmatpush3.bf16.msra.mxu0 %v5692_v42  ;;  %5120 = vmatpush3.bf16.msra.mxu1 %v5704_v38 }
 0x441   :  { %5103 = vmatprep.subr.bf16.mxu0 %v5693_v41  ;;  %5121 = vmatprep.subr.bf16.mxu1 %v5705_v37 }
 0x444   :  { %5104 = vmatpush3.bf16.msra.mxu0 %v5694_v54  ;;  %5122 = vmatpush3.bf16.msra.mxu1 %v5706_v44 }
 0x445   :  { %5105 = vmatprep.subr.bf16.mxu0 %v5695_v39  ;;  %5123 = vmatprep.subr.bf16.mxu1 %v5707_v61 }
 0x448   :  { %5106 = vmatpush3.bf16.msra.mxu0 %v5696_v26  ;;  %5124 = vmatpush3.bf16.msra.mxu1 %v5708_v27 }
 0x449   :  { %5107 = vmatprep.subr.bf16.mxu0 %v5697_v22  ;;  %5125 = vmatprep.subr.bf16.mxu1 %v5709_v20 }
 0x44c   :  { %5108 = vmatpush3.bf16.msra.mxu0 %v5698_v10  ;;  %5126 = vmatpush3.bf16.msra.mxu1 %v5710_v25 }
 0x44d   :  { %5127 = vmatprep.subr.bf16.mxu1 %v5711_v33 }
 0x44f   :  { %5042 = vmatmul.mubr.msk.bf16.vlgmr.msra.gmra.mrb[132].mxu0 %vm8055_vm2, %v5721_v16 }
 0x450   :  { %5128 = vmatpush3.bf16.msra.mxu1 %v5712_v4 }
 0x451   :  { %5129 = vmatprep.subr.bf16.mxu1 %v5713_v24 }
 0x454   :  { %5130 = vmatpush3.bf16.msra.mxu1 %v5714_v36 }
 0x47d   :  { %v3369_v8 = vpop.f32.mrb[124].mxu0  ;;  %v3708_v1 = vpop.f32.mrb[124].mxu1 }
 0x47e   :  { %v3741_v60 = vmax.f32 %v7945_v21, %v3369_v8  ;;  %v3743_v52 = vmax.f32 %v7947_v11, %v3708_v1  ;;  %v3371_v17 = vpop.f32.mrb[125].mxu0  ;;  %v3710_v28 = vpop.f32.mrb[125].mxu1 }
 0x47f   :  { %v3742_v18 = vmax.f32 %v7949_v51, %v3371_v17  ;;  %v3744_v56 = vmax.f32 %v7951_v59, %v3710_v28  ;;  %v3373_v50 = vpop.f32.mrb[126].mxu0  ;;  %v3712_v23 = vpop.f32.mrb[126].mxu1 }
 0x480   :  { %v3761_v3 = vmax.f32 %v3741_v60, %v3743_v52  ;;  %v3745_v47 = vmax.f32 %v7953_v12, %v3373_v50  ;;  %v3747_v15 = vmax.f32 %v7955_v30, %v3712_v23  ;;  %v3375_v9 = vpop.f32.mrb[127].mxu0  ;;  %v3714_v49 = vpop.f32.mrb[127].mxu1 }
 0x481   :  { %v3762_v48 = vmax.f32 %v3742_v18, %v3744_v56  ;;  %v3746_v21 = vmax.f32 %v7957_v43, %v3375_v9  ;;  %v3748_v11 = vmax.f32 %v7959_v29, %v3714_v49 }
 0x482   :  { %v3789_v58 = vadd.f32 %v7966_v5, %v3761_v3  ;;  %v3763_v40 = vmax.f32 %v3745_v47, %v3747_v15 }
 0x483   :  { %v3790_v51 = vadd.f32 %v7970_v7, %v3762_v48  ;;  %v3764_v59 = vmax.f32 %v3746_v21, %v3748_v11 }
 0x484   :  { %v3791_v13 = vadd.f32 %v7966_v5, %v3763_v40  ;;  %vm3805_vm5 = vcmp.gt.f32.partialorder %v3789_v58, 1.0  ;;  %v4966_v5 = vld [vmem:[%s8151_s6] ss:$0 sm:$0xff] }
 0x485   :  { %v3792_v62 = vadd.f32 %v7970_v7, %v3764_v59  ;;  %vm3806_vm8 = vcmp.gt.f32.partialorder %v3790_v51, 1.0 }
 0x486   :  { %vm3807_vm12 = vcmp.gt.f32.partialorder %v3791_v13, 1.0 }
 0x487   :  { %vm3808_vm11 = vcmp.gt.f32.partialorder %v3792_v62, 1.0  ;;  %vm5045_vm15 = vmpackc.low %vm3807_vm12, %vm3805_vm5 }
 0x488   :  { %vm5043_vm13 = vmpackc.low %vm3808_vm11, %vm3806_vm8 }
 0x489   :  { %5044 = vmatprep.mubr.msk.bf16.mxu1 %vm5043_vm13, %v5721_v16 }
 0x48a   :  { %5046 = vmatmul.mubr.msk.bf16.vlgmr.msra.gmra.mrb[132].mxu1 %vm5045_vm15, %v5721_v16 }
 0x502   :  { %v5065_v12 = vpop.f32.mrb[128].mxu0 }
 0x503   :  { %v5066_v30 = vpop.f32.mrb[129].mxu0 }
 0x504   :  { %v5067_v43 = vadd.f32 %v5066_v30, %v5065_v12  ;;  %v5068_v29 = vpop.f32.mrb[130].mxu0 }
 0x505   :  { %v5069_v14 = vpop.f32.mrb[131].mxu0 }
 0x506   :  { %v5070_v6 = vadd.f32 %v5069_v14, %v5068_v29  ;;  %v4403_v32 = vadd.f32 %v5067_v43, %v4966_v5 }
 0x508   :  { %v4406_v34 = vadd.f32 %v5070_v6, %v4966_v5 }
 0x50a   :  { %v5087_v7 = vpop.f32.mrb[128].mxu1 }
 0x50b   :  { %v5088_v55 = vpop.f32.mrb[129].mxu1 }
 0x50c   :  { %v5089_v46 = vadd.f32 %v5088_v55, %v5087_v7  ;;  %v5090_v53 = vpop.f32.mrb[130].mxu1 }
 0x50d   :  { %v5091_v2 = vpop.f32.mrb[131].mxu1 }
 0x50e   :  { %v4444_v63 = vadd.f32 %v5089_v46, %v4403_v32  ;;  %v5092_v57 = vadd.f32 %v5091_v2, %v5090_v53 }
 0x510   :  { %v4447_v16 = vadd.f32 %v5092_v57, %v4406_v34 }
 0x522   :  { %v5109_v35 = vpop.f32.mrb[132].mxu0 }
 0x523   :  { %v5110_v0 = vpop.f32.mrb[133].mxu0 }
 0x524   :  { %v5111_v31 = vadd.f32 %v5110_v0, %v5109_v35  ;;  %v5112_v42 = vpop.f32.mrb[134].mxu0 }
 0x525   :  { %v5113_v19 = vpop.f32.mrb[135].mxu0 }
 0x526   :  { %v4485_v38 = vadd.f32 %v5111_v31, %v4444_v63  ;;  %v5114_v41 = vadd.f32 %v5113_v19, %v5112_v42 }
 0x528   :  { %v4488_v37 = vadd.f32 %v5114_v41, %v4447_v16 }
 0x55d   :  { %v5131_v54 = vpop.f32.mrb[132].mxu1 }
 0x55e   :  { %v5132_v44 = vpop.f32.mrb[133].mxu1 }
 0x55f   :  { %v5133_v39 = vadd.f32 %v5132_v44, %v5131_v54  ;;  %v5134_v61 = vpop.f32.mrb[134].mxu1 }
 0x560   :  { %v5135_v26 = vpop.f32.mrb[135].mxu1 }
 0x561   :  { %v4526_v27 = vadd.f32 %v5133_v39, %v4485_v38  ;;  %v5136_v22 = vadd.f32 %v5135_v26, %v5134_v61 }
 0x563   :  { %4532 = vst [vmem:[%s8152_s8] sm:$0xff] %v4526_v27  ;;  %vm4534_vm14 = vcmp.gt.f32.partialorder %v4526_v27, 1.0  ;;  %v4529_v20 = vadd.f32 %v5136_v22, %v4488_v37 }
 0x564   :  { %v5047_v10 = vsel %vm4534_vm14, 1.0, %v8331_v45 }
 0x565   :  { %4540 = vst [vmem:[%s8153_s7] sm:$0xff] %v5047_v10  ;;  %4533 = vst [vmem:[%s8152_s8 + $0x8] sm:$0xff] %v4529_v20  ;;  %vm4535_vm0 = vcmp.gt.f32.partialorder %v4529_v20, 1.0 }
 0x566   :  { %v5048_v25 = vsel %vm4535_vm0, 1.0, %v8331_v45 }
 0x567   :  { %4541 = vst [vmem:[%s8153_s7 + $0x8] sm:$0xff] %v5048_v25 }

</bundles_post_ra>
